<compile_context>
chip_gen: v5e
topology: v5e:2x2
jax: 0.10.0
libtpu: 0.0.40
codegen_flags: <defaults>
</compile_context>

<pallas_src>
import functools

import jax
import jax.numpy as jnp
from jax import lax
from jax.experimental import pallas as pl
from jax.experimental.pallas import tpu as pltpu

EPS = 1e-5
VMEM_LIMIT = 48 * 1024 * 1024
REDUCTION_RATIO = 8          # ChannelGate MLP bottleneck ratio
_ROW_CAP = 8192              # target rows (tile_h * W) per block


def _sigmoid(v):
    # tanh formulation: numerically safe for large |v| and maps onto the EUP tanh unit.
    return 0.5 * (jnp.tanh(0.5 * v) + 1.0)


def _largest_divisor_leq(n, cap):
    cap = max(1, min(int(cap), int(n)))
    for d in range(cap, 0, -1):
        if n % d == 0:
            return d
    return 1


# --------------------------------------------------------------------------- #
# Kernel 1: CBAM channel-gate VECTOR (avg+max pool -> shared MLP -> sigmoid)
# gridded over (N, H-tiles); only the (N, 1, C) gate vector is written to HBM.
# --------------------------------------------------------------------------- #
def _pool_mlp_kernel(x_ref, w1_ref, b1_ref, w2_ref, b2_ref, o_ref,
                     sum_acc, max_acc, *, inv_rows):
    h = pl.program_id(1)
    nh = pl.num_programs(1)
    _, th, w, c = x_ref.shape

    @pl.when(h == 0)
    def _init():
        sum_acc[...] = jnp.zeros_like(sum_acc)
        max_acc[...] = jnp.full_like(max_acc, -jnp.inf)

    x2 = x_ref[...].astype(jnp.float32).reshape(th * w, c)
    # mean pool as a ones-vector matmul (MXU); max pool stays on the reduce units.
    ones = jnp.ones((1, th * w), jnp.float32)
    sum_acc[...] += jnp.dot(ones, x2, preferred_element_type=jnp.float32)
    max_acc[...] = jnp.maximum(max_acc[...], jnp.max(x2, axis=0, keepdims=True))

    @pl.when(h == nh - 1)
    def _finish():
        def mlp(v):
            hid = jnp.maximum(
                jnp.dot(v, w1_ref[...], preferred_element_type=jnp.float32) + b1_ref[...],
                0.0)
            return jnp.dot(hid, w2_ref[...], preferred_element_type=jnp.float32) + b2_ref[...]

        gate = _sigmoid(mlp(sum_acc[...] * inv_rows) + mlp(max_acc[...]))   # (1, C)
        o_ref[...] = gate.reshape(1, 1, c)


def _channel_gate_vec(x, p, th):
    N, H, W, C = x.shape
    Cr = p["w1"].shape[1]
    nh = H // th
    kernel = functools.partial(_pool_mlp_kernel, inv_rows=1.0 / float(H * W))
    xmap = lambda n, h: (n, h, 0, 0)
    wmap = lambda n, h: (0, 0)
    return pl.pallas_call(
        kernel,
        out_shape=jax.ShapeDtypeStruct((N, 1, C), jnp.float32),
        grid=(N, nh),
        in_specs=[
            pl.BlockSpec((1, th, W, C), xmap),
            pl.BlockSpec((C, Cr), wmap),
            pl.BlockSpec((1, Cr), wmap),
            pl.BlockSpec((Cr, C), wmap),
            pl.BlockSpec((1, C), wmap),
        ],
        out_specs=pl.BlockSpec((1, 1, C), lambda n, h: (n, 0, 0)),
        scratch_shapes=[pltpu.VMEM((1, C), jnp.float32),
                        pltpu.VMEM((1, C), jnp.float32)],
        compiler_params=pltpu.CompilerParams(
            dimension_semantics=("parallel", "arbitrary"),
            vmem_limit_bytes=VMEM_LIMIT),
    )(x, p["w1"], p["b1"], p["w2"], p["b2"])


# --------------------------------------------------------------------------- #
# Kernel 2: both GridAttentionBlock score maps, fully fused
#   one K=(4*C0+C1) bf16 matmul (theta im2col + phi, channel gates folded into the
#   per-sample weight) -> relu -> block-diag psi -> sigmoid
# --------------------------------------------------------------------------- #
def _scores_kernel(xg_ref, wsc_ref, phb_ref, psw_ref, psb_ref, o_ref):
    _, th2, w2, k = xg_ref.shape
    p = th2 * w2
    inp = xg_ref[...].reshape(p, k)                                       # bf16
    f = jnp.dot(inp, wsc_ref[0], preferred_element_type=jnp.float32) + phb_ref[...]
    f = jnp.maximum(f, 0.0)
    att = jnp.dot(f, psw_ref[...], preferred_element_type=jnp.float32) + psb_ref[...]
    # TODO(synk): output is lane-sparse (last dim 2) but tiny (quarter-res, 2 ch);
    # a (N, 2, H2, W2) layout would need an in-kernel transpose of (P, 2).
    o_ref[...] = _sigmoid(att).reshape(1, th2, w2, 2)


def _attention_scores(xg, wsc, phb, psw, psb, th2):
    N, H2, W2, K = xg.shape
    Ci2 = wsc.shape[2]
    nh = H2 // th2
    xmap = lambda n, h: (n, h, 0, 0)
    cmap = lambda n, h: (0, 0)
    return pl.pallas_call(
        _scores_kernel,
        out_shape=jax.ShapeDtypeStruct((N, H2, W2, 2), jnp.float32),
        grid=(N, nh),
        in_specs=[
            pl.BlockSpec((1, th2, W2, K), xmap),
            pl.BlockSpec((1, K, Ci2), lambda n, h: (n, 0, 0)),
            pl.BlockSpec((1, Ci2), cmap),
            pl.BlockSpec((Ci2, 2), cmap),
            pl.BlockSpec((1, 2), cmap),
        ],
        out_specs=pl.BlockSpec((1, th2, W2, 2), xmap),
        compiler_params=pltpu.CompilerParams(
            dimension_semantics=("parallel", "parallel"),
            vmem_limit_bytes=VMEM_LIMIT),
    )(xg, wsc, phb, psw, psb)


# --------------------------------------------------------------------------- #
# Kernel 3 (pass 1): per-channel sums + Gram blocks of the gated W-conv outputs.
# Gives exact training-mode batch statistics for BOTH BatchNorms analytically.
# --------------------------------------------------------------------------- #
def _wconv_stats_kernel(x_ref, a_ref, w1_ref, w2_ref,
                        s1_ref, s2_ref, g11_ref, g12_ref, g22_ref):
    h = pl.program_id(1)
    _, th, w, c = x_ref.shape
    p = th * w

    @pl.when(h == 0)
    def _init():
        s1_ref[...] = jnp.zeros_like(s1_ref)
        s2_ref[...] = jnp.zeros_like(s2_ref)
        g11_ref[...] = jnp.zeros_like(g11_ref)
        g12_ref[...] = jnp.zeros_like(g12_ref)
        g22_ref[...] = jnp.zeros_like(g22_ref)

    x2 = x_ref[...].reshape(p, c)
    a2 = a_ref[...].reshape(p, 2)
    wy1 = jnp.dot(x2 * a2[:, 0:1], w1_ref[0], preferred_element_type=jnp.float32)
    wy2 = jnp.dot(x2 * a2[:, 1:2], w2_ref[0], preferred_element_type=jnp.float32)
    s1_ref[...] += jnp.sum(wy1, axis=0, keepdims=True).reshape(1, 1, c)
    s2_ref[...] += jnp.sum(wy2, axis=0, keepdims=True).reshape(1, 1, c)
    g11_ref[...] += jnp.dot(wy1.T, wy1, preferred_element_type=jnp.float32).reshape(1, c, c)
    g12_ref[...] += jnp.dot(wy1.T, wy2, preferred_element_type=jnp.float32).reshape(1, c, c)
    g22_ref[...] += jnp.dot(wy2.T, wy2, preferred_element_type=jnp.float32).reshape(1, c, c)


def _wconv_stats(x, att_up, ww1g, ww2g, th):
    N, H, W, C = x.shape
    nh = H // th
    xmap = lambda n, h: (n, h, 0, 0)
    nmap = lambda n, h: (n, 0, 0)
    return pl.pallas_call(
        _wconv_stats_kernel,
        out_shape=(jax.ShapeDtypeStruct((N, 1, C), jnp.float32),
                   jax.ShapeDtypeStruct((N, 1, C), jnp.float32),
                   jax.ShapeDtypeStruct((N, C, C), jnp.float32),
                   jax.ShapeDtypeStruct((N, C, C), jnp.float32),
                   jax.ShapeDtypeStruct((N, C, C), jnp.float32)),
        grid=(N, nh),
        in_specs=[
            pl.BlockSpec((1, th, W, C), xmap),
            pl.BlockSpec((1, th, W, 2), xmap),
            pl.BlockSpec((1, C, C), nmap),
            pl.BlockSpec((1, C, C), nmap),
        ],
        out_specs=(pl.BlockSpec((1, 1, C), nmap),
                   pl.BlockSpec((1, 1, C), nmap),
                   pl.BlockSpec((1, C, C), nmap),
                   pl.BlockSpec((1, C, C), nmap),
                   pl.BlockSpec((1, C, C), nmap)),
        compiler_params=pltpu.CompilerParams(
            dimension_semantics=("parallel", "arbitrary"),
            vmem_limit_bytes=VMEM_LIMIT),
    )(x, att_up, ww1g, ww2g)


# --------------------------------------------------------------------------- #
# Kernel 4 (pass 2): gate x with both attention maps and apply the fully fused
# per-sample affine (W conv + BN1 + combine conv + BN2) + ReLU. Fully parallel.
# --------------------------------------------------------------------------- #
def _gate_combine_kernel(x_ref, a_ref, wa1_ref, wa2_ref, b_ref, o_ref):
    _, th, w, c = x_ref.shape
    p = th * w
    x2 = x_ref[...].reshape(p, c)
    a2 = a_ref[...].reshape(p, 2)
    z = (jnp.dot(x2 * a2[:, 0:1], wa1_ref[0], preferred_element_type=jnp.float32)
         + jnp.dot(x2 * a2[:, 1:2], wa2_ref[0], preferred_element_type=jnp.float32)
         + b_ref[...])
    o_ref[...] = jnp.maximum(z, 0.0).reshape(1, th, w, c)


def _gate_combine_apply(x, att_up, wa1, wa2, bias, th):
    N, H, W, C = x.shape
    nh = H // th
    xmap = lambda n, h: (n, h, 0, 0)
    nmap = lambda n, h: (n, 0, 0)
    return pl.pallas_call(
        _gate_combine_kernel,
        out_shape=jax.ShapeDtypeStruct((N, H, W, C), jnp.float32),
        grid=(N, nh),
        in_specs=[
            pl.BlockSpec((1, th, W, C), xmap),
            pl.BlockSpec((1, th, W, 2), xmap),
            pl.BlockSpec((1, C, C), nmap),
            pl.BlockSpec((1, C, C), nmap),
            pl.BlockSpec((1, C), lambda n, h: (0, 0)),
        ],
        out_specs=pl.BlockSpec((1, th, W, C), xmap),
        compiler_params=pltpu.CompilerParams(
            dimension_semantics=("parallel", "parallel"),
            vmem_limit_bytes=VMEM_LIMIT),
    )(x, att_up, wa1, wa2, bias)


# --------------------------------------------------------------------------- #
# Wrapper: PyTorch-style NCHW in/out
# --------------------------------------------------------------------------- #
def spatial_channel_attention_forward(x_nchw, g_nchw, params, *, row_tile=None):
    """input: (N, filters[0], H, W); gating_signal: (N, filters[1], H/2, W/2)."""
    x = jnp.transpose(x_nchw, (0, 2, 3, 1)).astype(jnp.float32)      # NHWC
    g = jnp.transpose(g_nchw, (0, 2, 3, 1)).astype(jnp.float32)
    N, H, W, C0 = x.shape
    _, Hg, Wg, C1 = g.shape
    H2, W2 = H // 2, W // 2
    b1p, b2p = params["blk1"], params["blk2"]
    Ci = b1p["theta_w"].shape[3]
    # Gating signal is at the theta (stride-2) resolution => phi needs no resampling.
    # TODO(synk): general (Hg, Wg) would additionally need a bilinear resize of phi(g).
    assert (Hg, Wg) == (H2, W2) and H % 2 == 0 and W % 2 == 0

    if row_tile is None:
        th = _largest_divisor_leq(H, max(1, _ROW_CAP // max(W, 1)))
        th2 = _largest_divisor_leq(H2, max(1, _ROW_CAP // max(W2, 1)))
    else:
        th = _largest_divisor_leq(H, row_tile)
        th2 = _largest_divisor_leq(H2, max(1, row_tile // 2))
    hi = lax.Precision.HIGHEST

    # 1) channel-gate vectors only (x_A / g_A never hit HBM)
    gx = _channel_gate_vec(x, params["cg_x"], th)[:, 0, :]           # (N, C0)
    gg = _channel_gate_vec(g, params["cg_g"], th2)[:, 0, :]          # (N, C1)

    # 2) fused theta(2x2/s2, im2col) + phi(1x1) input and per-sample weight.
    # space-to-depth of the raw x is a pure layout op in XLA; the channel gates are
    # folded into the per-sample weight matrix instead of rescaling activations.
    xs = (x.reshape(N, H2, 2, W2, 2, C0)
           .transpose(0, 1, 3, 2, 4, 5)
           .reshape(N, H2, W2, 4 * C0))
    xg = jnp.concatenate([xs, g], axis=-1).astype(jnp.bfloat16)      # (N, H2, W2, 4C0+C1)

    thw = jnp.concatenate([b1p["theta_w"].reshape(4 * C0, Ci),
                           b2p["theta_w"].reshape(4 * C0, Ci)], axis=1)        # (4C0, 2Ci)
    phw = jnp.concatenate([b1p["phi_w"], b2p["phi_w"]], axis=1)                # (C1, 2Ci)
    phb = jnp.concatenate([b1p["phi_b"], b2p["phi_b"]], axis=1)                # (1, 2Ci)
    gx4 = jnp.tile(gx, (1, 4))                                                 # (N, 4C0)
    wsc = jnp.concatenate([gx4[:, :, None] * thw[None],
                           gg[:, :, None] * phw[None]], axis=1).astype(jnp.bfloat16)
    zc = jnp.zeros((Ci, 1), jnp.float32)
    psw = jnp.concatenate([jnp.concatenate([b1p["psi_w"], zc], axis=1),
                           jnp.concatenate([zc, b2p["psi_w"]], axis=1)], axis=0)  # (2Ci, 2)
    psb = jnp.concatenate([b1p["psi_b"], b2p["psi_b"]], axis=1)                # (1, 2)

    att = _attention_scores(xg, wsc, phb, psw, psb, th2)                       # (N,H2,W2,2)

    # 3) bilinear 2x upsample of both attention maps (half-pixel centers).
    # TODO(synk): fuse the fixed 4-tap stencil into the stats/apply kernels (and resolve
    # PyTorch align_corners semantics) to drop this XLA op and its (N,H,W,2) round trip.
    att_up = jax.image.resize(att, (N, H, W, 2), method="bilinear")

    # 4) gate + W(1x1) + BN + combine(1x1) + BN + ReLU as a gridded two-pass pipeline.
    # Channel gates are folded into per-sample W-conv weights; the 1x1 conv biases are
    # dropped because training-mode BN cancels them exactly.
    ww1g = gx[:, :, None] * b1p["W_w"][None]                                   # (N, C0, C0)
    ww2g = gx[:, :, None] * b2p["W_w"][None]

    s1o, s2o, g11, g12, g22 = _wconv_stats(x, att_up, ww1g, ww2g, th)
    R = float(N * H * W)
    S = jnp.concatenate([jnp.sum(s1o[:, 0, :], axis=0), jnp.sum(s2o[:, 0, :], axis=0)])
    M11 = jnp.sum(g11, axis=0)
    M12 = jnp.sum(g12, axis=0)
    M22 = jnp.sum(g22, axis=0)
    M = jnp.concatenate([jnp.concatenate([M11, M12], axis=1),
                         jnp.concatenate([M12.T, M22], axis=1)], axis=0)       # (2C0, 2C0)

    mean1 = S / R
    var1 = jnp.maximum(jnp.diagonal(M) / R - mean1 ** 2, 0.0)      # biased (training BN)
    g1c = jnp.concatenate([b1p["bn_g"][0], b2p["bn_g"][0]])
    be1 = jnp.concatenate([b1p["bn_b"][0], b2p["bn_b"][0]])
    s1 = g1c * lax.rsqrt(var1 + EPS)
    t1 = be1 - mean1 * s1

    comb = params["comb"]
    Wc, cb = comb["w"], comb["b"][0]
    A = s1[:, None] * Wc                                           # BN1 folded into combine
    bvec = jnp.dot(t1, Wc, precision=hi) + cb
    m1A = jnp.dot(mean1, A, precision=hi)
    mean2 = m1A + bvec
    MA = jnp.dot(M / R, A, precision=hi)
    e2 = jnp.sum(A * MA, axis=0) + 2.0 * bvec * m1A + bvec ** 2    # E[z^2] per channel
    var2 = jnp.maximum(e2 - mean2 ** 2, 0.0)
    s2 = comb["bn_g"][0] * lax.rsqrt(var2 + EPS)
    t2 = comb["bn_b"][0] - mean2 * s2
    Afin = A * s2[None, :]
    bfin = (bvec * s2 + t2)[None, :]                               # (1, C0)

    wa1 = jnp.einsum("nij,jk->nik", ww1g, Afin[:C0, :], precision=hi)   # (N, C0, C0)
    wa2 = jnp.einsum("nij,jk->nik", ww2g, Afin[C0:, :], precision=hi)

    out = _gate_combine_apply(x, att_up, wa1, wa2, bfin, th)
    return jnp.transpose(out, (0, 3, 1, 2))                        # back to NCHW


# --------------------------------------------------------------------------- #
# Pure-JAX reference (same math) for validation
# --------------------------------------------------------------------------- #
def ref_forward(x_nchw, g_nchw, params):
    hi = lax.Precision.HIGHEST
    mm = lambda a, b: jnp.dot(a, b, precision=hi)
    x = jnp.transpose(x_nchw, (0, 2, 3, 1)).astype(jnp.float32)
    g = jnp.transpose(g_nchw, (0, 2, 3, 1)).astype(jnp.float32)
    N, H, W, C0 = x.shape

    def channel_gate(h, p):
        avg = jnp.mean(h, axis=(1, 2))
        mx = jnp.max(h, axis=(1, 2))

        def mlp(v):
            return mm(jnp.maximum(mm(v, p["w1"]) + p["b1"], 0.0), p["w2"]) + p["b2"]

        gate = _sigmoid(mlp(avg) + mlp(mx))
        return h * gate[:, None, None, :]

    def bn(h, gamma, beta):
        m = jnp.mean(h, axis=(0, 1, 2), keepdims=True)
        v = jnp.mean((h - m) ** 2, axis=(0, 1, 2), keepdims=True)
        return (h - m) * lax.rsqrt(v + EPS) * gamma + beta

    x_A = channel_gate(x, params["cg_x"])
    g_A = channel_gate(g, params["cg_g"])

    dn = ("NHWC", "HWIO", "NHWC")
    gates = []
    for key in ("blk1", "blk2"):
        p = params[key]
        theta = lax.conv_general_dilated(x_A, p["theta_w"], (2, 2), "VALID",
                                         dimension_numbers=dn, precision=hi)
        phi = jnp.einsum("nhwc,cd->nhwd", g_A, p["phi_w"], precision=hi) + p["phi_b"]
        f = jnp.maximum(theta + phi, 0.0)
        att = _sigmoid(jnp.einsum("nhwc,cd->nhwd", f, p["psi_w"], precision=hi) + p["psi_b"])
        att = jax.image.resize(att, (N, H, W, 1), method="bilinear")
        y = att * x_A
        wy = jnp.einsum("nhwc,cd->nhwd", y, p["W_w"], precision=hi) + p["W_b"]
        gates.append(bn(wy, p["bn_g"], p["bn_b"]))

    cat = jnp.concatenate(gates, axis=-1)
    z = jnp.einsum("nhwc,cd->nhwd", cat, params["comb"]["w"], precision=hi) + params["comb"]["b"]
    out = jnp.maximum(bn(z, params["comb"]["bn_g"], params["comb"]["bn_b"]), 0.0)
    return jnp.transpose(out, (0, 3, 1, 2))


# --------------------------------------------------------------------------- #
# Deterministic synthetic parameters
# (linear / 1x1 conv weights stored as (in, out); theta conv stored in HWIO)
# --------------------------------------------------------------------------- #
def make_params(filters, key):
    C0, C1 = filters
    Ci = C0                               # inter_size = filters[0]
    keys = iter(jax.random.split(key, 24))

    def nrm(shape, scale):
        return (scale * jax.random.normal(next(keys), shape)).astype(jnp.float32)

    def channel_gate_params(C):
        Cr = max(C // REDUCTION_RATIO, 1)
        return {"w1": nrm((C, Cr), 0.3), "b1": nrm((1, Cr), 0.1),
                "w2": nrm((Cr, C), 0.3), "b2": nrm((1, C), 0.1)}

    def gate_block_params():
        return {"theta_w": nrm((2, 2, C0, Ci), 0.15),
                "phi_w": nrm((C1, Ci), 0.15), "phi_b": nrm((1, Ci), 0.1),
                "psi_w": nrm((Ci, 1), 0.3), "psi_b": nrm((1, 1), 0.1),
                "W_w": nrm((C0, C0), 0.15), "W_b": nrm((1, C0), 0.1),
                "bn_g": jnp.linspace(0.8, 1.2, C0, dtype=jnp.float32).reshape(1, C0),
                "bn_b": jnp.linspace(-0.1, 0.1, C0, dtype=jnp.float32).reshape(1, C0)}

    return {
        "cg_x": channel_gate_params(C0),
        "cg_g": channel_gate_params(C1),
        "blk1": gate_block_params(),
        "blk2": gate_block_params(),
        "comb": {"w": nrm((2 * C0, C0), 0.15), "b": nrm((1, C0), 0.1),
                 "bn_g": jnp.linspace(1.1, 0.9, C0, dtype=jnp.float32).reshape(1, C0),
                 "bn_b": jnp.linspace(0.05, -0.05, C0, dtype=jnp.float32).reshape(1, C0)},
    }


if __name__ == "__main__":
    filters = (32, 64)                    # (filters[0], filters[1])
    N, H, W = 2, 16, 16
    Hg, Wg = H // 2, W // 2               # gating signal at half resolution

    key = jax.random.PRNGKey(0)
    kx, kg, kp = jax.random.split(key, 3)
    x = jax.random.normal(kx, (N, filters[0], H, W), dtype=jnp.float32)    # NCHW input
    g = jax.random.normal(kg, (N, filters[1], Hg, Wg), dtype=jnp.float32)  # NCHW gating signal
    params = make_params(filters, kp)

    fwd = jax.jit(spatial_channel_attention_forward, static_argnames=("row_tile",))
    # row_tile=8 forces multi-tile H grids at this small test size so the gridded
    # accumulation paths (pool + BN stats) are exercised; leave None for auto-tiling.
    out = jax.block_until_ready(fwd(x, g, params, row_tile=8))
    ref = jax.block_until_ready(ref_forward(x, g, params))

    max_err = float(jnp.max(jnp.abs(out - ref)))
    assert out.shape == (N, filters[0], H, W)
    assert max_err < 3e-2, f"mismatch vs reference, max abs err = {max_err}"

    print("KERNEL_OK")
</pallas_src>

<mosaic_0001>
module attributes {stable_mosaic.version = 11 : i64} {
  func.func @_pool_mlp_kernel(%arg0: i32, %arg1: i32, %arg2: memref<1x8x16x32xf32, #tpu.memory_space<vmem>>, %arg3: memref<32x4xf32, #tpu.memory_space<vmem>>, %arg4: memref<1x4xf32, #tpu.memory_space<vmem>>, %arg5: memref<4x32xf32, #tpu.memory_space<vmem>>, %arg6: memref<1x32xf32, #tpu.memory_space<vmem>>, %arg7: memref<1x1x32xf32, #tpu.memory_space<vmem>>, %arg8: memref<1x32xf32, #tpu.memory_space<vmem>>, %arg9: memref<1x32xf32, #tpu.memory_space<vmem>>) attributes {dimension_semantics = [#tpu.dimension_semantics<parallel>, #tpu.dimension_semantics<arbitrary>], iteration_bounds = array<i64: 2, 2>, scalar_prefetch = 0 : i64, scratch_operands = 2 : i64, tpu.core_type = #tpu.core_type<tc>, window_params = [{transform_indices = @transform_0, window_bounds = array<i64: 1, 8, 16, 32>}, {pipeline_mode = #tpu.pipeline_mode<synchronous>, transform_indices = @transform_1, window_bounds = array<i64: 32, 4>}, {pipeline_mode = #tpu.pipeline_mode<synchronous>, transform_indices = @transform_2, window_bounds = array<i64: 1, 4>}, {pipeline_mode = #tpu.pipeline_mode<synchronous>, transform_indices = @transform_3, window_bounds = array<i64: 4, 32>}, {pipeline_mode = #tpu.pipeline_mode<synchronous>, transform_indices = @transform_4, window_bounds = array<i64: 1, 32>}, {transform_indices = @transform_5, window_bounds = array<i64: 1, 1, 32>}]} {
    %c0_i32 = arith.constant 0 : i32
    %0 = arith.cmpi eq, %arg1, %c0_i32 : i32
    %1 = arith.extui %0 : i1 to i32
    %c0_i32_0 = arith.constant 0 : i32
    %2 = arith.cmpi ne, %1, %c0_i32_0 : i32
    scf.if %2 {
      %cst_15 = arith.constant 0.000000e+00 : f32
      %18 = vector.broadcast %cst_15 : f32 to vector<1x32xf32>
      %c0_16 = arith.constant 0 : index
      %c0_17 = arith.constant 0 : index
      %19 = vector.load %arg8[%c0_16, %c0_17] : memref<1x32xf32, #tpu.memory_space<vmem>>, vector<1x32xf32>
      tpu.vector_store %arg8[%c0_16, %c0_17], %18 {strides = array<i32>} : memref<1x32xf32, #tpu.memory_space<vmem>>, vector<1x32xf32>,
      %cst_18 = arith.constant 0xFF800000 : f32
      %20 = vector.broadcast %cst_18 : f32 to vector<1x32xf32>
      %c0_19 = arith.constant 0 : index
      %c0_20 = arith.constant 0 : index
      %21 = vector.load %arg9[%c0_19, %c0_20] : memref<1x32xf32, #tpu.memory_space<vmem>>, vector<1x32xf32>
      tpu.vector_store %arg9[%c0_19, %c0_20], %20 {strides = array<i32>} : memref<1x32xf32, #tpu.memory_space<vmem>>, vector<1x32xf32>,
    } else {
    }
    %c0 = arith.constant 0 : index
    %c0_1 = arith.constant 0 : index
    %c0_2 = arith.constant 0 : index
    %c0_3 = arith.constant 0 : index
    %3 = vector.load %arg2[%c0, %c0_1, %c0_2, %c0_3] : memref<1x8x16x32xf32, #tpu.memory_space<vmem>>, vector<1x8x16x32xf32>
    %4 = vector.shape_cast %3 : vector<1x8x16x32xf32> to vector<128x32xf32>
    %cst = arith.constant 1.000000e+00 : f32
    %5 = vector.broadcast %cst : f32 to vector<1x128xf32>
    %c0_4 = arith.constant 0 : index
    %c0_5 = arith.constant 0 : index
    %6 = vector.load %arg8[%c0_4, %c0_5] : memref<1x32xf32, #tpu.memory_space<vmem>>, vector<1x32xf32>
    %cst_6 = arith.constant dense<0.000000e+00> : vector<1x32xf32>
    %7 = tpu.matmul %5, %4, %cst_6 {dimension_numbers = #tpu.dot_dimension_numbers<[1], [0], [0], [1], [0, 0, 1, 1], [], []>} : vector<1x128xf32>, vector<128x32xf32>, vector<1x32xf32> -> vector<1x32xf32>
    %8 = arith.addf %6, %7 : vector<1x32xf32>
    %c0_7 = arith.constant 0 : index
    %c0_8 = arith.constant 0 : index
    %9 = vector.load %arg8[%c0_7, %c0_8] : memref<1x32xf32, #tpu.memory_space<vmem>>, vector<1x32xf32>
    tpu.vector_store %arg8[%c0_7, %c0_8], %8 {strides = array<i32>} : memref<1x32xf32, #tpu.memory_space<vmem>>, vector<1x32xf32>,
    %c0_9 = arith.constant 0 : index
    %c0_10 = arith.constant 0 : index
    %10 = vector.load %arg9[%c0_9, %c0_10] : memref<1x32xf32, #tpu.memory_space<vmem>>, vector<1x32xf32>
    %cst_11 = arith.constant dense<0xFF800000> : vector<32xf32>
    %11 = vector.multi_reduction <maximumf>, %4, %cst_11 [0] : vector<128x32xf32> to vector<32xf32>
    %12 = vector.shape_cast %11 : vector<32xf32> to vector<1x32xf32>
    %13 = arith.maximumf %10, %12 : vector<1x32xf32>
    %c0_12 = arith.constant 0 : index
    %c0_13 = arith.constant 0 : index
    %14 = vector.load %arg9[%c0_12, %c0_13] : memref<1x32xf32, #tpu.memory_space<vmem>>, vector<1x32xf32>
    tpu.vector_store %arg9[%c0_12, %c0_13], %13 {strides = array<i32>} : memref<1x32xf32, #tpu.memory_space<vmem>>, vector<1x32xf32>,
    %c1_i32 = arith.constant 1 : i32
    %15 = arith.cmpi eq, %arg1, %c1_i32 : i32
    %16 = arith.extui %15 : i1 to i32
    %c0_i32_14 = arith.constant 0 : i32
    %17 = arith.cmpi ne, %16, %c0_i32_14 : i32
    scf.if %17 {
      %c0_15 = arith.constant 0 : index
      %c0_16 = arith.constant 0 : index
      %18 = vector.load %arg8[%c0_15, %c0_16] : memref<1x32xf32, #tpu.memory_space<vmem>>, vector<1x32xf32>
      %cst_17 = arith.constant 3.906250e-03 : f32
      %19 = vector.broadcast %cst_17 : f32 to vector<1x32xf32>
      %20 = arith.mulf %18, %19 : vector<1x32xf32>
      %c0_18 = arith.constant 0 : index
      %c0_19 = arith.constant 0 : index
      %21 = vector.load %arg3[%c0_18, %c0_19] : memref<32x4xf32, #tpu.memory_space<vmem>>, vector<32x4xf32>
      %cst_20 = arith.constant dense<0.000000e+00> : vector<1x4xf32>
      %22 = tpu.matmul %20, %21, %cst_20 {dimension_numbers = #tpu.dot_dimension_numbers<[1], [0], [0], [1], [0, 0, 1, 1], [], []>} : vector<1x32xf32>, vector<32x4xf32>, vector<1x4xf32> -> vector<1x4xf32>
      %c0_21 = arith.constant 0 : index
      %c0_22 = arith.constant 0 : index
      %23 = vector.load %arg4[%c0_21, %c0_22] : memref<1x4xf32, #tpu.memory_space<vmem>>, vector<1x4xf32>
      %24 = arith.addf %22, %23 : vector<1x4xf32>
      %cst_23 = arith.constant 0.000000e+00 : f32
      %25 = vector.broadcast %cst_23 : f32 to vector<1x4xf32>
      %26 = arith.maximumf %24, %25 : vector<1x4xf32>
      %c0_24 = arith.constant 0 : index
      %c0_25 = arith.constant 0 : index
      %27 = vector.load %arg5[%c0_24, %c0_25] : memref<4x32xf32, #tpu.memory_space<vmem>>, vector<4x32xf32>
      %cst_26 = arith.constant dense<0.000000e+00> : vector<1x32xf32>
      %28 = tpu.matmul %26, %27, %cst_26 {dimension_numbers = #tpu.dot_dimension_numbers<[1], [0], [0], [1], [0, 0, 1, 1], [], []>} : vector<1x4xf32>, vector<4x32xf32>, vector<1x32xf32> -> vector<1x32xf32>
      %c0_27 = arith.constant 0 : index
      %c0_28 = arith.constant 0 : index
      %29 = vector.load %arg6[%c0_27, %c0_28] : memref<1x32xf32, #tpu.memory_space<vmem>>, vector<1x32xf32>
      %30 = arith.addf %28, %29 : vector<1x32xf32>
      %c0_29 = arith.constant 0 : index
      %c0_30 = arith.constant 0 : index
      %31 = vector.load %arg9[%c0_29, %c0_30] : memref<1x32xf32, #tpu.memory_space<vmem>>, vector<1x32xf32>
      %c0_31 = arith.constant 0 : index
      %c0_32 = arith.constant 0 : index
      %32 = vector.load %arg3[%c0_31, %c0_32] : memref<32x4xf32, #tpu.memory_space<vmem>>, vector<32x4xf32>
      %cst_33 = arith.constant dense<0.000000e+00> : vector<1x4xf32>
      %33 = tpu.matmul %31, %32, %cst_33 {dimension_numbers = #tpu.dot_dimension_numbers<[1], [0], [0], [1], [0, 0, 1, 1], [], []>} : vector<1x32xf32>, vector<32x4xf32>, vector<1x4xf32> -> vector<1x4xf32>
      %c0_34 = arith.constant 0 : index
      %c0_35 = arith.constant 0 : index
      %34 = vector.load %arg4[%c0_34, %c0_35] : memref<1x4xf32, #tpu.memory_space<vmem>>, vector<1x4xf32>
      %35 = arith.addf %33, %34 : vector<1x4xf32>
      %cst_36 = arith.constant 0.000000e+00 : f32
      %36 = vector.broadcast %cst_36 : f32 to vector<1x4xf32>
      %37 = arith.maximumf %35, %36 : vector<1x4xf32>
      %c0_37 = arith.constant 0 : index
      %c0_38 = arith.constant 0 : index
      %38 = vector.load %arg5[%c0_37, %c0_38] : memref<4x32xf32, #tpu.memory_space<vmem>>, vector<4x32xf32>
      %cst_39 = arith.constant dense<0.000000e+00> : vector<1x32xf32>
      %39 = tpu.matmul %37, %38, %cst_39 {dimension_numbers = #tpu.dot_dimension_numbers<[1], [0], [0], [1], [0, 0, 1, 1], [], []>} : vector<1x4xf32>, vector<4x32xf32>, vector<1x32xf32> -> vector<1x32xf32>
      %c0_40 = arith.constant 0 : index
      %c0_41 = arith.constant 0 : index
      %40 = vector.load %arg6[%c0_40, %c0_41] : memref<1x32xf32, #tpu.memory_space<vmem>>, vector<1x32xf32>
      %41 = arith.addf %39, %40 : vector<1x32xf32>
      %42 = arith.addf %30, %41 : vector<1x32xf32>
      %cst_42 = arith.constant 5.000000e-01 : f32
      %43 = vector.broadcast %cst_42 : f32 to vector<1x32xf32>
      %44 = arith.mulf %43, %42 : vector<1x32xf32>
      %45 = math.tanh %44 : vector<1x32xf32>
      %cst_43 = arith.constant 1.000000e+00 : f32
      %46 = vector.broadcast %cst_43 : f32 to vector<1x32xf32>
      %47 = arith.addf %45, %46 : vector<1x32xf32>
      %cst_44 = arith.constant 5.000000e-01 : f32
      %48 = vector.broadcast %cst_44 : f32 to vector<1x32xf32>
      %49 = arith.mulf %48, %47 : vector<1x32xf32>
      %50 = vector.shape_cast %49 : vector<1x32xf32> to vector<1x1x32xf32>
      %c0_45 = arith.constant 0 : index
      %c0_46 = arith.constant 0 : index
      %c0_47 = arith.constant 0 : index
      %51 = vector.load %arg7[%c0_45, %c0_46, %c0_47] : memref<1x1x32xf32, #tpu.memory_space<vmem>>, vector<1x1x32xf32>
      tpu.vector_store %arg7[%c0_45, %c0_46, %c0_47], %50 {strides = array<i32>} : memref<1x1x32xf32, #tpu.memory_space<vmem>>, vector<1x1x32xf32>,
    } else {
    }
    return
  }
  func.func @transform_0(%arg0: i32, %arg1: i32) -> (i32, i32, i32, i32) {
    %c0_i32 = arith.constant 0 : i32
    %c0_i32_0 = arith.constant 0 : i32
    %c0_i32_1 = arith.constant 0 : i32
    return %arg0, %arg1, %c0_i32, %c0_i32_0 : i32, i32, i32, i32
  }
  func.func @transform_1(%arg0: i32, %arg1: i32) -> (i32, i32) {
    %c0_i32 = arith.constant 0 : i32
    %c0_i32_0 = arith.constant 0 : i32
    %c0_i32_1 = arith.constant 0 : i32
    return %c0_i32, %c0_i32_0 : i32, i32
  }
  func.func @transform_2(%arg0: i32, %arg1: i32) -> (i32, i32) {
    %c0_i32 = arith.constant 0 : i32
    %c0_i32_0 = arith.constant 0 : i32
    %c0_i32_1 = arith.constant 0 : i32
    return %c0_i32, %c0_i32_0 : i32, i32
  }
  func.func @transform_3(%arg0: i32, %arg1: i32) -> (i32, i32) {
    %c0_i32 = arith.constant 0 : i32
    %c0_i32_0 = arith.constant 0 : i32
    %c0_i32_1 = arith.constant 0 : i32
    return %c0_i32, %c0_i32_0 : i32, i32
  }
  func.func @transform_4(%arg0: i32, %arg1: i32) -> (i32, i32) {
    %c0_i32 = arith.constant 0 : i32
    %c0_i32_0 = arith.constant 0 : i32
    %c0_i32_1 = arith.constant 0 : i32
    return %c0_i32, %c0_i32_0 : i32, i32
  }
  func.func @transform_5(%arg0: i32, %arg1: i32) -> (i32, i32, i32) {
    %c0_i32 = arith.constant 0 : i32
    %c0_i32_0 = arith.constant 0 : i32
    %c0_i32_1 = arith.constant 0 : i32
    return %arg0, %c0_i32, %c0_i32_0 : i32, i32, i32
  }
}

module attributes {stable_mosaic.version = 11 : i64} {
  func.func @_pool_mlp_kernel(%arg0: i32, %arg1: i32, %arg2: memref<1x4x8x64xf32, #tpu.memory_space<vmem>>, %arg3: memref<64x8xf32, #tpu.memory_space<vmem>>, %arg4: memref<1x8xf32, #tpu.memory_space<vmem>>, %arg5: memref<8x64xf32, #tpu.memory_space<vmem>>, %arg6: memref<1x64xf32, #tpu.memory_space<vmem>>, %arg7: memref<1x1x64xf32, #tpu.memory_space<vmem>>, %arg8: memref<1x64xf32, #tpu.memory_space<vmem>>, %arg9: memref<1x64xf32, #tpu.memory_space<vmem>>) attributes {dimension_semantics = [#tpu.dimension_semantics<parallel>, #tpu.dimension_semantics<arbitrary>], iteration_bounds = array<i64: 2, 2>, scalar_prefetch = 0 : i64, scratch_operands = 2 : i64, tpu.core_type = #tpu.core_type<tc>, window_params = [{transform_indices = @transform_0, window_bounds = array<i64: 1, 4, 8, 64>}, {pipeline_mode = #tpu.pipeline_mode<synchronous>, transform_indices = @transform_1, window_bounds = array<i64: 64, 8>}, {pipeline_mode = #tpu.pipeline_mode<synchronous>, transform_indices = @transform_2, window_bounds = array<i64: 1, 8>}, {pipeline_mode = #tpu.pipeline_mode<synchronous>, transform_indices = @transform_3, window_bounds = array<i64: 8, 64>}, {pipeline_mode = #tpu.pipeline_mode<synchronous>, transform_indices = @transform_4, window_bounds = array<i64: 1, 64>}, {transform_indices = @transform_5, window_bounds = array<i64: 1, 1, 64>}]} {
    %c0_i32 = arith.constant 0 : i32
    %0 = arith.cmpi eq, %arg1, %c0_i32 : i32
    %1 = arith.extui %0 : i1 to i32
    %c0_i32_0 = arith.constant 0 : i32
    %2 = arith.cmpi ne, %1, %c0_i32_0 : i32
    scf.if %2 {
      %cst_15 = arith.constant 0.000000e+00 : f32
      %18 = vector.broadcast %cst_15 : f32 to vector<1x64xf32>
      %c0_16 = arith.constant 0 : index
      %c0_17 = arith.constant 0 : index
      %19 = vector.load %arg8[%c0_16, %c0_17] : memref<1x64xf32, #tpu.memory_space<vmem>>, vector<1x64xf32>
      tpu.vector_store %arg8[%c0_16, %c0_17], %18 {strides = array<i32>} : memref<1x64xf32, #tpu.memory_space<vmem>>, vector<1x64xf32>,
      %cst_18 = arith.constant 0xFF800000 : f32
      %20 = vector.broadcast %cst_18 : f32 to vector<1x64xf32>
      %c0_19 = arith.constant 0 : index
      %c0_20 = arith.constant 0 : index
      %21 = vector.load %arg9[%c0_19, %c0_20] : memref<1x64xf32, #tpu.memory_space<vmem>>, vector<1x64xf32>
      tpu.vector_store %arg9[%c0_19, %c0_20], %20 {strides = array<i32>} : memref<1x64xf32, #tpu.memory_space<vmem>>, vector<1x64xf32>,
    } else {
    }
    %c0 = arith.constant 0 : index
    %c0_1 = arith.constant 0 : index
    %c0_2 = arith.constant 0 : index
    %c0_3 = arith.constant 0 : index
    %3 = vector.load %arg2[%c0, %c0_1, %c0_2, %c0_3] : memref<1x4x8x64xf32, #tpu.memory_space<vmem>>, vector<1x4x8x64xf32>
    %4 = vector.shape_cast %3 : vector<1x4x8x64xf32> to vector<32x64xf32>
    %cst = arith.constant 1.000000e+00 : f32
    %5 = vector.broadcast %cst : f32 to vector<1x32xf32>
    %c0_4 = arith.constant 0 : index
    %c0_5 = arith.constant 0 : index
    %6 = vector.load %arg8[%c0_4, %c0_5] : memref<1x64xf32, #tpu.memory_space<vmem>>, vector<1x64xf32>
    %cst_6 = arith.constant dense<0.000000e+00> : vector<1x64xf32>
    %7 = tpu.matmul %5, %4, %cst_6 {dimension_numbers = #tpu.dot_dimension_numbers<[1], [0], [0], [1], [0, 0, 1, 1], [], []>} : vector<1x32xf32>, vector<32x64xf32>, vector<1x64xf32> -> vector<1x64xf32>
    %8 = arith.addf %6, %7 : vector<1x64xf32>
    %c0_7 = arith.constant 0 : index
    %c0_8 = arith.constant 0 : index
    %9 = vector.load %arg8[%c0_7, %c0_8] : memref<1x64xf32, #tpu.memory_space<vmem>>, vector<1x64xf32>
    tpu.vector_store %arg8[%c0_7, %c0_8], %8 {strides = array<i32>} : memref<1x64xf32, #tpu.memory_space<vmem>>, vector<1x64xf32>,
    %c0_9 = arith.constant 0 : index
    %c0_10 = arith.constant 0 : index
    %10 = vector.load %arg9[%c0_9, %c0_10] : memref<1x64xf32, #tpu.memory_space<vmem>>, vector<1x64xf32>
    %cst_11 = arith.constant dense<0xFF800000> : vector<64xf32>
    %11 = vector.multi_reduction <maximumf>, %4, %cst_11 [0] : vector<32x64xf32> to vector<64xf32>
    %12 = vector.shape_cast %11 : vector<64xf32> to vector<1x64xf32>
    %13 = arith.maximumf %10, %12 : vector<1x64xf32>
    %c0_12 = arith.constant 0 : index
    %c0_13 = arith.constant 0 : index
    %14 = vector.load %arg9[%c0_12, %c0_13] : memref<1x64xf32, #tpu.memory_space<vmem>>, vector<1x64xf32>
    tpu.vector_store %arg9[%c0_12, %c0_13], %13 {strides = array<i32>} : memref<1x64xf32, #tpu.memory_space<vmem>>, vector<1x64xf32>,
    %c1_i32 = arith.constant 1 : i32
    %15 = arith.cmpi eq, %arg1, %c1_i32 : i32
    %16 = arith.extui %15 : i1 to i32
    %c0_i32_14 = arith.constant 0 : i32
    %17 = arith.cmpi ne, %16, %c0_i32_14 : i32
    scf.if %17 {
      %c0_15 = arith.constant 0 : index
      %c0_16 = arith.constant 0 : index
      %18 = vector.load %arg8[%c0_15, %c0_16] : memref<1x64xf32, #tpu.memory_space<vmem>>, vector<1x64xf32>
      %cst_17 = arith.constant 1.562500e-02 : f32
      %19 = vector.broadcast %cst_17 : f32 to vector<1x64xf32>
      %20 = arith.mulf %18, %19 : vector<1x64xf32>
      %c0_18 = arith.constant 0 : index
      %c0_19 = arith.constant 0 : index
      %21 = vector.load %arg3[%c0_18, %c0_19] : memref<64x8xf32, #tpu.memory_space<vmem>>, vector<64x8xf32>
      %cst_20 = arith.constant dense<0.000000e+00> : vector<1x8xf32>
      %22 = tpu.matmul %20, %21, %cst_20 {dimension_numbers = #tpu.dot_dimension_numbers<[1], [0], [0], [1], [0, 0, 1, 1], [], []>} : vector<1x64xf32>, vector<64x8xf32>, vector<1x8xf32> -> vector<1x8xf32>
      %c0_21 = arith.constant 0 : index
      %c0_22 = arith.constant 0 : index
      %23 = vector.load %arg4[%c0_21, %c0_22] : memref<1x8xf32, #tpu.memory_space<vmem>>, vector<1x8xf32>
      %24 = arith.addf %22, %23 : vector<1x8xf32>
      %cst_23 = arith.constant 0.000000e+00 : f32
      %25 = vector.broadcast %cst_23 : f32 to vector<1x8xf32>
      %26 = arith.maximumf %24, %25 : vector<1x8xf32>
      %c0_24 = arith.constant 0 : index
      %c0_25 = arith.constant 0 : index
      %27 = vector.load %arg5[%c0_24, %c0_25] : memref<8x64xf32, #tpu.memory_space<vmem>>, vector<8x64xf32>
      %cst_26 = arith.constant dense<0.000000e+00> : vector<1x64xf32>
      %28 = tpu.matmul %26, %27, %cst_26 {dimension_numbers = #tpu.dot_dimension_numbers<[1], [0], [0], [1], [0, 0, 1, 1], [], []>} : vector<1x8xf32>, vector<8x64xf32>, vector<1x64xf32> -> vector<1x64xf32>
      %c0_27 = arith.constant 0 : index
      %c0_28 = arith.constant 0 : index
      %29 = vector.load %arg6[%c0_27, %c0_28] : memref<1x64xf32, #tpu.memory_space<vmem>>, vector<1x64xf32>
      %30 = arith.addf %28, %29 : vector<1x64xf32>
      %c0_29 = arith.constant 0 : index
      %c0_30 = arith.constant 0 : index
      %31 = vector.load %arg9[%c0_29, %c0_30] : memref<1x64xf32, #tpu.memory_space<vmem>>, vector<1x64xf32>
      %c0_31 = arith.constant 0 : index
      %c0_32 = arith.constant 0 : index
      %32 = vector.load %arg3[%c0_31, %c0_32] : memref<64x8xf32, #tpu.memory_space<vmem>>, vector<64x8xf32>
      %cst_33 = arith.constant dense<0.000000e+00> : vector<1x8xf32>
      %33 = tpu.matmul %31, %32, %cst_33 {dimension_numbers = #tpu.dot_dimension_numbers<[1], [0], [0], [1], [0, 0, 1, 1], [], []>} : vector<1x64xf32>, vector<64x8xf32>, vector<1x8xf32> -> vector<1x8xf32>
      %c0_34 = arith.constant 0 : index
      %c0_35 = arith.constant 0 : index
      %34 = vector.load %arg4[%c0_34, %c0_35] : memref<1x8xf32, #tpu.memory_space<vmem>>, vector<1x8xf32>
      %35 = arith.addf %33, %34 : vector<1x8xf32>
      %cst_36 = arith.constant 0.000000e+00 : f32
      %36 = vector.broadcast %cst_36 : f32 to vector<1x8xf32>
      %37 = arith.maximumf %35, %36 : vector<1x8xf32>
      %c0_37 = arith.constant 0 : index
      %c0_38 = arith.constant 0 : index
      %38 = vector.load %arg5[%c0_37, %c0_38] : memref<8x64xf32, #tpu.memory_space<vmem>>, vector<8x64xf32>
      %cst_39 = arith.constant dense<0.000000e+00> : vector<1x64xf32>
      %39 = tpu.matmul %37, %38, %cst_39 {dimension_numbers = #tpu.dot_dimension_numbers<[1], [0], [0], [1], [0, 0, 1, 1], [], []>} : vector<1x8xf32>, vector<8x64xf32>, vector<1x64xf32> -> vector<1x64xf32>
      %c0_40 = arith.constant 0 : index
      %c0_41 = arith.constant 0 : index
      %40 = vector.load %arg6[%c0_40, %c0_41] : memref<1x64xf32, #tpu.memory_space<vmem>>, vector<1x64xf32>
      %41 = arith.addf %39, %40 : vector<1x64xf32>
      %42 = arith.addf %30, %41 : vector<1x64xf32>
      %cst_42 = arith.constant 5.000000e-01 : f32
      %43 = vector.broadcast %cst_42 : f32 to vector<1x64xf32>
      %44 = arith.mulf %43, %42 : vector<1x64xf32>
      %45 = math.tanh %44 : vector<1x64xf32>
      %cst_43 = arith.constant 1.000000e+00 : f32
      %46 = vector.broadcast %cst_43 : f32 to vector<1x64xf32>
      %47 = arith.addf %45, %46 : vector<1x64xf32>
      %cst_44 = arith.constant 5.000000e-01 : f32
      %48 = vector.broadcast %cst_44 : f32 to vector<1x64xf32>
      %49 = arith.mulf %48, %47 : vector<1x64xf32>
      %50 = vector.shape_cast %49 : vector<1x64xf32> to vector<1x1x64xf32>
      %c0_45 = arith.constant 0 : index
      %c0_46 = arith.constant 0 : index
      %c0_47 = arith.constant 0 : index
      %51 = vector.load %arg7[%c0_45, %c0_46, %c0_47] : memref<1x1x64xf32, #tpu.memory_space<vmem>>, vector<1x1x64xf32>
      tpu.vector_store %arg7[%c0_45, %c0_46, %c0_47], %50 {strides = array<i32>} : memref<1x1x64xf32, #tpu.memory_space<vmem>>, vector<1x1x64xf32>,
    } else {
    }
    return
  }
  func.func @transform_0(%arg0: i32, %arg1: i32) -> (i32, i32, i32, i32) {
    %c0_i32 = arith.constant 0 : i32
    %c0_i32_0 = arith.constant 0 : i32
    %c0_i32_1 = arith.constant 0 : i32
    return %arg0, %arg1, %c0_i32, %c0_i32_0 : i32, i32, i32, i32
  }
  func.func @transform_1(%arg0: i32, %arg1: i32) -> (i32, i32) {
    %c0_i32 = arith.constant 0 : i32
    %c0_i32_0 = arith.constant 0 : i32
    %c0_i32_1 = arith.constant 0 : i32
    return %c0_i32, %c0_i32_0 : i32, i32
  }
  func.func @transform_2(%arg0: i32, %arg1: i32) -> (i32, i32) {
    %c0_i32 = arith.constant 0 : i32
    %c0_i32_0 = arith.constant 0 : i32
    %c0_i32_1 = arith.constant 0 : i32
    return %c0_i32, %c0_i32_0 : i32, i32
  }
  func.func @transform_3(%arg0: i32, %arg1: i32) -> (i32, i32) {
    %c0_i32 = arith.constant 0 : i32
    %c0_i32_0 = arith.constant 0 : i32
    %c0_i32_1 = arith.constant 0 : i32
    return %c0_i32, %c0_i32_0 : i32, i32
  }
  func.func @transform_4(%arg0: i32, %arg1: i32) -> (i32, i32) {
    %c0_i32 = arith.constant 0 : i32
    %c0_i32_0 = arith.constant 0 : i32
    %c0_i32_1 = arith.constant 0 : i32
    return %c0_i32, %c0_i32_0 : i32, i32
  }
  func.func @transform_5(%arg0: i32, %arg1: i32) -> (i32, i32, i32) {
    %c0_i32 = arith.constant 0 : i32
    %c0_i32_0 = arith.constant 0 : i32
    %c0_i32_1 = arith.constant 0 : i32
    return %arg0, %c0_i32, %c0_i32_0 : i32, i32, i32
  }
}

module attributes {stable_mosaic.version = 11 : i64} {
  func.func @_scores_kernel(%arg0: i32, %arg1: i32, %arg2: memref<1x4x8x192xbf16, #tpu.memory_space<vmem>>, %arg3: memref<1x192x64xbf16, #tpu.memory_space<vmem>>, %arg4: memref<1x64xf32, #tpu.memory_space<vmem>>, %arg5: memref<64x2xf32, #tpu.memory_space<vmem>>, %arg6: memref<1x2xf32, #tpu.memory_space<vmem>>, %arg7: memref<1x4x8x2xf32, #tpu.memory_space<vmem>>) attributes {dimension_semantics = [#tpu.dimension_semantics<parallel>, #tpu.dimension_semantics<parallel>], iteration_bounds = array<i64: 2, 2>, scalar_prefetch = 0 : i64, scratch_operands = 0 : i64, tpu.core_type = #tpu.core_type<tc>, window_params = [{transform_indices = @transform_0, window_bounds = array<i64: 1, 4, 8, 192>}, {transform_indices = @transform_1, window_bounds = array<i64: 1, 192, 64>}, {pipeline_mode = #tpu.pipeline_mode<synchronous>, transform_indices = @transform_2, window_bounds = array<i64: 1, 64>}, {pipeline_mode = #tpu.pipeline_mode<synchronous>, transform_indices = @transform_3, window_bounds = array<i64: 64, 2>}, {pipeline_mode = #tpu.pipeline_mode<synchronous>, transform_indices = @transform_4, window_bounds = array<i64: 1, 2>}, {transform_indices = @transform_5, window_bounds = array<i64: 1, 4, 8, 2>}]} {
    %c0 = arith.constant 0 : index
    %c0_0 = arith.constant 0 : index
    %c0_1 = arith.constant 0 : index
    %c0_2 = arith.constant 0 : index
    %0 = vector.load %arg2[%c0, %c0_0, %c0_1, %c0_2] : memref<1x4x8x192xbf16, #tpu.memory_space<vmem>>, vector<1x4x8x192xbf16>
    %1 = vector.shape_cast %0 : vector<1x4x8x192xbf16> to vector<32x192xbf16>
    %c0_3 = arith.constant 0 : index
    %c0_4 = arith.constant 0 : index
    %c0_5 = arith.constant 0 : index
    %2 = vector.load %arg3[%c0_3, %c0_4, %c0_5] : memref<1x192x64xbf16, #tpu.memory_space<vmem>>, vector<1x192x64xbf16>
    %3 = vector.shape_cast %2 : vector<1x192x64xbf16> to vector<192x64xbf16>
    %cst = arith.constant dense<0.000000e+00> : vector<32x64xf32>
    %4 = tpu.matmul %1, %3, %cst {dimension_numbers = #tpu.dot_dimension_numbers<[1], [0], [0], [1], [0, 0, 1, 1], [], []>} : vector<32x192xbf16>, vector<192x64xbf16>, vector<32x64xf32> -> vector<32x64xf32>
    %c0_6 = arith.constant 0 : index
    %c0_7 = arith.constant 0 : index
    %5 = vector.load %arg4[%c0_6, %c0_7] : memref<1x64xf32, #tpu.memory_space<vmem>>, vector<1x64xf32>
    %6 = vector.broadcast %5 : vector<1x64xf32> to vector<32x64xf32>
    %7 = arith.addf %4, %6 : vector<32x64xf32>
    %cst_8 = arith.constant 0.000000e+00 : f32
    %8 = vector.broadcast %cst_8 : f32 to vector<32x64xf32>
    %9 = arith.maximumf %7, %8 : vector<32x64xf32>
    %c0_9 = arith.constant 0 : index
    %c0_10 = arith.constant 0 : index
    %10 = vector.load %arg5[%c0_9, %c0_10] : memref<64x2xf32, #tpu.memory_space<vmem>>, vector<64x2xf32>
    %cst_11 = arith.constant dense<0.000000e+00> : vector<32x2xf32>
    %11 = tpu.matmul %9, %10, %cst_11 {dimension_numbers = #tpu.dot_dimension_numbers<[1], [0], [0], [1], [0, 0, 1, 1], [], []>} : vector<32x64xf32>, vector<64x2xf32>, vector<32x2xf32> -> vector<32x2xf32>
    %c0_12 = arith.constant 0 : index
    %c0_13 = arith.constant 0 : index
    %12 = vector.load %arg6[%c0_12, %c0_13] : memref<1x2xf32, #tpu.memory_space<vmem>>, vector<1x2xf32>
    %13 = vector.broadcast %12 : vector<1x2xf32> to vector<32x2xf32>
    %14 = arith.addf %11, %13 : vector<32x2xf32>
    %cst_14 = arith.constant 5.000000e-01 : f32
    %15 = vector.broadcast %cst_14 : f32 to vector<32x2xf32>
    %16 = arith.mulf %15, %14 : vector<32x2xf32>
    %17 = math.tanh %16 : vector<32x2xf32>
    %cst_15 = arith.constant 1.000000e+00 : f32
    %18 = vector.broadcast %cst_15 : f32 to vector<32x2xf32>
    %19 = arith.addf %17, %18 : vector<32x2xf32>
    %cst_16 = arith.constant 5.000000e-01 : f32
    %20 = vector.broadcast %cst_16 : f32 to vector<32x2xf32>
    %21 = arith.mulf %20, %19 : vector<32x2xf32>
    %22 = vector.shape_cast %21 : vector<32x2xf32> to vector<1x4x8x2xf32>
    %c0_17 = arith.constant 0 : index
    %c0_18 = arith.constant 0 : index
    %c0_19 = arith.constant 0 : index
    %c0_20 = arith.constant 0 : index
    %23 = vector.load %arg7[%c0_17, %c0_18, %c0_19, %c0_20] : memref<1x4x8x2xf32, #tpu.memory_space<vmem>>, vector<1x4x8x2xf32>
    tpu.vector_store %arg7[%c0_17, %c0_18, %c0_19, %c0_20], %22 {strides = array<i32>} : memref<1x4x8x2xf32, #tpu.memory_space<vmem>>, vector<1x4x8x2xf32>,
    return
  }
  func.func @transform_0(%arg0: i32, %arg1: i32) -> (i32, i32, i32, i32) {
    %c0_i32 = arith.constant 0 : i32
    %c0_i32_0 = arith.constant 0 : i32
    %c0_i32_1 = arith.constant 0 : i32
    return %arg0, %arg1, %c0_i32, %c0_i32_0 : i32, i32, i32, i32
  }
  func.func @transform_1(%arg0: i32, %arg1: i32) -> (i32, i32, i32) {
    %c0_i32 = arith.constant 0 : i32
    %c0_i32_0 = arith.constant 0 : i32
    %c0_i32_1 = arith.constant 0 : i32
    return %arg0, %c0_i32, %c0_i32_0 : i32, i32, i32
  }
  func.func @transform_2(%arg0: i32, %arg1: i32) -> (i32, i32) {
    %c0_i32 = arith.constant 0 : i32
    %c0_i32_0 = arith.constant 0 : i32
    %c0_i32_1 = arith.constant 0 : i32
    return %c0_i32, %c0_i32_0 : i32, i32
  }
  func.func @transform_3(%arg0: i32, %arg1: i32) -> (i32, i32) {
    %c0_i32 = arith.constant 0 : i32
    %c0_i32_0 = arith.constant 0 : i32
    %c0_i32_1 = arith.constant 0 : i32
    return %c0_i32, %c0_i32_0 : i32, i32
  }
  func.func @transform_4(%arg0: i32, %arg1: i32) -> (i32, i32) {
    %c0_i32 = arith.constant 0 : i32
    %c0_i32_0 = arith.constant 0 : i32
    %c0_i32_1 = arith.constant 0 : i32
    return %c0_i32, %c0_i32_0 : i32, i32
  }
  func.func @transform_5(%arg0: i32, %arg1: i32) -> (i32, i32, i32, i32) {
    %c0_i32 = arith.constant 0 : i32
    %c0_i32_0 = arith.constant 0 : i32
    %c0_i32_1 = arith.constant 0 : i32
    return %arg0, %arg1, %c0_i32, %c0_i32_0 : i32, i32, i32, i32
  }
}

module attributes {stable_mosaic.version = 11 : i64} {
  func.func @_wconv_stats_kernel(%arg0: i32, %arg1: i32, %arg2: memref<1x8x16x32xf32, #tpu.memory_space<vmem>>, %arg3: memref<1x8x16x2xf32, #tpu.memory_space<vmem>>, %arg4: memref<1x32x32xf32, #tpu.memory_space<vmem>>, %arg5: memref<1x32x32xf32, #tpu.memory_space<vmem>>, %arg6: memref<1x1x32xf32, #tpu.memory_space<vmem>>, %arg7: memref<1x1x32xf32, #tpu.memory_space<vmem>>, %arg8: memref<1x32x32xf32, #tpu.memory_space<vmem>>, %arg9: memref<1x32x32xf32, #tpu.memory_space<vmem>>, %arg10: memref<1x32x32xf32, #tpu.memory_space<vmem>>) attributes {dimension_semantics = [#tpu.dimension_semantics<parallel>, #tpu.dimension_semantics<arbitrary>], iteration_bounds = array<i64: 2, 2>, scalar_prefetch = 0 : i64, scratch_operands = 0 : i64, tpu.core_type = #tpu.core_type<tc>, window_params = [{transform_indices = @transform_0, window_bounds = array<i64: 1, 8, 16, 32>}, {transform_indices = @transform_1, window_bounds = array<i64: 1, 8, 16, 2>}, {transform_indices = @transform_2, window_bounds = array<i64: 1, 32, 32>}, {transform_indices = @transform_3, window_bounds = array<i64: 1, 32, 32>}, {transform_indices = @transform_4, window_bounds = array<i64: 1, 1, 32>}, {transform_indices = @transform_5, window_bounds = array<i64: 1, 1, 32>}, {transform_indices = @transform_6, window_bounds = array<i64: 1, 32, 32>}, {transform_indices = @transform_7, window_bounds = array<i64: 1, 32, 32>}, {transform_indices = @transform_8, window_bounds = array<i64: 1, 32, 32>}]} {
    %c0_i32 = arith.constant 0 : i32
    %0 = arith.cmpi eq, %arg1, %c0_i32 : i32
    %1 = arith.extui %0 : i1 to i32
    %c0_i32_0 = arith.constant 0 : i32
    %2 = arith.cmpi ne, %1, %c0_i32_0 : i32
    scf.if %2 {
      %cst_50 = arith.constant 0.000000e+00 : f32
      %49 = vector.broadcast %cst_50 : f32 to vector<1x1x32xf32>
      %c0_51 = arith.constant 0 : index
      %c0_52 = arith.constant 0 : index
      %c0_53 = arith.constant 0 : index
      %50 = vector.load %arg6[%c0_51, %c0_52, %c0_53] : memref<1x1x32xf32, #tpu.memory_space<vmem>>, vector<1x1x32xf32>
      tpu.vector_store %arg6[%c0_51, %c0_52, %c0_53], %49 {strides = array<i32>} : memref<1x1x32xf32, #tpu.memory_space<vmem>>, vector<1x1x32xf32>,
      %cst_54 = arith.constant 0.000000e+00 : f32
      %51 = vector.broadcast %cst_54 : f32 to vector<1x1x32xf32>
      %c0_55 = arith.constant 0 : index
      %c0_56 = arith.constant 0 : index
      %c0_57 = arith.constant 0 : index
      %52 = vector.load %arg7[%c0_55, %c0_56, %c0_57] : memref<1x1x32xf32, #tpu.memory_space<vmem>>, vector<1x1x32xf32>
      tpu.vector_store %arg7[%c0_55, %c0_56, %c0_57], %51 {strides = array<i32>} : memref<1x1x32xf32, #tpu.memory_space<vmem>>, vector<1x1x32xf32>,
      %cst_58 = arith.constant 0.000000e+00 : f32
      %53 = vector.broadcast %cst_58 : f32 to vector<1x32x32xf32>
      %c0_59 = arith.constant 0 : index
      %c0_60 = arith.constant 0 : index
      %c0_61 = arith.constant 0 : index
      %54 = vector.load %arg8[%c0_59, %c0_60, %c0_61] : memref<1x32x32xf32, #tpu.memory_space<vmem>>, vector<1x32x32xf32>
      tpu.vector_store %arg8[%c0_59, %c0_60, %c0_61], %53 {strides = array<i32>} : memref<1x32x32xf32, #tpu.memory_space<vmem>>, vector<1x32x32xf32>,
      %cst_62 = arith.constant 0.000000e+00 : f32
      %55 = vector.broadcast %cst_62 : f32 to vector<1x32x32xf32>
      %c0_63 = arith.constant 0 : index
      %c0_64 = arith.constant 0 : index
      %c0_65 = arith.constant 0 : index
      %56 = vector.load %arg9[%c0_63, %c0_64, %c0_65] : memref<1x32x32xf32, #tpu.memory_space<vmem>>, vector<1x32x32xf32>
      tpu.vector_store %arg9[%c0_63, %c0_64, %c0_65], %55 {strides = array<i32>} : memref<1x32x32xf32, #tpu.memory_space<vmem>>, vector<1x32x32xf32>,
      %cst_66 = arith.constant 0.000000e+00 : f32
      %57 = vector.broadcast %cst_66 : f32 to vector<1x32x32xf32>
      %c0_67 = arith.constant 0 : index
      %c0_68 = arith.constant 0 : index
      %c0_69 = arith.constant 0 : index
      %58 = vector.load %arg10[%c0_67, %c0_68, %c0_69] : memref<1x32x32xf32, #tpu.memory_space<vmem>>, vector<1x32x32xf32>
      tpu.vector_store %arg10[%c0_67, %c0_68, %c0_69], %57 {strides = array<i32>} : memref<1x32x32xf32, #tpu.memory_space<vmem>>, vector<1x32x32xf32>,
    } else {
    }
    %c0 = arith.constant 0 : index
    %c0_1 = arith.constant 0 : index
    %c0_2 = arith.constant 0 : index
    %c0_3 = arith.constant 0 : index
    %3 = vector.load %arg2[%c0, %c0_1, %c0_2, %c0_3] : memref<1x8x16x32xf32, #tpu.memory_space<vmem>>, vector<1x8x16x32xf32>
    %4 = vector.shape_cast %3 : vector<1x8x16x32xf32> to vector<128x32xf32>
    %c0_4 = arith.constant 0 : index
    %c0_5 = arith.constant 0 : index
    %c0_6 = arith.constant 0 : index
    %c0_7 = arith.constant 0 : index
    %5 = vector.load %arg3[%c0_4, %c0_5, %c0_6, %c0_7] : memref<1x8x16x2xf32, #tpu.memory_space<vmem>>, vector<1x8x16x2xf32>
    %6 = vector.shape_cast %5 : vector<1x8x16x2xf32> to vector<128x2xf32>
    %7 = vector.extract_strided_slice %6 {offsets = [0, 0], sizes = [128, 1], strides = [1, 1]} : vector<128x2xf32> to vector<128x1xf32>
    %8 = vector.broadcast %7 : vector<128x1xf32> to vector<128x32xf32>
    %9 = arith.mulf %4, %8 : vector<128x32xf32>
    %c0_8 = arith.constant 0 : index
    %c0_9 = arith.constant 0 : index
    %c0_10 = arith.constant 0 : index
    %10 = vector.load %arg4[%c0_8, %c0_9, %c0_10] : memref<1x32x32xf32, #tpu.memory_space<vmem>>, vector<1x32x32xf32>
    %11 = vector.shape_cast %10 : vector<1x32x32xf32> to vector<32x32xf32>
    %cst = arith.constant dense<0.000000e+00> : vector<128x32xf32>
    %12 = tpu.matmul %9, %11, %cst {dimension_numbers = #tpu.dot_dimension_numbers<[1], [0], [0], [1], [0, 0, 1, 1], [], []>} : vector<128x32xf32>, vector<32x32xf32>, vector<128x32xf32> -> vector<128x32xf32>
    %13 = vector.extract_strided_slice %6 {offsets = [0, 1], sizes = [128, 1], strides = [1, 1]} : vector<128x2xf32> to vector<128x1xf32>
    %14 = vector.broadcast %13 : vector<128x1xf32> to vector<128x32xf32>
    %15 = arith.mulf %4, %14 : vector<128x32xf32>
    %c0_11 = arith.constant 0 : index
    %c0_12 = arith.constant 0 : index
    %c0_13 = arith.constant 0 : index
    %16 = vector.load %arg5[%c0_11, %c0_12, %c0_13] : memref<1x32x32xf32, #tpu.memory_space<vmem>>, vector<1x32x32xf32>
    %17 = vector.shape_cast %16 : vector<1x32x32xf32> to vector<32x32xf32>
    %cst_14 = arith.constant dense<0.000000e+00> : vector<128x32xf32>
    %18 = tpu.matmul %15, %17, %cst_14 {dimension_numbers = #tpu.dot_dimension_numbers<[1], [0], [0], [1], [0, 0, 1, 1], [], []>} : vector<128x32xf32>, vector<32x32xf32>, vector<128x32xf32> -> vector<128x32xf32>
    %c0_15 = arith.constant 0 : index
    %c0_16 = arith.constant 0 : index
    %c0_17 = arith.constant 0 : index
    %19 = vector.load %arg6[%c0_15, %c0_16, %c0_17] : memref<1x1x32xf32, #tpu.memory_space<vmem>>, vector<1x1x32xf32>
    %cst_18 = arith.constant dense<0.000000e+00> : vector<32xf32>
    %20 = vector.multi_reduction <add>, %12, %cst_18 [0] : vector<128x32xf32> to vector<32xf32>
    %21 = vector.shape_cast %20 : vector<32xf32> to vector<1x32xf32>
    %22 = vector.shape_cast %21 : vector<1x32xf32> to vector<1x1x32xf32>
    %23 = arith.addf %19, %22 : vector<1x1x32xf32>
    %c0_19 = arith.constant 0 : index
    %c0_20 = arith.constant 0 : index
    %c0_21 = arith.constant 0 : index
    %24 = vector.load %arg6[%c0_19, %c0_20, %c0_21] : memref<1x1x32xf32, #tpu.memory_space<vmem>>, vector<1x1x32xf32>
    tpu.vector_store %arg6[%c0_19, %c0_20, %c0_21], %23 {strides = array<i32>} : memref<1x1x32xf32, #tpu.memory_space<vmem>>, vector<1x1x32xf32>,
    %c0_22 = arith.constant 0 : index
    %c0_23 = arith.constant 0 : index
    %c0_24 = arith.constant 0 : index
    %25 = vector.load %arg7[%c0_22, %c0_23, %c0_24] : memref<1x1x32xf32, #tpu.memory_space<vmem>>, vector<1x1x32xf32>
    %cst_25 = arith.constant dense<0.000000e+00> : vector<32xf32>
    %26 = vector.multi_reduction <add>, %18, %cst_25 [0] : vector<128x32xf32> to vector<32xf32>
    %27 = vector.shape_cast %26 : vector<32xf32> to vector<1x32xf32>
    %28 = vector.shape_cast %27 : vector<1x32xf32> to vector<1x1x32xf32>
    %29 = arith.addf %25, %28 : vector<1x1x32xf32>
    %c0_26 = arith.constant 0 : index
    %c0_27 = arith.constant 0 : index
    %c0_28 = arith.constant 0 : index
    %30 = vector.load %arg7[%c0_26, %c0_27, %c0_28] : memref<1x1x32xf32, #tpu.memory_space<vmem>>, vector<1x1x32xf32>
    tpu.vector_store %arg7[%c0_26, %c0_27, %c0_28], %29 {strides = array<i32>} : memref<1x1x32xf32, #tpu.memory_space<vmem>>, vector<1x1x32xf32>,
    %c0_29 = arith.constant 0 : index
    %c0_30 = arith.constant 0 : index
    %c0_31 = arith.constant 0 : index
    %31 = vector.load %arg8[%c0_29, %c0_30, %c0_31] : memref<1x32x32xf32, #tpu.memory_space<vmem>>, vector<1x32x32xf32>
    %32 = tpu.transpose %12, [1, 0] : vector<128x32xf32> -> vector<32x128xf32>
    %cst_32 = arith.constant dense<0.000000e+00> : vector<32x32xf32>
    %33 = tpu.matmul %32, %12, %cst_32 {dimension_numbers = #tpu.dot_dimension_numbers<[1], [0], [0], [1], [0, 0, 1, 1], [], []>} : vector<32x128xf32>, vector<128x32xf32>, vector<32x32xf32> -> vector<32x32xf32>
    %34 = vector.shape_cast %33 : vector<32x32xf32> to vector<1x32x32xf32>
    %35 = arith.addf %31, %34 : vector<1x32x32xf32>
    %c0_33 = arith.constant 0 : index
    %c0_34 = arith.constant 0 : index
    %c0_35 = arith.constant 0 : index
    %36 = vector.load %arg8[%c0_33, %c0_34, %c0_35] : memref<1x32x32xf32, #tpu.memory_space<vmem>>, vector<1x32x32xf32>
    tpu.vector_store %arg8[%c0_33, %c0_34, %c0_35], %35 {strides = array<i32>} : memref<1x32x32xf32, #tpu.memory_space<vmem>>, vector<1x32x32xf32>,
    %c0_36 = arith.constant 0 : index
    %c0_37 = arith.constant 0 : index
    %c0_38 = arith.constant 0 : index
    %37 = vector.load %arg9[%c0_36, %c0_37, %c0_38] : memref<1x32x32xf32, #tpu.memory_space<vmem>>, vector<1x32x32xf32>
    %38 = tpu.transpose %12, [1, 0] : vector<128x32xf32> -> vector<32x128xf32>
    %cst_39 = arith.constant dense<0.000000e+00> : vector<32x32xf32>
    %39 = tpu.matmul %38, %18, %cst_39 {dimension_numbers = #tpu.dot_dimension_numbers<[1], [0], [0], [1], [0, 0, 1, 1], [], []>} : vector<32x128xf32>, vector<128x32xf32>, vector<32x32xf32> -> vector<32x32xf32>
    %40 = vector.shape_cast %39 : vector<32x32xf32> to vector<1x32x32xf32>
    %41 = arith.addf %37, %40 : vector<1x32x32xf32>
    %c0_40 = arith.constant 0 : index
    %c0_41 = arith.constant 0 : index
    %c0_42 = arith.constant 0 : index
    %42 = vector.load %arg9[%c0_40, %c0_41, %c0_42] : memref<1x32x32xf32, #tpu.memory_space<vmem>>, vector<1x32x32xf32>
    tpu.vector_store %arg9[%c0_40, %c0_41, %c0_42], %41 {strides = array<i32>} : memref<1x32x32xf32, #tpu.memory_space<vmem>>, vector<1x32x32xf32>,
    %c0_43 = arith.constant 0 : index
    %c0_44 = arith.constant 0 : index
    %c0_45 = arith.constant 0 : index
    %43 = vector.load %arg10[%c0_43, %c0_44, %c0_45] : memref<1x32x32xf32, #tpu.memory_space<vmem>>, vector<1x32x32xf32>
    %44 = tpu.transpose %18, [1, 0] : vector<128x32xf32> -> vector<32x128xf32>
    %cst_46 = arith.constant dense<0.000000e+00> : vector<32x32xf32>
    %45 = tpu.matmul %44, %18, %cst_46 {dimension_numbers = #tpu.dot_dimension_numbers<[1], [0], [0], [1], [0, 0, 1, 1], [], []>} : vector<32x128xf32>, vector<128x32xf32>, vector<32x32xf32> -> vector<32x32xf32>
    %46 = vector.shape_cast %45 : vector<32x32xf32> to vector<1x32x32xf32>
    %47 = arith.addf %43, %46 : vector<1x32x32xf32>
    %c0_47 = arith.constant 0 : index
    %c0_48 = arith.constant 0 : index
    %c0_49 = arith.constant 0 : index
    %48 = vector.load %arg10[%c0_47, %c0_48, %c0_49] : memref<1x32x32xf32, #tpu.memory_space<vmem>>, vector<1x32x32xf32>
    tpu.vector_store %arg10[%c0_47, %c0_48, %c0_49], %47 {strides = array<i32>} : memref<1x32x32xf32, #tpu.memory_space<vmem>>, vector<1x32x32xf32>,
    return
  }
  func.func @transform_0(%arg0: i32, %arg1: i32) -> (i32, i32, i32, i32) {
    %c0_i32 = arith.constant 0 : i32
    %c0_i32_0 = arith.constant 0 : i32
    %c0_i32_1 = arith.constant 0 : i32
    return %arg0, %arg1, %c0_i32, %c0_i32_0 : i32, i32, i32, i32
  }
  func.func @transform_1(%arg0: i32, %arg1: i32) -> (i32, i32, i32, i32) {
    %c0_i32 = arith.constant 0 : i32
    %c0_i32_0 = arith.constant 0 : i32
    %c0_i32_1 = arith.constant 0 : i32
    return %arg0, %arg1, %c0_i32, %c0_i32_0 : i32, i32, i32, i32
  }
  func.func @transform_2(%arg0: i32, %arg1: i32) -> (i32, i32, i32) {
    %c0_i32 = arith.constant 0 : i32
    %c0_i32_0 = arith.constant 0 : i32
    %c0_i32_1 = arith.constant 0 : i32
    return %arg0, %c0_i32, %c0_i32_0 : i32, i32, i32
  }
  func.func @transform_3(%arg0: i32, %arg1: i32) -> (i32, i32, i32) {
    %c0_i32 = arith.constant 0 : i32
    %c0_i32_0 = arith.constant 0 : i32
    %c0_i32_1 = arith.constant 0 : i32
    return %arg0, %c0_i32, %c0_i32_0 : i32, i32, i32
  }
  func.func @transform_4(%arg0: i32, %arg1: i32) -> (i32, i32, i32) {
    %c0_i32 = arith.constant 0 : i32
    %c0_i32_0 = arith.constant 0 : i32
    %c0_i32_1 = arith.constant 0 : i32
    return %arg0, %c0_i32, %c0_i32_0 : i32, i32, i32
  }
  func.func @transform_5(%arg0: i32, %arg1: i32) -> (i32, i32, i32) {
    %c0_i32 = arith.constant 0 : i32
    %c0_i32_0 = arith.constant 0 : i32
    %c0_i32_1 = arith.constant 0 : i32
    return %arg0, %c0_i32, %c0_i32_0 : i32, i32, i32
  }
  func.func @transform_6(%arg0: i32, %arg1: i32) -> (i32, i32, i32) {
    %c0_i32 = arith.constant 0 : i32
    %c0_i32_0 = arith.constant 0 : i32
    %c0_i32_1 = arith.constant 0 : i32
    return %arg0, %c0_i32, %c0_i32_0 : i32, i32, i32
  }
  func.func @transform_7(%arg0: i32, %arg1: i32) -> (i32, i32, i32) {
    %c0_i32 = arith.constant 0 : i32
    %c0_i32_0 = arith.constant 0 : i32
    %c0_i32_1 = arith.constant 0 : i32
    return %arg0, %c0_i32, %c0_i32_0 : i32, i32, i32
  }
  func.func @transform_8(%arg0: i32, %arg1: i32) -> (i32, i32, i32) {
    %c0_i32 = arith.constant 0 : i32
    %c0_i32_0 = arith.constant 0 : i32
    %c0_i32_1 = arith.constant 0 : i32
    return %arg0, %c0_i32, %c0_i32_0 : i32, i32, i32
  }
}

module attributes {stable_mosaic.version = 11 : i64} {
  func.func @_gate_combine_kernel(%arg0: i32, %arg1: i32, %arg2: memref<1x8x16x32xf32, #tpu.memory_space<vmem>>, %arg3: memref<1x8x16x2xf32, #tpu.memory_space<vmem>>, %arg4: memref<1x32x32xf32, #tpu.memory_space<vmem>>, %arg5: memref<1x32x32xf32, #tpu.memory_space<vmem>>, %arg6: memref<1x32xf32, #tpu.memory_space<vmem>>, %arg7: memref<1x8x16x32xf32, #tpu.memory_space<vmem>>) attributes {dimension_semantics = [#tpu.dimension_semantics<parallel>, #tpu.dimension_semantics<parallel>], iteration_bounds = array<i64: 2, 2>, scalar_prefetch = 0 : i64, scratch_operands = 0 : i64, tpu.core_type = #tpu.core_type<tc>, window_params = [{transform_indices = @transform_0, window_bounds = array<i64: 1, 8, 16, 32>}, {transform_indices = @transform_1, window_bounds = array<i64: 1, 8, 16, 2>}, {transform_indices = @transform_2, window_bounds = array<i64: 1, 32, 32>}, {transform_indices = @transform_3, window_bounds = array<i64: 1, 32, 32>}, {pipeline_mode = #tpu.pipeline_mode<synchronous>, transform_indices = @transform_4, window_bounds = array<i64: 1, 32>}, {transform_indices = @transform_5, window_bounds = array<i64: 1, 8, 16, 32>}]} {
    %c0 = arith.constant 0 : index
    %c0_0 = arith.constant 0 : index
    %c0_1 = arith.constant 0 : index
    %c0_2 = arith.constant 0 : index
    %0 = vector.load %arg2[%c0, %c0_0, %c0_1, %c0_2] : memref<1x8x16x32xf32, #tpu.memory_space<vmem>>, vector<1x8x16x32xf32>
    %1 = vector.shape_cast %0 : vector<1x8x16x32xf32> to vector<128x32xf32>
    %c0_3 = arith.constant 0 : index
    %c0_4 = arith.constant 0 : index
    %c0_5 = arith.constant 0 : index
    %c0_6 = arith.constant 0 : index
    %2 = vector.load %arg3[%c0_3, %c0_4, %c0_5, %c0_6] : memref<1x8x16x2xf32, #tpu.memory_space<vmem>>, vector<1x8x16x2xf32>
    %3 = vector.shape_cast %2 : vector<1x8x16x2xf32> to vector<128x2xf32>
    %4 = vector.extract_strided_slice %3 {offsets = [0, 0], sizes = [128, 1], strides = [1, 1]} : vector<128x2xf32> to vector<128x1xf32>
    %5 = vector.broadcast %4 : vector<128x1xf32> to vector<128x32xf32>
    %6 = arith.mulf %1, %5 : vector<128x32xf32>
    %c0_7 = arith.constant 0 : index
    %c0_8 = arith.constant 0 : index
    %c0_9 = arith.constant 0 : index
    %7 = vector.load %arg4[%c0_7, %c0_8, %c0_9] : memref<1x32x32xf32, #tpu.memory_space<vmem>>, vector<1x32x32xf32>
    %8 = vector.shape_cast %7 : vector<1x32x32xf32> to vector<32x32xf32>
    %cst = arith.constant dense<0.000000e+00> : vector<128x32xf32>
    %9 = tpu.matmul %6, %8, %cst {dimension_numbers = #tpu.dot_dimension_numbers<[1], [0], [0], [1], [0, 0, 1, 1], [], []>} : vector<128x32xf32>, vector<32x32xf32>, vector<128x32xf32> -> vector<128x32xf32>
    %10 = vector.extract_strided_slice %3 {offsets = [0, 1], sizes = [128, 1], strides = [1, 1]} : vector<128x2xf32> to vector<128x1xf32>
    %11 = vector.broadcast %10 : vector<128x1xf32> to vector<128x32xf32>
    %12 = arith.mulf %1, %11 : vector<128x32xf32>
    %c0_10 = arith.constant 0 : index
    %c0_11 = arith.constant 0 : index
    %c0_12 = arith.constant 0 : index
    %13 = vector.load %arg5[%c0_10, %c0_11, %c0_12] : memref<1x32x32xf32, #tpu.memory_space<vmem>>, vector<1x32x32xf32>
    %14 = vector.shape_cast %13 : vector<1x32x32xf32> to vector<32x32xf32>
    %cst_13 = arith.constant dense<0.000000e+00> : vector<128x32xf32>
    %15 = tpu.matmul %12, %14, %cst_13 {dimension_numbers = #tpu.dot_dimension_numbers<[1], [0], [0], [1], [0, 0, 1, 1], [], []>} : vector<128x32xf32>, vector<32x32xf32>, vector<128x32xf32> -> vector<128x32xf32>
    %16 = arith.addf %9, %15 : vector<128x32xf32>
    %c0_14 = arith.constant 0 : index
    %c0_15 = arith.constant 0 : index
    %17 = vector.load %arg6[%c0_14, %c0_15] : memref<1x32xf32, #tpu.memory_space<vmem>>, vector<1x32xf32>
    %18 = vector.broadcast %17 : vector<1x32xf32> to vector<128x32xf32>
    %19 = arith.addf %16, %18 : vector<128x32xf32>
    %cst_16 = arith.constant 0.000000e+00 : f32
    %20 = vector.broadcast %cst_16 : f32 to vector<128x32xf32>
    %21 = arith.maximumf %19, %20 : vector<128x32xf32>
    %22 = vector.shape_cast %21 : vector<128x32xf32> to vector<1x8x16x32xf32>
    %c0_17 = arith.constant 0 : index
    %c0_18 = arith.constant 0 : index
    %c0_19 = arith.constant 0 : index
    %c0_20 = arith.constant 0 : index
    %23 = vector.load %arg7[%c0_17, %c0_18, %c0_19, %c0_20] : memref<1x8x16x32xf32, #tpu.memory_space<vmem>>, vector<1x8x16x32xf32>
    tpu.vector_store %arg7[%c0_17, %c0_18, %c0_19, %c0_20], %22 {strides = array<i32>} : memref<1x8x16x32xf32, #tpu.memory_space<vmem>>, vector<1x8x16x32xf32>,
    return
  }
  func.func @transform_0(%arg0: i32, %arg1: i32) -> (i32, i32, i32, i32) {
    %c0_i32 = arith.constant 0 : i32
    %c0_i32_0 = arith.constant 0 : i32
    %c0_i32_1 = arith.constant 0 : i32
    return %arg0, %arg1, %c0_i32, %c0_i32_0 : i32, i32, i32, i32
  }
  func.func @transform_1(%arg0: i32, %arg1: i32) -> (i32, i32, i32, i32) {
    %c0_i32 = arith.constant 0 : i32
    %c0_i32_0 = arith.constant 0 : i32
    %c0_i32_1 = arith.constant 0 : i32
    return %arg0, %arg1, %c0_i32, %c0_i32_0 : i32, i32, i32, i32
  }
  func.func @transform_2(%arg0: i32, %arg1: i32) -> (i32, i32, i32) {
    %c0_i32 = arith.constant 0 : i32
    %c0_i32_0 = arith.constant 0 : i32
    %c0_i32_1 = arith.constant 0 : i32
    return %arg0, %c0_i32, %c0_i32_0 : i32, i32, i32
  }
  func.func @transform_3(%arg0: i32, %arg1: i32) -> (i32, i32, i32) {
    %c0_i32 = arith.constant 0 : i32
    %c0_i32_0 = arith.constant 0 : i32
    %c0_i32_1 = arith.constant 0 : i32
    return %arg0, %c0_i32, %c0_i32_0 : i32, i32, i32
  }
  func.func @transform_4(%arg0: i32, %arg1: i32) -> (i32, i32) {
    %c0_i32 = arith.constant 0 : i32
    %c0_i32_0 = arith.constant 0 : i32
    %c0_i32_1 = arith.constant 0 : i32
    return %c0_i32, %c0_i32_0 : i32, i32
  }
  func.func @transform_5(%arg0: i32, %arg1: i32) -> (i32, i32, i32, i32) {
    %c0_i32 = arith.constant 0 : i32
    %c0_i32_0 = arith.constant 0 : i32
    %c0_i32_1 = arith.constant 0 : i32
    return %arg0, %arg1, %c0_i32, %c0_i32_0 : i32, i32, i32, i32
  }
}

</mosaic_0001>

<bundles_post_ra>
// kernel: spatial_channel_attention_forward.6
= control target key start
LH: loop header
LB: loop body
LE: loop exit
PB: predicated region body
PF: predicated region fallthrough
CT: control target
= control target key end

     0   :  { %s623_s18 = smov 0   ;;  %s625_s19 = smov 0   ;;  %s730_s0 = inlined_call_operand.vmem [shape: f32[2,8,8,64], index: 0, kind: input, shape index: {}]   ;;  %s731_s1 = inlined_call_operand.vmem [shape: f32[64,8], index: 1, kind: input, shape index: {}]   ;;  %s732_s2 = inlined_call_operand.vmem [shape: f32[1,8], index: 2, kind: input, shape index: {}]   ;;  %s733_s3 = inlined_call_operand.vmem [shape: f32[8,64], index: 3, kind: input, shape index: {}]   ;;  %s734_s4 = inlined_call_operand.vmem [shape: f32[1,64], index: 4, kind: input, shape index: {}]   ;;  %s735_s5 = inlined_call_operand.vmem [shape: f32[2,1,64], index: 5, kind: output, shape index: {}]  }
   0x1   :  { %s627_s20 = smov 0   ;;  %s629_s21 = smov 0  }
   0x2   :  { %s631_s22 = smov 0  }
   0x3 LB: > { %s24_s23 = sadd.s32 1, %s580_s20  ;;  %s27_s24 = sadd.s32 1, %s584_s21  ;;  %s588_s22 = sphi %s631_s22, %s15_s22   ;;  %s584_s21 = sphi %s629_s21, %s739_s21   ;;  %s580_s20 = sphi %s627_s20, %s738_s20   ;;  %s576_s19 = sphi %s625_s19, %s737_s19   ;;  %s572_s18 = sphi %s623_s18, %s736_s18  }
   0x4   : > { %p25_p0 = scmp.ge.s32.totalorder %s24_s23, 2  ;;  %p492_p1 = scmp.ge.s32.totalorder %s588_s22, 1 }
   0x5   : > { %p206_p2 = scmp.lt.s32.totalorder %s588_s22, 5 }
   0x6   : > { %s741_s23 = smov (%p25_p0, %s24_s23), 0  ;;  %s743_s24 = smov (!%p25_p0, %s27_s24), %s584_s21 }
   0x7   : > { %p207_p3 = pnand %p492_p1, %p206_p2  ;;  %p29_p4 = scmp.ge.s32.totalorder %s743_s24, 2 }
   0x8   : > { %s493_s25 = sshll.u32 (!%p207_p3), %s572_s18, 2  ;;  %p237_p5 = scmp.lt.s32.totalorder (!%p207_p3), %s576_s19, 1 }
   0x9   : > { %s745_s24 = smov (%p29_p4, %s743_s24), 0  ;;  %210 = sbr.rel (%p207_p3) target bundleno = 463 (0x1cf), region = 40 }
   0xa   : > { %p239_p6 = scmp.lt.s32.totalorder (!%p207_p3), %s493_s25, 7  ;;  %p496_p7 = scmp.ne.s32.totalorder (!%p207_p3), %s572_s18, 0 }
   0xe   : > { %s747_s19 = smov (!%p237_p5, %s576_s19), 1  ;;  %s749_s25 = smov (!%p239_p6, %s493_s25), 7 }
   0xf   : > { %s494_s26 = sshll.u32 %s747_s19, 3  ;;  %s248_s29 = scalar_lea.vmem %s735_s5, %s747_s19 }
  0x10   : > { %s242_s30 = sadd.s32 %s494_s26, %s749_s25  ;;  %252 = sbr.rel (%p496_p7) target bundleno = 24 (0x18), region = 44 }
  0x11   : > { %s495_s6 = sshll.u32 %s242_s30, 3 }
  0x12   : > { %s244_s9 = scalar_lea.vmem %s730_s0, %s495_s6 }
  0x15   : > { %vm253_vm0 = vcmask 516096   ;;  %v590_v0 = vmov 0.0   ;;  %v591_v1 = vmov -inf  }
  0x16   : > { %254 = vst.msk [vmem:[#allocation2] sm:$0x1] %vm253_vm0, %v590_v0 }
  0x17   : > { %255 = vst.msk [vmem:[#allocation3] sm:$0x1] %vm253_vm0, %v591_v1 }
  0x18 PF: > { %v259_v2 = vld [vmem:[%s244_s9 + $0x18] sm:$0xff]  ;;  %vm289_vm1 = vcmask 523264   ;;  %v258_v3 = vld [vmem:[%s244_s9 + $0x10] sm:$0xff]  ;;  %v257_v4 = vld [vmem:[%s244_s9 + $0x8] sm:$0xff]  ;;  %vm261_vm2 = vcmask 261120   ;;  %v592_v13 = vmov 1.0  }
  0x19   : > { %277 = vmatpush.msra.mxu0 %v259_v2  ;;  %v293_v5 = vsel %vm289_vm1, %v259_v2, -inf  ;;  %v292_v6 = vsel %vm289_vm1, %v258_v3, -inf  ;;  %v291_v7 = vsel %vm289_vm1, %v257_v4, -inf  ;;  %v256_v8 = vld [vmem:[%s244_s9] sm:$0xff]  ;;  %vm286_vm3 = vcmask 516096   ;;  %p498_p8 = scmp.ne.s32.totalorder %s572_s18, 1 }
  0x1a   : > { %v295_v9 = vmax.f32 %v292_v6, %v293_v5  ;;  %v290_v10 = vsel %vm289_vm1, %v256_v8, -inf }
  0x1b   : > { %278 = vmatpush.msra.mxu0 %v258_v3  ;;  %v294_v11 = vmax.f32 %v290_v10, %v291_v7 }
  0x1d   : > { %279 = vmatpush.msra.mxu0 %v257_v4  ;;  %v296_v12 = vmax.f32 %v294_v11, %v295_v9  ;;  %v260_v22 = vld [vmem:[#allocation2] sm:$0x1] }
  0x1e   : > { %v288_v20 = vld [vmem:[#allocation3] sm:$0x1] }
  0x1f   : > { %280 = vmatpush.msra.mxu0 %v256_v8  ;;  %v297_v14 = vrot.slane %v296_v12, 4 }
  0x20   : > { %497 = vmatmul.msk.f32.vlgmr.msra.gmra.mxu0 %vm261_vm2, %v592_v13 }
  0x21   : > { %v298_v15 = vmax.f32 %v296_v12, %v297_v14 }
  0x23   : > { %v299_v16 = vrot.slane %v298_v15, 2 }
  0x25   : > { %v300_v17 = vmax.f32 %v298_v15, %v299_v16 }
  0x27   : > { %v301_v18 = vrot.slane %v300_v17, 1 }
  0x29   : > { %v302_v19 = vmax.f32 %v300_v17, %v301_v18 }
  0x2b   : > { %v303_v21 = vmax.f32 %v288_v20, %v302_v19 }
  0x2d   : > { %304 = vst.msk [vmem:[#allocation3] sm:$0x1] %vm286_vm3, %v303_v21 }
  0x9c   : > { %308 = sbr.rel (%p498_p8) target bundleno = 463 (0x1cf), region = 48 }
  0x9d   : > { %v282_v23 = vpop.f32.mrf.mxu0 }
  0x9e   : > { %v285_v24 = vadd.f32 %v282_v23, %v260_v22 }
  0xa0   : > { %287 = vst.msk [vmem:[#allocation2] sm:$0x1] %vm286_vm3, %v285_v24 }
  0xa1   : > { %v318_v25 = vld [vmem:[%s731_s1 + $0x38] sm:$0xff]  ;;  %v317_v26 = vld [vmem:[%s731_s1 + $0x30] sm:$0xff]  ;;  %v316_v27 = vld [vmem:[%s731_s1 + $0x28] sm:$0xff]  ;;  %vm346_vm4 = vcmask 64512  }
  0xa2   : > { %382 = vmatpush.msra.mxu2 %v318_v25  ;;  %331 = vmatpush.msra.mxu0 %v318_v25  ;;  %v315_v28 = vld [vmem:[%s731_s1 + $0x20] sm:$0xff]  ;;  %v314_v29 = vld [vmem:[%s731_s1 + $0x18] sm:$0xff]  ;;  %v313_v30 = vld [vmem:[%s731_s1 + $0x10] sm:$0xff] }
  0xa3   : > { %v312_v32 = vld [vmem:[%s731_s1 + $0x8] sm:$0xff]  ;;  %v311_v33 = vld [vmem:[%s731_s1] sm:$0xff] }
  0xa4   : > { %383 = vmatpush.msra.mxu2 %v317_v26  ;;  %332 = vmatpush.msra.mxu0 %v317_v26  ;;  %v370_v35 = vld [vmem:[#allocation3] sm:$0x1]  ;;  %v319_v37 = vld [vmem:[%s732_s2] sm:$0x1] }
  0xa5   : > { %v344_v36 = vld [vmem:[%s733_s3] sm:$0xff] }
  0xa6   : > { %384 = vmatpush.msra.mxu2 %v316_v27  ;;  %333 = vmatpush.msra.mxu0 %v316_v27  ;;  %v345_v44 = vld [vmem:[%s734_s4] sm:$0x1] }
  0xa7   : > { %v309_v31 = vld [vmem:[#allocation2] sm:$0x1]  ;;  %413 = vmatpush.msra.mxu3 %v344_v36  ;;  %365 = vmatpush.msra.mxu1 %v344_v36 }
  0xa8   : > { %385 = vmatpush.msra.mxu2 %v315_v28  ;;  %334 = vmatpush.msra.mxu0 %v315_v28  ;;  %v310_v34 = vmul.f32 0.015625, %v309_v31 }
  0xaa   : > { %386 = vmatpush.msra.mxu2 %v314_v29  ;;  %335 = vmatpush.msra.mxu0 %v314_v29 }
  0xac   : > { %387 = vmatpush.msra.mxu2 %v313_v30  ;;  %336 = vmatpush.msra.mxu0 %v313_v30 }
  0xae   : > { %388 = vmatpush.msra.mxu2 %v312_v32  ;;  %337 = vmatpush.msra.mxu0 %v312_v32 }
  0xb0   : > { %389 = vmatpush.msra.mxu2 %v311_v33  ;;  %338 = vmatpush.msra.mxu0 %v311_v33 }
  0xb1   : > { %501 = vmatmul.msk.f32.vlgmr.msra.gmra.mxu2 %vm289_vm1, %v370_v35  ;;  %499 = vmatmul.msk.f32.vlgmr.msra.gmra.mxu0 %vm289_vm1, %v310_v34 }
 0x12e   : > { %v340_v38 = vpop.f32.mrf.mxu0 }
 0x12f   : > { %v341_v39 = vadd.f32 %v340_v38, %v319_v37 }
 0x131   : > { %v343_v40 = vmax.f32 %v341_v39, 0.0 }
 0x133   : > { %500 = vmatmul.msk.f32.vlgmr.msra.gmra.mxu1 %vm346_vm4, %v343_v40 }
 0x134   : > { %v391_v41 = vpop.f32.mrf.mxu2 }
 0x135   : > { %v392_v42 = vadd.f32 %v391_v41, %v319_v37 }
 0x137   : > { %v394_v43 = vmax.f32 %v392_v42, 0.0 }
 0x139   : > { %502 = vmatmul.msk.f32.vlgmr.msra.gmra.mxu3 %vm346_vm4, %v394_v43 }
 0x1b0   : > { %v367_v45 = vpop.f32.mrf.mxu1 }
 0x1b1   : > { %v368_v46 = vadd.f32 %v367_v45, %v345_v44 }
 0x1bc   : > { %v415_v47 = vpop.f32.mrf.mxu3 }
 0x1bd   : > { %v416_v48 = vadd.f32 %v415_v47, %v345_v44 }
 0x1bf   : > { %v418_v49 = vadd.f32 %v416_v48, %v368_v46 }
 0x1c1   : > { %v419_v50 = vmul.f32 0.5, %v418_v49 }
 0x1c3   : > { %548 = vtanh.f32 %v419_v50 }
 0x1c9   : > { %v549_v51 = vpop.eup %548 }
 0x1ca   : > { %v421_v52 = vadd.f32 1.0, %v549_v51 }
 0x1cc   : > { %v422_v53 = vmul.f32 0.5, %v421_v52 }
 0x1ce   : > { %423 = vst.msk [vmem:[%s248_s29] sm:$0x1] %vm286_vm3, %v422_v53 }
 0x1cf PF: > { %s15_s22 = sadd.s32 1, %s588_s22   ;;  %s736_s18 = smov %s580_s20 }
 0x1d0   : > { %p12_p9 = scmp.ge.s32.totalorder %s15_s22, 6   ;;  %s737_s19 = smov %s584_s21 }
 0x1d1   : > { %s738_s20 = smov %s741_s23  ;;  %s739_s21 = smov %s745_s24 }
 0x1d2   :  { %14 = sbr.rel (!%p12_p9) target bundleno = 3 (0x3), region = 78 }

// kernel: spatial_channel_attention_forward.5
= control target key start
LH: loop header
LB: loop body
LE: loop exit
PB: predicated region body
PF: predicated region fallthrough
CT: control target
= control target key end

     0   :  { %10 = vsyncpa [#allocation5], 0  ;;  %s957_s0 = inlined_call_operand.hbm [shape: f32[2,16,16,32], index: 0, kind: input, shape index: {}]   ;;  %s958_s1 = inlined_call_operand.vmem [shape: f32[32,4], index: 1, kind: input, shape index: {}]   ;;  %s959_s2 = inlined_call_operand.vmem [shape: f32[1,4], index: 2, kind: input, shape index: {}]   ;;  %s960_s3 = inlined_call_operand.vmem [shape: f32[4,32], index: 3, kind: input, shape index: {}]   ;;  %s961_s4 = inlined_call_operand.vmem [shape: f32[1,32], index: 4, kind: input, shape index: {}]   ;;  %s962_s5 = inlined_call_operand.vmem [shape: f32[2,1,32], index: 5, kind: output, shape index: {}]  }
   0x1   :  { %12 = vsyncpa [#allocation5 + $0x1], 0  ;;  %s774_s18 = smov 0   ;;  %s776_s19 = smov 0  }
   0x2   :  { %s778_s20 = smov 0   ;;  %s780_s21 = smov 0  }
   0x3   :  { %s782_s22 = smov 0   ;;  %s784_s23 = smov 0  }
   0x4   :  { %s786_s24 = smov 0   ;;  %s788_s25 = smov 0  }
   0x5 LB: > { %s541_s26 = sadd.s32 4294967295, %s737_s25   ;;  %s27_s27 = sadd.s32 1, %s729_s23  ;;  %s737_s25 = sphi %s788_s25, %s18_s25   ;;  %s733_s24 = sphi %s786_s24, %s977_s24   ;;  %s729_s23 = sphi %s784_s23, %s976_s23   ;;  %s725_s22 = sphi %s782_s22, %s975_s22   ;;  %s721_s21 = sphi %s780_s21, %s974_s21   ;;  %s717_s20 = sphi %s778_s20, %s973_s20   ;;  %s713_s19 = sphi %s776_s19, %s972_s19   ;;  %s709_s18 = sphi %s774_s18, %s971_s18  }
   0x6   : > { %p28_p0 = scmp.ge.s32.totalorder %s27_s27, 2  ;;  %s30_s28 = sadd.s32 1, %s733_s24 }
   0x7   : > { %s39_s29 = sadd.s32 1, %s717_s20  ;;  %p46_p1 = scmp.ne.s32.totalorder %s717_s20, %s713_s19 }
   0x8   : > { %s979_s27 = smov (%p28_p0, %s27_s27), 0  ;;  %s981_s28 = smov (!%p28_p0, %s30_s28), %s733_s24 }
   0x9   : > { %965 = sst [smem:[#allocation7_spill]] %s979_s27  ;;  %s35_s30 = ssub.s32 %s729_s23, %s979_s27 }
   0xa   : > { %p47_p2 = scmp.eq.s32.totalorder %s737_s25, 0  ;;  %p32_p3 = scmp.ge.s32.totalorder %s981_s28, 2 }
   0xb   : > { %p52_p4 = scmp.ne.s32.totalorder %s713_s19, %s709_s18  ;;  %p53_p6 = scmp.eq.s32.totalorder %s541_s26, 0 }
   0xc   : > { %p825_p5 = por %p47_p2, %p46_p1  ;;  %s983_s28 = smov (%p32_p3, %s981_s28), 0 }
   0xd   : > { %967 = sst [smem:[#allocation8_spill]] %s983_s28  ;;  %p831_p7 = por %p53_p6, %p52_p4 }
   0xe   : > { %s34_s8 = ssub.s32 %s733_s24, %s983_s28  ;;  %p569_p8 = scmp.lt.s32.totalorder %s737_s25, 4 }
   0xf   : > { %s36_s9 = sor.u32 %s35_s30, %s34_s8  ;;  %s198_s10 = sand.u32 1, %s717_s20  }
  0x10   : > { %p37_p9 = scmp.eq.s32.totalorder %s36_s9, 0  ;;  %s545_s11 = sshll.u32 %s198_s10, 7 }
  0x11   : > { %s562_s12 = sshll.u32 %s729_s23, 4  ;;  %s548_s14 = sshll.u32 %s733_s24, 5 }
  0x12   : > { %s841_s13 = scalar_select %p37_p9, %s717_s20, %s39_s29  }
  0x13   : > { %s208_s15 = sadd.s32 %s562_s12, %s548_s14  ;;  %s202_s16 = scalar_lea.vmem [#allocation4], %s545_s11 }
  0x14   : > { %s213_s17 = sshll.u32 %s202_s16, 4  ;;  %s549_s18 = sshll.u32 %s208_s15, 3  ;;  %s214_s17 = int_to_ptr.vmem [resolvable:$true] %s213_s17 }
  0x15   : > { %s210_s28 = scalar_lea.hbm %s957_s0, %s549_s18  ;;  %p566_p10 = pnand %p569_p8, %p825_p5 }
  0x16   : > { %s211_s30 = sshll.u32 %s210_s28, 4  ;;  %p550_p11 = scmp.ge.s32.totalorder %s737_s25, 1  ;;  %s212_s30 = int_to_ptr.hbm [resolvable:$true] %s211_s30 }
  0x17   : > { %s199_s8 = scalar_lea.sflag [#allocation5], %s198_s10  ;;  %s739_s29 = smov 128  }
  0x18   : > { %s740_s9 = smov 8   ;;  %p221_p12 = scmp.lt.s32.totalorder %s737_s25, 5 }
  0x19   : > { %568 = dma.hbm_to_vmem [thread:$0]  (!%p566_p10), %s212_s30, 2048, %s214_s17, %s199_s8, %s739_s29, %s739_s29, %s740_s9  }
  0x1a   : > { %p222_p13 = pnand %p550_p11, %p221_p12 }
  0x1b   : > { %s227_s11 = sand.u32 (!%p222_p13), 1, %s713_s19  }
  0x1c   : > { %225 = sbr.rel (%p222_p13) target bundleno = 499 (0x1f3), region = 40  ;;  %s551_s12 = sshll.u32 (!%p222_p13), %s227_s11, 7 }
  0x1d   : > { %s228_s14 = scalar_lea.sflag (!%p222_p13), [#allocation5], %s227_s11  ;;  %s854_s27 = scalar_lea.vmem (!%p222_p13), [#allocation4], %s551_s12 }
  0x21   : > { %704 = dma.done.wait (%p831_p7), %s228_s14, 2048  }
  0x22   : > { %706 = vsyncadd (%p831_p7), %s228_s14, 4294965248  ;;  %p258_p0 = scmp.lt.s32.totalorder %s725_s22, 1  ;;  %p552_p1 = scmp.ne.s32.totalorder %s721_s21, 0 }
  0x24   : > { %s985_s22 = smov (!%p258_p0, %s725_s22), 1  ;;  %264 = sbr.rel (%p552_p1) target bundleno = 44 (0x2c), region = 48 }
  0x25   : > { %s260_s10 = scalar_lea.vmem %s962_s5, %s985_s22 }
  0x29   : > { %vm265_vm0 = vcmask 253952   ;;  %v741_v0 = vmov 0.0   ;;  %v742_v1 = vmov -inf  }
  0x2a   : > { %266 = vst.msk [vmem:[#allocation2] sm:$0x1] %vm265_vm0, %v741_v0 }
  0x2b   : > { %267 = vst.msk [vmem:[#allocation3] sm:$0x1] %vm265_vm0, %v742_v1 }
  0x2c PF: > { %v283_v2 = vld [vmem:[%s854_s27 + $0x78] sm:$0xff]  ;;  %vm309_vm1 = vcmask 261120   ;;  %v282_v3 = vld [vmem:[%s854_s27 + $0x70] sm:$0xff]  ;;  %v281_v4 = vld [vmem:[%s854_s27 + $0x68] sm:$0xff]  ;;  %v743_v49 = vmov 1.0   ;;  %vm306_vm2 = vcmask 253952  }
  0x2d   : > { %285 = vmatpush.msra.mxu0 %v283_v2  ;;  %v279_v5 = vld [vmem:[%s854_s27 + $0x58] sm:$0xff]  ;;  %v278_v6 = vld [vmem:[%s854_s27 + $0x50] sm:$0xff]  ;;  %v280_v7 = vld [vmem:[%s854_s27 + $0x60] sm:$0xff]  ;;  %v336_v33 = vsel %vm309_vm1, %v283_v2, -inf  ;;  %v334_v34 = vsel %vm309_vm1, %v282_v3, -inf  ;;  %v332_v35 = vsel %vm309_vm1, %v281_v4, -inf }
  0x2e   : > { %v328_v8 = vsel %vm309_vm1, %v279_v5, -inf  ;;  %v277_v9 = vld [vmem:[%s854_s27 + $0x48] sm:$0xff]  ;;  %v276_v10 = vld [vmem:[%s854_s27 + $0x40] sm:$0xff]  ;;  %v275_v11 = vld [vmem:[%s854_s27 + $0x38] sm:$0xff]  ;;  %v326_v12 = vsel %vm309_vm1, %v278_v6, -inf  ;;  %v330_v37 = vsel %vm309_vm1, %v280_v7, -inf }
  0x2f   : > { %286 = vmatpush.msra.mxu0 %v282_v3  ;;  %v324_v13 = vsel %vm309_vm1, %v277_v9, -inf  ;;  %v320_v14 = vsel %vm309_vm1, %v275_v11, -inf  ;;  %v274_v15 = vld [vmem:[%s854_s27 + $0x30] sm:$0xff]  ;;  %v273_v16 = vld [vmem:[%s854_s27 + $0x28] sm:$0xff]  ;;  %v272_v17 = vld [vmem:[%s854_s27 + $0x20] sm:$0xff]  ;;  %v322_v24 = vsel %vm309_vm1, %v276_v10, -inf }
  0x30   : > { %v318_v18 = vsel %vm309_vm1, %v274_v15, -inf  ;;  %v316_v19 = vsel %vm309_vm1, %v273_v16, -inf  ;;  %v314_v20 = vsel %vm309_vm1, %v272_v17, -inf  ;;  %v271_v21 = vld [vmem:[%s854_s27 + $0x18] sm:$0xff]  ;;  %v270_v22 = vld [vmem:[%s854_s27 + $0x10] sm:$0xff]  ;;  %v269_v23 = vld [vmem:[%s854_s27 + $0x8] sm:$0xff] }
  0x31   : > { %287 = vmatpush.msra.mxu0 %v281_v4  ;;  %v313_v25 = vsel %vm309_vm1, %v271_v21, -inf  ;;  %v312_v26 = vsel %vm309_vm1, %v270_v22, -inf  ;;  %v311_v27 = vsel %vm309_vm1, %v269_v23, -inf  ;;  %v268_v28 = vld [vmem:[%s854_s27] sm:$0xff]  ;;  %v284_v58 = vld [vmem:[#allocation2] sm:$0x1] }
  0x32   : > { %v321_v29 = vmax.f32 %v313_v25, %v320_v14  ;;  %v319_v30 = vmax.f32 %v312_v26, %v318_v18  ;;  %v317_v31 = vmax.f32 %v311_v27, %v316_v19  ;;  %v310_v32 = vsel %vm309_vm1, %v268_v28, -inf  ;;  %v308_v56 = vld [vmem:[#allocation3] sm:$0x1]  ;;  %p553_p2 = scmp.ne.s32.totalorder %s721_s21, 1 }
  0x33   : > { %288 = vmatpush.msra.mxu0 %v280_v7  ;;  %v315_v36 = vmax.f32 %v310_v32, %v314_v20 }
  0x34   : > { %v329_v38 = vmax.f32 %v321_v29, %v328_v8  ;;  %v327_v39 = vmax.f32 %v319_v30, %v326_v12  ;;  %v325_v40 = vmax.f32 %v317_v31, %v324_v13 }
  0x35   : > { %289 = vmatpush.msra.mxu0 %v279_v5  ;;  %v323_v41 = vmax.f32 %v315_v36, %v322_v24 }
  0x36   : > { %v337_v42 = vmax.f32 %v329_v38, %v336_v33  ;;  %v335_v43 = vmax.f32 %v327_v39, %v334_v34  ;;  %v333_v44 = vmax.f32 %v325_v40, %v332_v35 }
  0x37   : > { %290 = vmatpush.msra.mxu0 %v278_v6  ;;  %v331_v45 = vmax.f32 %v323_v41, %v330_v37 }
  0x38   : > { %v339_v46 = vmax.f32 %v335_v43, %v337_v42 }
  0x39   : > { %291 = vmatpush.msra.mxu0 %v277_v9  ;;  %v338_v47 = vmax.f32 %v331_v45, %v333_v44 }
  0x3b   : > { %292 = vmatpush.msra.mxu0 %v276_v10  ;;  %v340_v48 = vmax.f32 %v338_v47, %v339_v46 }
  0x3d   : > { %293 = vmatpush.msra.mxu0 %v275_v11  ;;  %v341_v50 = vrot.slane %v340_v48, 4 }
  0x3f   : > { %294 = vmatpush.msra.mxu0 %v274_v15  ;;  %v342_v51 = vmax.f32 %v340_v48, %v341_v50 }
  0x41   : > { %295 = vmatpush.msra.mxu0 %v273_v16  ;;  %v343_v52 = vrot.slane %v342_v51, 2 }
  0x43   : > { %296 = vmatpush.msra.mxu0 %v272_v17  ;;  %v344_v53 = vmax.f32 %v342_v51, %v343_v52 }
  0x45   : > { %297 = vmatpush.msra.mxu0 %v271_v21  ;;  %v345_v54 = vrot.slane %v344_v53, 1 }
  0x47   : > { %298 = vmatpush.msra.mxu0 %v270_v22  ;;  %v346_v55 = vmax.f32 %v344_v53, %v345_v54 }
  0x49   : > { %299 = vmatpush.msra.mxu0 %v269_v23  ;;  %v347_v57 = vmax.f32 %v308_v56, %v346_v55 }
  0x4b   : > { %300 = vmatpush.msra.mxu0 %v268_v28  ;;  %348 = vst.msk [vmem:[#allocation3] sm:$0x1] %vm306_vm2, %v347_v57 }
  0x4c   : > { %301 = vmatmul.f32.vlgmr.msra.gmra.mxu0 %v743_v49 }
  0xc8   : > { %352 = sbr.rel (%p553_p2) target bundleno = 499 (0x1f3), region = 52 }
  0xc9   : > { %v302_v59 = vpop.f32.mrf.mxu0 }
  0xca   : > { %v305_v60 = vadd.f32 %v302_v59, %v284_v58 }
  0xcc   : > { %307 = vst.msk [vmem:[#allocation2] sm:$0x1] %vm306_vm2, %v305_v60 }
  0xcd   : > { %v358_v61 = vld [vmem:[%s958_s1 + $0x18] sm:$0xff]  ;;  %v357_v62 = vld [vmem:[%s958_s1 + $0x10] sm:$0xff]  ;;  %v356_v0 = vld [vmem:[%s958_s1 + $0x8] sm:$0xff]  ;;  %vm390_vm3 = vcmask 1043456   ;;  %vm386_vm4 = vcmask 31744  }
  0xce   : > { %430 = vmatpush.msra.mxu2 %v358_v61  ;;  %375 = vmatpush.msra.mxu0 %v358_v61  ;;  %v355_v1 = vld [vmem:[%s958_s1] sm:$0xff] }
  0xcf   : > { %v414_v3 = vld [vmem:[#allocation3] sm:$0x1]  ;;  %v359_v5 = vld [vmem:[%s959_s2] sm:$0x1] }
  0xd0   : > { %431 = vmatpush.msra.mxu2 %v357_v62  ;;  %376 = vmatpush.msra.mxu0 %v357_v62  ;;  %v384_v4 = vld [vmem:[%s960_s3] sm:$0xf] }
  0xd1   : > { %558 = vmatpush.msk.msra.mxu3 %vm390_vm3, %v384_v4  ;;  %555 = vmatpush.msk.msra.mxu1 %vm390_vm3, %v384_v4  ;;  %v385_v12 = vld [vmem:[%s961_s4] sm:$0x1] }
  0xd2   : > { %432 = vmatpush.msra.mxu2 %v356_v0  ;;  %377 = vmatpush.msra.mxu0 %v356_v0 }
  0xd3   : > { %v353_v63 = vld [vmem:[#allocation2] sm:$0x1] }
  0xd4   : > { %v354_v2 = vmul.f32 0.00390625, %v353_v63  ;;  %433 = vmatpush.msra.mxu2 %v355_v1  ;;  %378 = vmatpush.msra.mxu0 %v355_v1 }
  0xd5   : > { %557 = vmatmul.msk.f32.vlgmr.msra.gmra.mxu2 %vm309_vm1, %v414_v3 }
  0xd6   : > { %554 = vmatmul.msk.f32.vlgmr.msra.gmra.mxu0 %vm309_vm1, %v354_v2 }
 0x153   : > { %v380_v6 = vpop.f32.mrf.mxu0 }
 0x154   : > { %v381_v7 = vadd.f32 %v380_v6, %v359_v5 }
 0x156   : > { %v383_v8 = vmax.f32 %v381_v7, 0.0 }
 0x158   : > { %556 = vmatmul.msk.f32.vlgmr.msra.gmra.mxu1 %vm386_vm4, %v383_v8  ;;  %v435_v9 = vpop.f32.mrf.mxu2 }
 0x159   : > { %v436_v10 = vadd.f32 %v435_v9, %v359_v5 }
 0x15b   : > { %v438_v11 = vmax.f32 %v436_v10, 0.0 }
 0x15d   : > { %559 = vmatmul.msk.f32.vlgmr.msra.gmra.mxu3 %vm386_vm4, %v438_v11 }
 0x1d5   : > { %v411_v13 = vpop.f32.mrf.mxu1 }
 0x1d6   : > { %v412_v14 = vadd.f32 %v411_v13, %v385_v12 }
 0x1e0   : > { %v459_v15 = vpop.f32.mrf.mxu3 }
 0x1e1   : > { %v460_v16 = vadd.f32 %v459_v15, %v385_v12 }
 0x1e3   : > { %v462_v17 = vadd.f32 %v460_v16, %v412_v14 }
 0x1e5   : > { %v463_v18 = vmul.f32 0.5, %v462_v17 }
 0x1e7   : > { %639 = vtanh.f32 %v463_v18 }
 0x1ed   : > { %v640_v19 = vpop.eup %639 }
 0x1ee   : > { %v465_v20 = vadd.f32 1.0, %v640_v19 }
 0x1f0   : > { %v466_v21 = vmul.f32 0.5, %v465_v20 }
 0x1f2   : > { %467 = vst.msk [vmem:[%s260_s10] sm:$0x1] %vm306_vm2, %v466_v21 }
 0x1f3 PF: > { %s18_s25 = sadd.s32 1, %s737_s25   ;;  %s969_s6 = sld [smem:[#allocation7_spill]] }
 0x1f4   : > { %p15_p3 = scmp.ge.s32.totalorder %s18_s25, 6   ;;  %s970_s7 = sld [smem:[#allocation8_spill]] }
 0x1f5   : > { %s971_s18 = smov %s713_s19  ;;  %s972_s19 = smov %s717_s20 }
 0x1f6   : > { %s973_s20 = smov %s841_s13  ;;  %s974_s21 = smov %s729_s23 }
 0x1f7   : > { %s975_s22 = smov %s733_s24  ;;  %17 = sbr.rel (!%p15_p3) target bundleno = 5 (0x5), region = 88 }
 0x1f9   : > { %s976_s23 = smov %s969_s6 }
 0x1fa   : > { %s977_s24 = smov %s970_s7 }
 0x1fc   :  { %485 = vsyncpa [#allocation5], 1 }
 0x1fd   :  { %487 = vsyncpa [#allocation5 + $0x1], 1 }

// kernel: spatial_channel_attention_forward.7
= control target key start
LH: loop header
LB: loop body
LE: loop exit
PB: predicated region body
PF: predicated region fallthrough
CT: control target
= control target key end

     0   :  { %s868_s18 = smov 0   ;;  %s870_s19 = smov 0   ;;  %s988_s0 = inlined_call_operand.vmem [shape: bf16[2,8,8,192], index: 0, kind: input, shape index: {}]   ;;  %s989_s1 = inlined_call_operand.vmem [shape: bf16[2,192,64], index: 1, kind: input, shape index: {}]   ;;  %s990_s2 = inlined_call_operand.vmem [shape: f32[1,64], index: 2, kind: input, shape index: {}]   ;;  %s991_s3 = inlined_call_operand.vmem [shape: f32[64,2], index: 3, kind: input, shape index: {}]   ;;  %s992_s4 = inlined_call_operand.vmem [shape: f32[1,2], index: 4, kind: input, shape index: {}]   ;;  %s993_s5 = inlined_call_operand.vmem [shape: f32[2,8,8,2], index: 5, kind: output, shape index: {}]  }
   0x1   :  { %s872_s20 = smov 0   ;;  %s874_s21 = smov 0  }
   0x2   :  { %s876_s22 = smov 0  }
   0x3 LB: > { %s24_s23 = sadd.s32 1, %s828_s20  ;;  %s27_s24 = sadd.s32 1, %s832_s21  ;;  %s836_s22 = sphi %s876_s22, %s15_s22   ;;  %s832_s21 = sphi %s874_s21, %s997_s21   ;;  %s828_s20 = sphi %s872_s20, %s996_s20   ;;  %s824_s19 = sphi %s870_s19, %s995_s19   ;;  %s820_s18 = sphi %s868_s18, %s994_s18  }
   0x4   : > { %p25_p0 = scmp.ge.s32.totalorder %s24_s23, 2  ;;  %p642_p1 = scmp.ge.s32.totalorder %s836_s22, 1 }
   0x5   : > { %p219_p2 = scmp.lt.s32.totalorder %s836_s22, 5 }
   0x6   : > { %s999_s23 = smov (%p25_p0, %s24_s23), 0  ;;  %s1001_s24 = smov (!%p25_p0, %s27_s24), %s832_s21 }
   0x7   : > { %p220_p3 = pnand %p642_p1, %p219_p2  ;;  %p29_p4 = scmp.ge.s32.totalorder %s1001_s24, 2 }
   0x8   : > { %p262_p5 = scmp.lt.s32.totalorder (!%p220_p3), %s824_s19, 1  ;;  %s643_s25 = sshll.u32 (!%p220_p3), %s820_s18, 2 }
   0x9   : > { %s1003_s24 = smov (%p29_p4, %s1001_s24), 0  ;;  %223 = sbr.rel (%p220_p3) target bundleno = 354 (0x162), region = 40 }
   0xa   : > { %p264_p6 = scmp.lt.s32.totalorder (!%p220_p3), %s643_s25, 7 }
   0xe   : > { %s1005_s19 = smov (!%p262_p5, %s824_s19), 1  ;;  %s1007_s25 = smov (!%p264_p6, %s643_s25), 7  ;;  %v466_v5 = vld [vmem:[%s991_s3 + $0x38] sm:$0xff]  ;;  %vm410_vm0 = vcmask 523264   ;;  %v465_v25 = vld [vmem:[%s991_s3 + $0x30] sm:$0xff]  ;;  %v464_v26 = vld [vmem:[%s991_s3 + $0x28] sm:$0xff] }
   0xf   : > { %s747_s26 = smul.u32 96, %s1005_s19  ;;  %s644_s30 = sshll.u32 %s1007_s25, 1  ;;  %491 = vmatpush.msra.mxu2 %v466_v5  ;;  %v463_v27 = vld [vmem:[%s991_s3 + $0x20] sm:$0xff]  ;;  %v462_v28 = vld [vmem:[%s991_s3 + $0x18] sm:$0xff]  ;;  %v461_v29 = vld [vmem:[%s991_s3 + $0x10] sm:$0xff]  ;;  %vm528_vm1 = vcmask 15360  }
  0x10   : > { %s645_s6 = sshll.u32 %s1005_s19, 4  ;;  %s649_s14 = sshll.u32 %s1005_s19, 3  ;;  %v460_v30 = vld [vmem:[%s991_s3 + $0x8] sm:$0xff]  ;;  %v459_v31 = vld [vmem:[%s991_s3] sm:$0xff] }
  0x11   : > { %s906_s29 = scalar_lea.vmem %s989_s1, %s747_s26  ;;  %s268_s7 = sadd.s32 %s645_s6, %s644_s30  ;;  %492 = vmatpush.msra.mxu2 %v465_v25  ;;  %v788_v33 = vld [vmem:[%s990_s2] ss:$0 sm:$0xff] }
  0x12   : > { %v734_v0 = vld [vmem:[%s906_s29 + $0x38] sm:$0xff]  ;;  %v733_v2 = vld [vmem:[%s906_s29 + $0x30] sm:$0xff]  ;;  %v732_v4 = vld [vmem:[%s906_s29 + $0x28] sm:$0xff]  ;;  %s646_s8 = sshll.u32 %s268_s7, 2  ;;  %s932_s15 = sadd.s32 %s649_s14, %s1007_s25 }
  0x13   : > { %v738_v1 = vld [vmem:[%s906_s29 + $0x58] sm:$0xff]  ;;  %417 = vmatpush.bf16.msra.mxu0 %v734_v0  ;;  %739 = vmatpush.bf16.msra.mxu3 %v734_v0  ;;  %v737_v3 = vld [vmem:[%s906_s29 + $0x50] sm:$0xff]  ;;  %v736_v6 = vld [vmem:[%s906_s29 + $0x48] sm:$0xff]  ;;  %s270_s13 = scalar_lea.vmem %s988_s0, %s646_s8  ;;  %s650_s14 = sshll.u32 %s932_s15, 3 }
  0x14   : > { %440 = vmatpush.bf16.msra.mxu1 %v738_v1  ;;  %v731_v7 = vld [vmem:[%s906_s29 + $0x20] sm:$0xff]  ;;  %v655_v10 = vld [vmem:[%s270_s13 + $0x8] sm:$0xf0]  ;;  %v730_v11 = vld [vmem:[%s906_s29 + $0x18] sm:$0xff]  ;;  %493 = vmatpush.msra.mxu2 %v464_v26  ;;  %s285_s18 = scalar_lea.vmem %s993_s5, %s650_s14 }
  0x15   : > { %v735_v8 = vld [vmem:[%s906_s29 + $0x40] sm:$0xff]  ;;  %v729_v13 = vld [vmem:[%s906_s29 + $0x10] sm:$0xff]  ;;  %v728_v14 = vld [vmem:[%s906_s29 + $0x8] sm:$0xff] }
  0x16   : > { %v723_v9 = vld [vmem:[%s270_s13 + $0x4] sm:$0xf]  ;;  %v653_v16 = vld [vmem:[%s270_s13] sm:$0xf]  ;;  %v724_v17 = vld [vmem:[%s270_s13 + $0x4] sm:$0xf0]  ;;  %494 = vmatpush.msra.mxu2 %v463_v27 }
  0x17   : > { %418 = vmatpush.bf16.msra.mxu0 %v733_v2  ;;  %740 = vmatpush.bf16.msra.mxu3 %v733_v2  ;;  %v658_v12 = vor.u32 %v723_v9, %v655_v10  ;;  %v727_v15 = vld [vmem:[%s906_s29] sm:$0xff]  ;;  %v661_v18 = vld [vmem:[%s270_s13 + $0x10] sm:$0xf]  ;;  %v726_v19 = vld [vmem:[%s270_s13 + $0x14] sm:$0xf0]  ;;  %v654_v22 = vor.u32 %v724_v17, %v653_v16 }
  0x18   : > { %441 = vmatpush.bf16.msra.mxu1 %v737_v3  ;;  %v725_v20 = vld [vmem:[%s270_s13 + $0x14] sm:$0xf]  ;;  %v663_v21 = vld [vmem:[%s270_s13 + $0x18] sm:$0xf0]  ;;  %v662_v23 = vor.u32 %v726_v19, %v661_v18  ;;  %495 = vmatpush.msra.mxu2 %v462_v28  ;;  %v789_v53 = vld [vmem:[%s992_s4] ss:$0 sm:$0xff] }
  0x19   : > { %v666_v24 = vor.u32 %v725_v20, %v663_v21 }
  0x1a   : > { %496 = vmatpush.msra.mxu2 %v461_v29 }
  0x1b   : > { %419 = vmatpush.bf16.msra.mxu0 %v732_v4  ;;  %741 = vmatpush.bf16.msra.mxu3 %v732_v4 }
  0x1c   : > { %442 = vmatpush.bf16.msra.mxu1 %v736_v6  ;;  %497 = vmatpush.msra.mxu2 %v460_v30 }
  0x1e   : > { %498 = vmatpush.msra.mxu2 %v459_v31 }
  0x1f   : > { %420 = vmatpush.bf16.msra.mxu0 %v731_v7  ;;  %742 = vmatpush.bf16.msra.mxu3 %v731_v7 }
  0x20   : > { %443 = vmatpush.bf16.msra.mxu1 %v735_v8 }
  0x23   : > { %421 = vmatpush.bf16.msra.mxu0 %v730_v11  ;;  %743 = vmatpush.bf16.msra.mxu3 %v730_v11 }
  0x24   : > { %715 = vmatmul.msk.bf16.vlgmr.msra.gmra.mxu1 %vm410_vm0, %v658_v12 }
  0x27   : > { %422 = vmatpush.bf16.msra.mxu0 %v729_v13  ;;  %744 = vmatpush.bf16.msra.mxu3 %v729_v13 }
  0x2b   : > { %423 = vmatpush.bf16.msra.mxu0 %v728_v14  ;;  %745 = vmatpush.bf16.msra.mxu3 %v728_v14 }
  0x2f   : > { %424 = vmatpush.bf16.msra.mxu0 %v727_v15  ;;  %746 = vmatpush.bf16.msra.mxu3 %v727_v15 }
  0x32   : > { %425 = vmatmul.bf16.vlgmr.msra.gmra.mxu0 %v654_v22  ;;  %430 = vmatmul.bf16.vlgmr.msra.gmra.mxu3 %v662_v23 }
  0x34   : > { %716 = vmatmul.msk.bf16.gmra.mxu1 %vm410_vm0, %v666_v24 }
  0xa1   : > { %v445_v32 = vpop.f32.mrf.mxu1 }
  0xa9   : > { %v447_v36 = vpop.f32.mrf.mxu1 }
  0xaf   : > { %v426_v34 = vpop.f32.mrf.mxu0 }
  0xb0   : > { %v427_v35 = vadd.f32 %v788_v33, %v426_v34 }
  0xb1   : > { %v450_v44 = vpop.f32.mrf.mxu1 }
  0xb2   : > { %v446_v37 = vadd.f32 %v445_v32, %v427_v35 }
  0xb4   : > { %v455_v38 = vmax.f32 %v446_v37, 0.0 }
  0xb5   : > { %v431_v40 = vpop.f32.mrf.mxu3 }
  0xb6   : > { %717 = vmatmul.msk.f32.vlgmr.msra.gmra.mxu2 %vm410_vm0, %v455_v38  ;;  %v432_v43 = vadd.f32 %v788_v33, %v431_v40 }
  0xb7   : > { %v428_v39 = vpop.f32.mrf.mxu0 }
  0xb8   : > { %v429_v41 = vadd.f32 %v788_v33, %v428_v39  ;;  %v451_v46 = vadd.f32 %v450_v44, %v432_v43 }
  0xb9   : > { %v452_v50 = vpop.f32.mrf.mxu1 }
  0xba   : > { %v448_v42 = vadd.f32 %v447_v36, %v429_v41  ;;  %v457_v48 = vmax.f32 %v451_v46, 0.0 }
  0xbc   : > { %v456_v45 = vmax.f32 %v448_v42, 0.0 }
  0xbd   : > { %v433_v47 = vpop.f32.mrf.mxu3 }
  0xbe   : > { %718 = vmatmul.msk.f32.gmra.mxu2 %vm410_vm0, %v456_v45  ;;  %v434_v49 = vadd.f32 %v788_v33, %v433_v47 }
  0xc0   : > { %v453_v51 = vadd.f32 %v452_v50, %v434_v49 }
  0xc2   : > { %v458_v52 = vmax.f32 %v453_v51, 0.0 }
  0xc6   : > { %719 = vmatmul.msk.f32.gmra.mxu2 %vm410_vm0, %v457_v48 }
  0xce   : > { %720 = vmatmul.msk.f32.gmra.mxu2 %vm410_vm0, %v458_v52 }
 0x139   : > { %v500_v54 = vpop.f32.mrf.mxu2 }
 0x13a   : > { %v501_v55 = vadd.f32 %v789_v53, %v500_v54 }
 0x13c   : > { %v512_v56 = vmul.f32 0.5, %v501_v55 }
 0x13e   : > { %790 = vtanh.f32 %v512_v56 }
 0x141   : > { %v503_v57 = vpop.f32.mrf.mxu2 }
 0x142   : > { %v504_v58 = vadd.f32 %v789_v53, %v503_v57 }
 0x144   : > { %v791_v59 = vpop.eup %790  ;;  %v513_v60 = vmul.f32 0.5, %v504_v58 }
 0x145   : > { %v520_v61 = vadd.f32 1.0, %v791_v59 }
 0x146   : > { %792 = vtanh.f32 %v513_v60 }
 0x147   : > { %v524_v62 = vmul.f32 0.5, %v520_v61 }
 0x149   : > { %529 = vst.msk [vmem:[%s285_s18] sm:$0xff] %vm528_vm1, %v524_v62  ;;  %v506_v63 = vpop.f32.mrf.mxu2 }
 0x14a   : > { %v507_v0 = vadd.f32 %v789_v53, %v506_v63 }
 0x14c   : > { %v793_v1 = vpop.eup %792  ;;  %v514_v2 = vmul.f32 0.5, %v507_v0 }
 0x14d   : > { %v521_v3 = vadd.f32 1.0, %v793_v1 }
 0x14e   : > { %794 = vtanh.f32 %v514_v2 }
 0x14f   : > { %v525_v4 = vmul.f32 0.5, %v521_v3 }
 0x151   : > { %530 = vst.msk [vmem:[%s285_s18 + $0x8] sm:$0xff] %vm528_vm1, %v525_v4  ;;  %v509_v5 = vpop.f32.mrf.mxu2 }
 0x152   : > { %v510_v6 = vadd.f32 %v789_v53, %v509_v5 }
 0x154   : > { %v795_v7 = vpop.eup %794  ;;  %v515_v8 = vmul.f32 0.5, %v510_v6 }
 0x155   : > { %v522_v9 = vadd.f32 1.0, %v795_v7 }
 0x156   : > { %796 = vtanh.f32 %v515_v8 }
 0x157   : > { %v526_v10 = vmul.f32 0.5, %v522_v9 }
 0x159   : > { %531 = vst.msk [vmem:[%s285_s18 + $0x10] sm:$0xff] %vm528_vm1, %v526_v10 }
 0x15c   : > { %v797_v11 = vpop.eup %796 }
 0x15d   : > { %v523_v12 = vadd.f32 1.0, %v797_v11 }
 0x15f   : > { %v527_v13 = vmul.f32 0.5, %v523_v12 }
 0x161   : > { %532 = vst.msk [vmem:[%s285_s18 + $0x18] sm:$0xff] %vm528_vm1, %v527_v13 }
 0x162 PF: > { %s15_s22 = sadd.s32 1, %s836_s22   ;;  %s994_s18 = smov %s828_s20 }
 0x163   : > { %p12_p7 = scmp.ge.s32.totalorder %s15_s22, 6   ;;  %s995_s19 = smov %s832_s21 }
 0x164   : > { %s996_s20 = smov %s999_s23  ;;  %s997_s21 = smov %s1003_s24 }
 0x165   :  { %14 = sbr.rel (!%p12_p7) target bundleno = 3 (0x3), region = 73 }

// kernel: spatial_channel_attention_forward.8
= control target key start
LH: loop header
LB: loop body
LE: loop exit
PB: predicated region body
PF: predicated region fallthrough
CT: control target
= control target key end

     0   :  { %s1698_s27 = smov 0   ;;  %s1700_s28 = smov 0   ;;  %s2107_s0 = inlined_call_operand.vmem [shape: f32[2,16,16,32], index: 0, kind: input, shape index: {}]   ;;  %s2108_s1 = inlined_call_operand.vmem [shape: f32[2,16,16,2], index: 1, kind: input, shape index: {}]   ;;  %s2109_s2 = inlined_call_operand.vmem [shape: f32[2,32,32], index: 2, kind: input, shape index: {}]   ;;  %s2110_s3 = inlined_call_operand.vmem [shape: f32[2,32,32], index: 3, kind: input, shape index: {}]   ;;  %s2111_s4 = inlined_call_operand.vmem [shape: f32[2,1,32], index: 4, kind: output, shape index: {0}]   ;;  %s2112_s5 = inlined_call_operand.vmem [shape: f32[2,1,32], index: 5, kind: output, shape index: {1}]   ;;  %s2113_s6 = inlined_call_operand.vmem [shape: f32[2,32,32], index: 6, kind: output, shape index: {2}]   ;;  %s2114_s7 = inlined_call_operand.vmem [shape: f32[2,32,32], index: 7, kind: output, shape index: {3}]   ;;  %s2115_s8 = inlined_call_operand.vmem [shape: f32[2,32,32], index: 8, kind: output, shape index: {4}]  }
   0x1   :  { %2116 = sst [smem:[#allocation4_spill]] %s2109_s2  ;;  %s1702_s29 = smov 0  }
   0x2   :  { %2117 = sst [smem:[#allocation5_spill]] %s2110_s3  ;;  %s1704_s30 = smov 0  }
   0x3   :  { %s1706_s9 = smov 0  }
   0x4 LB: > { %s28_s10 = sadd.s32 1, %s1640_s29  ;;  %s31_s11 = sadd.s32 1, %s1644_s30  ;;  %s1648_s9 = sphi %s1706_s9, %s19_s9   ;;  %s1644_s30 = sphi %s1704_s30, %s2127_s30   ;;  %s1640_s29 = sphi %s1702_s29, %s2126_s29   ;;  %s1636_s28 = sphi %s1700_s28, %s2125_s28   ;;  %s1632_s27 = sphi %s1698_s27, %s2124_s27  }
   0x5   : > { %p29_p0 = scmp.ge.s32.totalorder %s28_s10, 2  ;;  %p1428_p1 = scmp.ge.s32.totalorder %s1648_s9, 1 }
   0x6   : > { %p329_p2 = scmp.lt.s32.totalorder %s1648_s9, 5 }
   0x7   : > { %s2129_s10 = smov (%p29_p0, %s28_s10), 0  ;;  %s2131_s11 = smov (!%p29_p0, %s31_s11), %s1644_s30 }
   0x8   : > { %2118 = sst [smem:[#allocation2_spill]] %s2129_s10  ;;  %p330_p3 = pnand %p1428_p1, %p329_p2 }
   0x9   : > { %p33_p4 = scmp.ge.s32.totalorder %s2131_s11, 2  ;;  %s1429_s12 = sshll.u32 (!%p330_p3), %s1632_s27, 3 }
   0xa   : > { %333 = sbr.rel (%p330_p3) target bundleno = 650 (0x28a), region = 36  ;;  %p405_p5 = scmp.lt.s32.totalorder (!%p330_p3), %s1636_s28, 1 }
   0xb   : > { %s2133_s11 = smov (%p33_p4, %s2131_s11), 0  ;;  %p407_p6 = scmp.lt.s32.totalorder (!%p330_p3), %s1429_s12, 15 }
   0xc   : > { %2119 = sst [smem:[#allocation3_spill]] %s2133_s11  ;;  %p1447_p7 = scmp.ne.s32.totalorder (!%p330_p3), %s1632_s27, 0 }
   0xd   : > { %s2120_s2 = sld [smem:[#allocation4_spill]] (!%p330_p3) }
   0xe   : > { %s2121_s3 = sld [smem:[#allocation5_spill]] (!%p330_p3) }
   0xf   : > { %s2135_s28 = smov (!%p405_p5, %s1636_s28), 1  ;;  %s2137_s12 = smov (!%p407_p6, %s1429_s12), 15 }
  0x10   : > { %s1431_s13 = sshll.u32 %s2135_s28, 5  ;;  %s1734_s16 = scalar_lea.vmem %s2111_s4, %s2135_s28 }
  0x11   : > { %s1430_s17 = sshll.u32 %s2137_s12, 1  ;;  %s1749_s10 = scalar_lea.vmem %s2112_s5, %s2135_s28 }
  0x12   : > { %s411_s21 = sadd.s32 %s1431_s13, %s1430_s17  ;;  %s1764_s23 = scalar_lea.vmem %s2113_s6, %s1431_s13 }
  0x13   : > { %s1739_s20 = scalar_lea.vmem %s2120_s2, %s1431_s13  ;;  %s1432_s25 = sshll.u32 %s411_s21, 3 }
  0x14   : > { %s1744_s24 = scalar_lea.vmem %s2121_s3, %s1431_s13  ;;  %s1754_s12 = scalar_lea.vmem %s2107_s0, %s1432_s25 }
  0x15   : > { %s1759_s17 = scalar_lea.vmem %s2108_s1, %s1432_s25  ;;  %s1769_s28 = scalar_lea.vmem %s2114_s7, %s1431_s13 }
  0x16   : > { %s1774_s14 = scalar_lea.vmem %s2115_s8, %s1431_s13  ;;  %460 = sbr.rel (%p1447_p7) target bundleno = 42 (0x2a), region = 40 }
  0x1b   : > { %vm461_vm0 = vcmask 253952   ;;  %vm464_vm1 = vcmask 261120   ;;  %v1650_v0 = vmov 0.0  }
  0x1c   : > { %462 = vst.msk [vmem:[%s1734_s16] sm:$0x1] %vm461_vm0, %v1650_v0 }
  0x1d   : > { %463 = vst.msk [vmem:[%s1749_s10] sm:$0x1] %vm461_vm0, %v1650_v0 }
  0x1e   : > { %465 = vst.msk [vmem:[%s1764_s23] sm:$0xff] %vm464_vm1, %v1650_v0 }
  0x1f   : > { %466 = vst.msk [vmem:[%s1764_s23 + $0x8] sm:$0xff] %vm464_vm1, %v1650_v0 }
  0x20   : > { %467 = vst.msk [vmem:[%s1764_s23 + $0x10] sm:$0xff] %vm464_vm1, %v1650_v0 }
  0x21   : > { %468 = vst.msk [vmem:[%s1764_s23 + $0x18] sm:$0xff] %vm464_vm1, %v1650_v0 }
  0x22   : > { %469 = vst.msk [vmem:[%s1769_s28] sm:$0xff] %vm464_vm1, %v1650_v0 }
  0x23   : > { %470 = vst.msk [vmem:[%s1769_s28 + $0x8] sm:$0xff] %vm464_vm1, %v1650_v0 }
  0x24   : > { %471 = vst.msk [vmem:[%s1769_s28 + $0x10] sm:$0xff] %vm464_vm1, %v1650_v0 }
  0x25   : > { %472 = vst.msk [vmem:[%s1769_s28 + $0x18] sm:$0xff] %vm464_vm1, %v1650_v0 }
  0x26   : > { %473 = vst.msk [vmem:[%s1774_s14] sm:$0xff] %vm464_vm1, %v1650_v0 }
  0x27   : > { %474 = vst.msk [vmem:[%s1774_s14 + $0x8] sm:$0xff] %vm464_vm1, %v1650_v0 }
  0x28   : > { %475 = vst.msk [vmem:[%s1774_s14 + $0x10] sm:$0xff] %vm464_vm1, %v1650_v0 }
  0x29   : > { %476 = vst.msk [vmem:[%s1774_s14 + $0x18] sm:$0xff] %vm464_vm1, %v1650_v0 }
  0x2a PF: > { %v497_v1 = vld [vmem:[%s1759_s17 + $0x20] sm:$0xff]  ;;  %v495_v2 = vld [vmem:[%s1759_s17 + $0x10] sm:$0xff]  ;;  %v1651_v4 = vmov 0   ;;  %v496_v5 = vld [vmem:[%s1759_s17 + $0x18] sm:$0xff]  ;;  %v1652_v7 = vmov 1   ;;  %vm609_vm2 = vcmask 261120  }
  0x2b   : > { %v493_v3 = vld [vmem:[%s1759_s17] sm:$0xff]  ;;  %1546 = vset.pattern.permute.xlu2 %v1651_v4  ;;  %1545 = vset.pattern.permute.xlu1 %v1651_v4  ;;  %v494_v6 = vld [vmem:[%s1759_s17 + $0x8] sm:$0xff]  ;;  %v499_v9 = vld [vmem:[%s1759_s17 + $0x30] sm:$0xff]  ;;  %vm959_vm3 = vcmask 253952  }
  0x2c   : > { %1544 = vset.pattern.permute.xlu0 %v1651_v4  ;;  %531 = vperm.xlu2 %1546, %v497_v1   ;;  %v498_v8 = vld [vmem:[%s1759_s17 + $0x28] sm:$0xff]  ;;  %v505_v10 = vld [vmem:[%s1759_s17 + $0x60] sm:$0xff]  ;;  %v500_v11 = vld [vmem:[%s1759_s17 + $0x38] sm:$0xff] }
  0x2d   : > { %521 = vperm.xlu1 %1545, %v495_v2   ;;  %511 = vperm.xlu0 %1544, %v493_v3   ;;  %v506_v12 = vld [vmem:[%s1759_s17 + $0x68] sm:$0xff]  ;;  %v501_v13 = vld [vmem:[%s1759_s17 + $0x40] sm:$0xff]  ;;  %v507_v14 = vld [vmem:[%s1759_s17 + $0x70] sm:$0xff] }
  0x2e   : > { %v508_v15 = vld [vmem:[%s1759_s17 + $0x78] sm:$0xff]  ;;  %v502_v16 = vld [vmem:[%s1759_s17 + $0x48] sm:$0xff]  ;;  %v503_v17 = vld [vmem:[%s1759_s17 + $0x50] sm:$0xff] }
  0x2f   : > { %v504_v18 = vld [vmem:[%s1759_s17 + $0x58] sm:$0xff]  ;;  %v607_v20 = vld [vmem:[%s1739_s20 + $0x10] sm:$0xff]  ;;  %v606_v22 = vld [vmem:[%s1739_s20 + $0x8] sm:$0xff] }
  0x30   : > { %v608_v19 = vld [vmem:[%s1739_s20 + $0x18] sm:$0xff]  ;;  %v605_v23 = vld [vmem:[%s1739_s20] sm:$0xff]  ;;  %v805_v24 = vld [vmem:[%s1744_s24 + $0x10] sm:$0xff] }
  0x31   : > { %670 = vmatpush.msra.mxu0 %v608_v19  ;;  %v806_v21 = vld [vmem:[%s1744_s24 + $0x18] sm:$0xff]  ;;  %1487 = vmatpush.msra.mxu3 %v608_v19  ;;  %v804_v25 = vld [vmem:[%s1744_s24 + $0x8] sm:$0xff]  ;;  %v803_v26 = vld [vmem:[%s1744_s24] sm:$0xff] }
  0x32   : > { %867 = vmatpush.msra.mxu1 %v806_v21  ;;  %v477_v29 = vld [vmem:[%s1754_s12] sm:$0xff]  ;;  %v478_v35 = vld [vmem:[%s1754_s12 + $0x8] sm:$0xff]  ;;  %v479_v39 = vld [vmem:[%s1754_s12 + $0x10] sm:$0xff] }
  0x33   : > { %671 = vmatpush.msra.mxu0 %v607_v20  ;;  %1488 = vmatpush.msra.mxu3 %v607_v20  ;;  %v480_v45 = vld [vmem:[%s1754_s12 + $0x18] sm:$0xff]  ;;  %v489_v46 = vld [vmem:[%s1754_s12 + $0x60] sm:$0xff]  ;;  %v490_v54 = vld [vmem:[%s1754_s12 + $0x68] sm:$0xff] }
  0x34   : > { %1547 = vset.pattern.permute.xlu2 %v1652_v7  ;;  %868 = vmatpush.msra.mxu1 %v805_v24  ;;  %v481_v53 = vld [vmem:[%s1754_s12 + $0x20] sm:$0xff]  ;;  %v482_v61 = vld [vmem:[%s1754_s12 + $0x28] sm:$0xff]  ;;  %v491_v62 = vld [vmem:[%s1754_s12 + $0x70] sm:$0xff] }
  0x35   : > { %526 = vperm.xlu1 %1545, %v496_v5   ;;  %516 = vperm.xlu0 %1544, %v494_v6  }
  0x36   : > { %724 = vperm.xlu2 %1547, %v493_v3   ;;  %672 = vmatpush.msra.mxu0 %v606_v22 }
  0x37   : > { %1489 = vmatpush.msra.mxu3 %v606_v22  ;;  %869 = vmatpush.msra.mxu1 %v804_v25 }
  0x38   : > { %673 = vmatpush.msra.mxu0 %v605_v23 }
  0x39   : > { %1490 = vmatpush.msra.mxu3 %v605_v23  ;;  %870 = vmatpush.msra.mxu1 %v803_v26  ;;  %v486_v23 = vld [vmem:[%s1754_s12 + $0x48] sm:$0xff] }
  0x3b   : > { %1491 = vmatpush.msrb.mxu3 %v806_v21 }
  0x3d   : > { %1548 = vset.pattern.permute.xlu1 %v1652_v7  ;;  %536 = vperm.xlu0 %1544, %v498_v8  }
  0x3e   : > { %728 = vperm.xlu1 %1548, %v494_v6   ;;  %1549 = vset.pattern.permute.xlu2 %v1651_v4  ;;  %v492_v6 = vld [vmem:[%s1754_s12 + $0x78] sm:$0xff] }
  0x3f   : > { %541 = vperm.xlu2 %1549, %v499_v9   ;;  %1492 = vmatpush.msrb.mxu3 %v805_v24 }
  0x41   : > { %1493 = vmatpush.msrb.mxu3 %v804_v25 }
  0x43   : > { %1494 = vmatpush.msrb.mxu3 %v803_v26 }
  0x45   : > { %1550 = vset.pattern.permute.xlu0 %v1652_v7 }
  0x46   : > { %1551 = vset.pattern.permute.xlu1 %v1651_v4  ;;  %732 = vperm.xlu0 %1550, %v495_v2  }
  0x47   : > { %571 = vperm.xlu1 %1551, %v505_v10   ;;  %546 = vperm.xlu2 %1549, %v500_v11  }
  0x4e   : > { %1553 = vset.pattern.permute.xlu0 %v1651_v4 }
  0x4f   : > { %1552 = vset.pattern.permute.xlu1 %v1652_v7  ;;  %576 = vperm.xlu2 %1549, %v506_v12  }
  0x50   : > { %736 = vperm.xlu1 %1552, %v496_v5   ;;  %551 = vperm.xlu0 %1553, %v501_v13   ;;  %v483_v5 = vld [vmem:[%s1754_s12 + $0x30] sm:$0xff] }
  0x57   : > { %581 = vperm.xlu2 %1549, %v507_v14  }
  0x58   : > { %740 = vperm.xlu1 %1552, %v497_v1   ;;  %586 = vperm.xlu0 %1553, %v508_v15  }
  0x5f   : > { %1555 = vset.pattern.permute.xlu2 %v1652_v7 }
  0x60   : > { %1554 = vset.pattern.permute.xlu1 %v1651_v4  ;;  %744 = vperm.xlu2 %1555, %v498_v8  }
  0x61   : > { %556 = vperm.xlu1 %1554, %v502_v16   ;;  %1556 = vset.pattern.permute.xlu0 %v1652_v7 }
  0x62   : > { %772 = vperm.xlu0 %1556, %v505_v10  }
  0x68   : > { %748 = vperm.xlu2 %1555, %v499_v9  }
  0x69   : > { %561 = vperm.xlu1 %1554, %v503_v17  }
  0x6a   : > { %780 = vperm.xlu0 %1556, %v507_v14  }
  0x70   : > { %752 = vperm.xlu2 %1555, %v500_v11   ;;  %v484_v11 = vld [vmem:[%s1754_s12 + $0x38] sm:$0xff] }
  0x71   : > { %566 = vperm.xlu1 %1554, %v504_v18  }
  0x72   : > { %764 = vperm.xlu0 %1556, %v503_v17  }
  0x78   : > { %756 = vperm.xlu2 %1555, %v501_v13  }
  0x79   : > { %1557 = vset.pattern.permute.xlu1 %v1652_v7 }
  0x7a   : > { %776 = vperm.xlu1 %1557, %v506_v12  }
  0x80   : > { %784 = vperm.xlu2 %1555, %v508_v15  }
  0x82   : > { %760 = vperm.xlu1 %1557, %v502_v16  }
  0x86   : > { %v532_v27 = vpop.permute.xlu2 %531 }
  0x87   : > { %v593_v55 = vmul.f32 %v532_v27, %v481_v53 }
  0x8a   : > { %768 = vperm.xlu1 %1557, %v504_v18   ;;  %v485_v18 = vld [vmem:[%s1754_s12 + $0x40] sm:$0xff] }
  0x90   : > { %v725_v28 = vpop.permute.xlu2 %724 }
  0x91   : > { %v787_v30 = vmul.f32 %v725_v28, %v477_v29  ;;  %v487_v28 = vld [vmem:[%s1754_s12 + $0x50] sm:$0xff] }
  0x93   : > { %1464 = vmatmul.msk.f32.vlgmr.msra.gmra.mxu1 %vm609_vm2, %v787_v30 }
  0x99   : > { %v542_v34 = vpop.permute.xlu2 %541 }
  0x9a   : > { %v595_v7 = vmul.f32 %v542_v34, %v483_v5 }
  0x9f   : > { %v522_v31 = vpop.permute.xlu1 %521  ;;  %v512_v32 = vpop.permute.xlu0 %511 }
  0xa0   : > { %v589_v33 = vmul.f32 %v512_v32, %v477_v29  ;;  %v591_v42 = vmul.f32 %v522_v31, %v479_v39 }
  0xa1   : > { %v547_v40 = vpop.permute.xlu2 %546 }
  0xa2   : > { %1448 = vmatmul.msk.f32.vlgmr.msra.gmra.mxu0 %vm609_vm2, %v589_v33  ;;  %v596_v14 = vmul.f32 %v547_v40, %v484_v11  ;;  %v488_v33 = vld [vmem:[%s1754_s12 + $0x58] sm:$0xff] }
  0xa7   : > { %v527_v36 = vpop.permute.xlu1 %526  ;;  %v517_v37 = vpop.permute.xlu0 %516 }
  0xa8   : > { %v590_v38 = vmul.f32 %v517_v37, %v478_v35  ;;  %v592_v47 = vmul.f32 %v527_v36, %v480_v45 }
  0xa9   : > { %v577_v48 = vpop.permute.xlu2 %576 }
  0xaa   : > { %1449 = vmatmul.msk.f32.gmra.mxu0 %vm609_vm2, %v590_v38  ;;  %v602_v56 = vmul.f32 %v577_v48, %v490_v54 }
  0xaf   : > { %v537_v41 = vpop.permute.xlu0 %536 }
  0xb0   : > { %v729_v43 = vpop.permute.xlu1 %728  ;;  %v594_v63 = vmul.f32 %v537_v41, %v482_v61 }
  0xb1   : > { %v788_v44 = vmul.f32 %v729_v43, %v478_v35  ;;  %v582_v57 = vpop.permute.xlu2 %581 }
  0xb2   : > { %1450 = vmatmul.msk.f32.gmra.mxu0 %vm609_vm2, %v591_v42  ;;  %v603_v0 = vmul.f32 %v582_v57, %v491_v62 }
  0xb3   : > { %1465 = vmatmul.msk.f32.gmra.mxu1 %vm609_vm2, %v788_v44 }
  0xb8   : > { %v733_v49 = vpop.permute.xlu0 %732 }
  0xb9   : > { %v789_v50 = vmul.f32 %v733_v49, %v479_v39  ;;  %v572_v51 = vpop.permute.xlu1 %571 }
  0xba   : > { %v601_v52 = vmul.f32 %v572_v51, %v489_v46  ;;  %1451 = vmatmul.msk.f32.gmra.mxu0 %vm609_vm2, %v592_v47  ;;  %v745_v4 = vpop.permute.xlu2 %744 }
  0xbb   : > { %1466 = vmatmul.msk.f32.gmra.mxu1 %vm609_vm2, %v789_v50  ;;  %v792_v9 = vmul.f32 %v745_v4, %v482_v61 }
  0xbc   : > { %1460 = vmatmul.msk.f32.vlgmr.msra.gmra.mxu3 %vm609_vm2, %v601_v52 }
  0xc2   : > { %v737_v58 = vpop.permute.xlu1 %736  ;;  %1452 = vmatmul.msk.f32.gmra.mxu0 %vm609_vm2, %v593_v55  ;;  %v552_v60 = vpop.permute.xlu0 %551 }
  0xc3   : > { %v790_v59 = vmul.f32 %v737_v58, %v480_v45  ;;  %v749_v13 = vpop.permute.xlu2 %748  ;;  %v597_v19 = vmul.f32 %v552_v60, %v485_v18 }
  0xc4   : > { %1461 = vmatmul.msk.f32.gmra.mxu3 %vm609_vm2, %v602_v56  ;;  %v793_v16 = vmul.f32 %v749_v13, %v483_v5 }
  0xc5   : > { %1467 = vmatmul.msk.f32.gmra.mxu1 %vm609_vm2, %v790_v59 }
  0xca   : > { %v741_v1 = vpop.permute.xlu1 %740  ;;  %1453 = vmatmul.msk.f32.gmra.mxu0 %vm609_vm2, %v594_v63  ;;  %v587_v3 = vpop.permute.xlu0 %586 }
  0xcb   : > { %v791_v2 = vmul.f32 %v741_v1, %v481_v53  ;;  %v604_v8 = vmul.f32 %v587_v3, %v492_v6  ;;  %v753_v20 = vpop.permute.xlu2 %752 }
  0xcc   : > { %1462 = vmatmul.msk.f32.gmra.mxu3 %vm609_vm2, %v603_v0  ;;  %v794_v21 = vmul.f32 %v753_v20, %v484_v11 }
  0xcd   : > { %1468 = vmatmul.msk.f32.gmra.mxu1 %vm609_vm2, %v791_v2 }
  0xd2   : > { %1454 = vmatmul.msk.f32.gmra.mxu0 %vm609_vm2, %v595_v7 }
  0xd3   : > { %v557_v10 = vpop.permute.xlu1 %556  ;;  %v757_v25 = vpop.permute.xlu2 %756 }
  0xd4   : > { %1463 = vmatmul.msk.f32.gmra.mxu3 %vm609_vm2, %v604_v8  ;;  %v773_v12 = vpop.permute.xlu0 %772  ;;  %v598_v24 = vmul.f32 %v557_v10, %v486_v23  ;;  %v795_v26 = vmul.f32 %v757_v25, %v485_v18 }
  0xd5   : > { %1469 = vmatmul.msk.f32.gmra.mxu1 %vm609_vm2, %v792_v9  ;;  %v799_v15 = vmul.f32 %v773_v12, %v489_v46 }
  0xda   : > { %1455 = vmatmul.msk.f32.gmra.mxu0 %vm609_vm2, %v596_v14 }
  0xdb   : > { %v562_v17 = vpop.permute.xlu1 %561  ;;  %v785_v37 = vpop.permute.xlu2 %784 }
  0xdc   : > { %1476 = vmatmul.msk.f32.vlgmr.msrb.gmra.mxu3 %vm609_vm2, %v799_v15  ;;  %v599_v30 = vmul.f32 %v562_v17, %v487_v28  ;;  %v781_v31 = vpop.permute.xlu0 %780  ;;  %v802_v39 = vmul.f32 %v785_v37, %v492_v6 }
  0xdd   : > { %1470 = vmatmul.msk.f32.gmra.mxu1 %vm609_vm2, %v793_v16  ;;  %v801_v34 = vmul.f32 %v781_v31, %v491_v62 }
  0xe2   : > { %1456 = vmatmul.msk.f32.gmra.mxu0 %vm609_vm2, %v597_v19 }
  0xe3   : > { %v567_v22 = vpop.permute.xlu1 %566 }
  0xe4   : > { %v600_v36 = vmul.f32 %v567_v22, %v488_v33  ;;  %v765_v38 = vpop.permute.xlu0 %764 }
  0xe5   : > { %1471 = vmatmul.msk.f32.gmra.mxu1 %vm609_vm2, %v794_v21  ;;  %v797_v40 = vmul.f32 %v765_v38, %v487_v28 }
  0xea   : > { %1457 = vmatmul.msk.f32.gmra.mxu0 %vm609_vm2, %v598_v24 }
  0xec   : > { %v777_v27 = vpop.permute.xlu1 %776 }
  0xed   : > { %v800_v29 = vmul.f32 %v777_v27, %v490_v54  ;;  %1472 = vmatmul.msk.f32.gmra.mxu1 %vm609_vm2, %v795_v26 }
  0xef   : > { %1477 = vmatmul.msk.f32.gmra.mxu3 %vm609_vm2, %v800_v29 }
  0xf2   : > { %1458 = vmatmul.msk.f32.gmra.mxu0 %vm609_vm2, %v599_v30 }
  0xf4   : > { %v761_v32 = vpop.permute.xlu1 %760 }
  0xf5   : > { %v796_v35 = vmul.f32 %v761_v32, %v486_v23 }
  0xf7   : > { %1473 = vmatmul.msk.f32.gmra.mxu1 %vm609_vm2, %v796_v35  ;;  %1478 = vmatmul.msk.f32.gmra.mxu3 %vm609_vm2, %v801_v34 }
  0xfa   : > { %1459 = vmatmul.msk.f32.gmra.mxu0 %vm609_vm2, %v600_v36 }
  0xfc   : > { %v769_v41 = vpop.permute.xlu1 %768 }
  0xfd   : > { %v798_v42 = vmul.f32 %v769_v41, %v488_v33 }
  0xff   : > { %1474 = vmatmul.msk.f32.gmra.mxu1 %vm609_vm2, %v797_v40  ;;  %1479 = vmatmul.msk.f32.gmra.mxu3 %vm609_vm2, %v802_v39 }
 0x107   : > { %1475 = vmatmul.msk.f32.gmra.mxu1 %vm609_vm2, %v798_v42 }
 0x110   : > { %v1863_v43 = vpop.f32.mrf.mxu1 }
 0x111   : > { %v962_v29 = vsel %vm609_vm2, %v1863_v43, 0.0 }
 0x11f   : > { %v1865_v44 = vpop.f32.mrf.mxu0 }
 0x120   : > { %v1558_v45 = vpack.i.bf16 %v1863_v43, %v1865_v44  ;;  %v921_v9 = vsel %vm609_vm2, %v1865_v44, 0.0 }
 0x122   : > { %1559 = vxpose.xlu2.b32.start [1/16] (narrow) %v1558_v45, 32 }
 0x127   : > { %v1869_v46 = vpop.f32.mrf.mxu0 }
 0x128   : > { %v922_v6 = vsel %vm609_vm2, %v1869_v46, 0.0 }
 0x129   : > { %v923_v11 = vadd.f32 %v922_v6, %v921_v9 }
 0x12f   : > { %v1871_v47 = vpop.f32.mrf.mxu0 }
 0x130   : > { %v1873_v48 = vpop.f32.mrf.mxu1  ;;  %v924_v10 = vsel %vm609_vm2, %v1871_v47, 0.0 }
 0x131   : > { %v1560_v49 = vpack.i.bf16 %v1873_v48, %v1869_v46  ;;  %v925_v13 = vadd.f32 %v924_v10, %v923_v11  ;;  %v963_v25 = vsel %vm609_vm2, %v1873_v48, 0.0 }
 0x132   : > { %v964_v32 = vadd.f32 %v963_v25, %v962_v29 }
 0x133   : > { %1561 = vxpose.xlu2.b32.cont [2/16] (narrow) %v1560_v49, 32 }
 0x137   : > { %v1877_v50 = vpop.f32.mrf.mxu0 }
 0x138   : > { %v1879_v51 = vpop.f32.mrf.mxu1  ;;  %v926_v12 = vsel %vm609_vm2, %v1877_v50, 0.0 }
 0x139   : > { %v1562_v52 = vpack.i.bf16 %v1879_v51, %v1871_v47  ;;  %v927_v16 = vadd.f32 %v926_v12, %v925_v13  ;;  %v965_v30 = vsel %vm609_vm2, %v1879_v51, 0.0 }
 0x13a   : > { %v966_v37 = vadd.f32 %v965_v30, %v964_v32 }
 0x13b   : > { %1563 = vxpose.xlu2.b32.cont [3/16] (narrow) %v1562_v52, 32 }
 0x13f   : > { %v1883_v53 = vpop.f32.mrf.mxu0  ;;  %v1885_v54 = vpop.f32.mrf.mxu3 }
 0x140   : > { %v928_v15 = vsel %vm609_vm2, %v1883_v53, 0.0 }
 0x141   : > { %v929_v20 = vadd.f32 %v928_v15, %v927_v16 }
 0x142   : > { %v1887_v55 = vpop.f32.mrf.mxu1 }
 0x143   : > { %v1564_v56 = vpack.i.bf16 %v1887_v55, %v1877_v50  ;;  %v967_v35 = vsel %vm609_vm2, %v1887_v55, 0.0 }
 0x144   : > { %v968_v45 = vadd.f32 %v967_v35, %v966_v37 }
 0x145   : > { %1565 = vxpose.xlu2.b32.cont [4/16] (narrow) %v1564_v56, 32 }
 0x147   : > { %v1891_v57 = vpop.f32.mrf.mxu0  ;;  %v1893_v58 = vpop.f32.mrf.mxu3 }
 0x148   : > { %v930_v17 = vsel %vm609_vm2, %v1891_v57, 0.0  ;;  %v946_v13 = vsel %vm609_vm2, %v1893_v58, 0.0 }
 0x149   : > { %v931_v23 = vadd.f32 %v930_v17, %v929_v20 }
 0x14a   : > { %v1895_v59 = vpop.f32.mrf.mxu1 }
 0x14b   : > { %v1566_v60 = vpack.i.bf16 %v1895_v59, %v1883_v53  ;;  %v969_v40 = vsel %vm609_vm2, %v1895_v59, 0.0 }
 0x14d   : > { %1567 = vxpose.xlu2.b32.cont [5/16] (narrow) %v1566_v60, 32  ;;  %v970_v60 = vadd.f32 %v969_v40, %v968_v45  ;;  %v920_v45 = vld [vmem:[%s1734_s16] sm:$0x1] }
 0x14f   : > { %v1899_v61 = vpop.f32.mrf.mxu0  ;;  %v1901_v62 = vpop.f32.mrf.mxu3 }
 0x150   : > { %v932_v22 = vsel %vm609_vm2, %v1899_v61, 0.0 }
 0x151   : > { %v933_v26 = vadd.f32 %v932_v22, %v931_v23  ;;  %v948_v22 = vsel %vm609_vm2, %v1901_v62, 0.0 }
 0x152   : > { %v1903_v63 = vpop.f32.mrf.mxu1 }
 0x153   : > { %v1568_v0 = vpack.i.bf16 %v1903_v63, %v1891_v57  ;;  %v971_v49 = vsel %vm609_vm2, %v1903_v63, 0.0 }
 0x154   : > { %v972_v9 = vadd.f32 %v971_v49, %v970_v60 }
 0x155   : > { %1569 = vxpose.xlu2.b32.cont [6/16] (narrow) %v1568_v0, 32 }
 0x157   : > { %v1907_v1 = vpop.f32.mrf.mxu0  ;;  %v1909_v2 = vpop.f32.mrf.mxu3 }
 0x158   : > { %1037 = vmatpush.msra.mxu2 %v1909_v2  ;;  %v934_v24 = vsel %vm609_vm2, %v1907_v1, 0.0 }
 0x159   : > { %v935_v31 = vadd.f32 %v934_v24, %v933_v26 }
 0x15a   : > { %v1912_v3 = vpop.f32.mrf.mxu1  ;;  %1038 = vmatpush.msra.mxu2 %v1901_v62 }
 0x15b   : > { %v1570_v4 = vpack.i.bf16 %v1912_v3, %v1899_v61 }
 0x15c   : > { %1039 = vmatpush.msra.mxu2 %v1893_v58 }
 0x15d   : > { %1571 = vxpose.xlu2.b32.cont [7/16] (narrow) %v1570_v4, 32  ;;  %v973_v4 = vsel %vm609_vm2, %v1912_v3, 0.0 }
 0x15e   : > { %1040 = vmatpush.msra.mxu2 %v1885_v54  ;;  %v974_v15 = vadd.f32 %v973_v4, %v972_v9 }
 0x15f   : > { %v1919_v5 = vpop.f32.mrf.mxu0  ;;  %v1937_v18 = vpop.f32.mrf.mxu3 }
 0x160   : > { %v936_v28 = vsel %vm609_vm2, %v1919_v5, 0.0 }
 0x161   : > { %v937_v36 = vadd.f32 %v936_v28, %v935_v31 }
 0x162   : > { %v1923_v7 = vpop.f32.mrf.mxu1 }
 0x163   : > { %v1572_v8 = vpack.i.bf16 %v1923_v7, %v1907_v1  ;;  %v975_v11 = vsel %vm609_vm2, %v1923_v7, 0.0 }
 0x164   : > { %v976_v23 = vadd.f32 %v975_v11, %v974_v15  ;;  %v1074_v11 = vld [vmem:[%s1769_s28] sm:$0xff] }
 0x165   : > { %1573 = vxpose.xlu2.b32.cont [8/16] (narrow) %v1572_v8, 32  ;;  %v944_v8 = vsel %vm609_vm2, %v1885_v54, 0.0 }
 0x167   : > { %v702_v14 = vpop.f32.mrf.mxu0 }
 0x168   : > { %v938_v33 = vsel %vm609_vm2, %v702_v14, 0.0 }
 0x169   : > { %v939_v41 = vadd.f32 %v938_v33, %v937_v36 }
 0x16a   : > { %v1939_v19 = vpop.f32.mrf.mxu1 }
 0x16b   : > { %v1574_v21 = vpack.i.bf16 %v1939_v19, %v1919_v5  ;;  %v977_v17 = vsel %vm609_vm2, %v1939_v19, 0.0 }
 0x16c   : > { %v978_v26 = vadd.f32 %v977_v17, %v976_v23  ;;  %v1002_v17 = vld [vmem:[%s1764_s23 + $0x8] sm:$0xff] }
 0x16d   : > { %1575 = vxpose.xlu2.b32.cont [9/16] (narrow) %v1574_v21, 32 }
 0x16f   : > { %v705_v27 = vpop.f32.mrf.mxu0 }
 0x170   : > { %v940_v38 = vsel %vm609_vm2, %v705_v27, 0.0 }
 0x171   : > { %v941_v52 = vadd.f32 %v940_v38, %v939_v41 }
 0x172   : > { %v1956_v34 = vpop.f32.mrf.mxu3 }
 0x174   : > { %v1961_v39 = vpop.f32.mrf.mxu1 }
 0x175   : > { %v1576_v42 = vpack.i.bf16 %v1961_v39, %v702_v14  ;;  %v979_v24 = vsel %vm609_vm2, %v1961_v39, 0.0 }
 0x176   : > { %v980_v29 = vadd.f32 %v979_v24, %v978_v26 }
 0x177   : > { %1577 = vxpose.xlu2.b32.cont [10/16] (narrow) %v1576_v42, 32  ;;  %v708_v56 = vpop.f32.mrf.mxu0 }
 0x178   : > { %v942_v0 = vsel %vm609_vm2, %v708_v56, 0.0  ;;  %1041 = vmatpush.msra.mxu2 %v708_v56 }
 0x179   : > { %v943_v6 = vadd.f32 %v942_v0, %v941_v52 }
 0x17a   : > { %v1973_v10 = vpop.f32.mrf.mxu3  ;;  %1042 = vmatpush.msra.mxu2 %v705_v27 }
 0x17b   : > { %v945_v12 = vadd.f32 %v944_v8, %v943_v6  ;;  %v989_v42 = vsel %vm609_vm2, %v1973_v10, 0.0  ;;  %v961_v8 = vld [vmem:[%s1749_s10] sm:$0x1] }
 0x17c   : > { %v1979_v16 = vpop.f32.mrf.mxu1  ;;  %1043 = vmatpush.msra.mxu2 %v702_v14  ;;  %v950_v14 = vsel %vm609_vm2, %v1909_v2, 0.0 }
 0x17d   : > { %v947_v20 = vadd.f32 %v946_v13, %v945_v12  ;;  %v1578_v21 = vpack.i.bf16 %v1979_v16, %v705_v27  ;;  %v981_v27 = vsel %vm609_vm2, %v1979_v16, 0.0 }
 0x17e   : > { %1044 = vmatpush.msra.mxu2 %v1919_v5  ;;  %v982_v32 = vadd.f32 %v981_v27, %v980_v29 }
 0x17f   : > { %v949_v25 = vadd.f32 %v948_v22, %v947_v20  ;;  %1579 = vxpose.xlu2.b32.cont [11/16] (narrow) %v1578_v21, 32  ;;  %v1075_v20 = vld [vmem:[%s1769_s28 + $0x8] sm:$0xff] }
 0x180   : > { %1045 = vmatpush.msra.mxu2 %v1907_v1 }
 0x181   : > { %v951_v28 = vadd.f32 %v950_v14, %v949_v25  ;;  %v1003_v25 = vld [vmem:[%s1764_s23 + $0x10] sm:$0xff] }
 0x182   : > { %v1994_v30 = vpop.f32.mrf.mxu3  ;;  %1046 = vmatpush.msra.mxu2 %v1899_v61  ;;  %v985_v61 = vsel %vm609_vm2, %v1937_v18, 0.0  ;;  %v1076_v14 = vld [vmem:[%s1769_s28 + $0x10] sm:$0xff] }
 0x183   : > { %v952_v5 = vrot.slane %v951_v28, 4  ;;  %1078 = vmatpush.msra.mxu3 %v1994_v30 }
 0x184   : > { %v905_v31 = vpop.f32.mrf.mxu1  ;;  %1047 = vmatpush.msra.mxu2 %v1891_v57  ;;  %v987_v57 = vsel %vm609_vm2, %v1956_v34, 0.0 }
 0x185   : > { %v953_v33 = vadd.f32 %v952_v5, %v951_v28  ;;  %v983_v35 = vsel %vm609_vm2, %v905_v31, 0.0  ;;  %v1580_v1 = vpack.i.bf16 %v905_v31, %v708_v56  ;;  %1079 = vmatpush.msra.mxu3 %v1973_v10  ;;  %v991_v56 = vsel %vm609_vm2, %v1994_v30, 0.0  ;;  %v1077_v5 = vld [vmem:[%s1769_s28 + $0x18] sm:$0xff] }
 0x186   : > { %v984_v36 = vadd.f32 %v983_v35, %v982_v32  ;;  %1048 = vmatpush.msra.mxu2 %v1883_v53 }
 0x187   : > { %v954_v37 = vrot.slane %v953_v33, 2  ;;  %1080 = vmatpush.msra.mxu3 %v1956_v34  ;;  %1581 = vxpose.xlu2.b32.cont [12/16] (narrow) %v1580_v1, 32  ;;  %v1115_v1 = vld [vmem:[%s1774_s14] sm:$0xff] }
 0x188   : > { %v986_v38 = vadd.f32 %v985_v61, %v984_v36  ;;  %1049 = vmatpush.msra.mxu2 %v1877_v50  ;;  %v1582_v50 = vpack.i.bf16 %v1937_v18, %v1885_v54 }
 0x189   : > { %v955_v40 = vadd.f32 %v954_v37, %v953_v33  ;;  %1081 = vmatpush.msra.mxu3 %v1937_v18  ;;  %v1116_v37 = vld [vmem:[%s1774_s14 + $0x8] sm:$0xff] }
 0x18a   : > { %v988_v41 = vadd.f32 %v987_v57, %v986_v38  ;;  %1050 = vmatpush.msra.mxu2 %v1871_v47 }
 0x18b   : > { %v956_v53 = vrot.slane %v955_v40, 1  ;;  %1082 = vmatpush.msra.mxu3 %v905_v31 }
 0x18c   : > { %v990_v49 = vadd.f32 %v989_v42, %v988_v41  ;;  %1051 = vmatpush.msra.mxu2 %v1869_v46  ;;  %v1118_v42 = vld [vmem:[%s1774_s14 + $0x18] sm:$0xff] }
 0x18d   : > { %v957_v52 = vadd.f32 %v956_v53, %v955_v40  ;;  %1083 = vmatpush.msra.mxu3 %v1979_v16  ;;  %v1117_v40 = vld [vmem:[%s1774_s14 + $0x10] sm:$0xff] }
 0x18e   : > { %v992_v47 = vadd.f32 %v991_v56, %v990_v49  ;;  %1052 = vmatpush.msra.mxu2 %v1865_v44  ;;  %v1584_v44 = vpack.i.bf16 %v1956_v34, %v1893_v58 }
 0x18f   : > { %v958_v60 = vadd.f32 %v957_v52, %v920_v45  ;;  %1084 = vmatpush.msra.mxu3 %v1961_v39  ;;  %1583 = vxpose.xlu2.b32.cont [13/16] (narrow) %v1582_v50, 32 }
 0x190   : > { %v993_v0 = vrot.slane %v992_v47, 4  ;;  %1151 = vmatpush.msrb.mxu2 %v1994_v30 }
 0x191   : > { %960 = vst.msk [vmem:[%s1734_s16] sm:$0x1] %vm959_vm3, %v958_v60  ;;  %1085 = vmatpush.msra.mxu3 %v1939_v19 }
 0x192   : > { %v994_v46 = vadd.f32 %v993_v0, %v992_v47  ;;  %1152 = vmatpush.msrb.mxu2 %v1973_v10 }
 0x193   : > { %1086 = vmatpush.msra.mxu3 %v1923_v7 }
 0x194   : > { %v995_v54 = vrot.slane %v994_v46, 2  ;;  %1153 = vmatpush.msrb.mxu2 %v1956_v34  ;;  %v1586_v34 = vpack.i.bf16 %v1973_v10, %v1901_v62  ;;  %v1588_v62 = vpack.i.bf16 %v1994_v30, %v1909_v2  ;;  %v1001_v10 = vld [vmem:[%s1764_s23] sm:$0xff]  ;;  %v1004_v30 = vld [vmem:[%s1764_s23 + $0x18] sm:$0xff] }
 0x195   : > { %1087 = vmatpush.msra.mxu3 %v1912_v3 }
 0x196   : > { %v996_v4 = vadd.f32 %v995_v54, %v994_v46  ;;  %1154 = vmatpush.msrb.mxu2 %v1937_v18 }
 0x197   : > { %1088 = vmatpush.msra.mxu3 %v1903_v63  ;;  %1585 = vxpose.xlu2.b32.cont [14/16] (narrow) %v1584_v44, 32 }
 0x198   : > { %v997_v6 = vrot.slane %v996_v4, 1  ;;  %1155 = vmatpush.msrb.mxu2 %v905_v31 }
 0x199   : > { %1089 = vmatpush.msra.mxu3 %v1895_v59 }
 0x19a   : > { %v998_v9 = vadd.f32 %v997_v6, %v996_v4  ;;  %1156 = vmatpush.msrb.mxu2 %v1979_v16 }
 0x19b   : > { %1090 = vmatpush.msra.mxu3 %v1887_v55 }
 0x19c   : > { %v999_v58 = vadd.f32 %v998_v9, %v961_v8  ;;  %1157 = vmatpush.msrb.mxu2 %v1961_v39 }
 0x19d   : > { %1091 = vmatpush.msra.mxu3 %v1879_v51 }
 0x19e   : > { %1000 = vst.msk [vmem:[%s1749_s10] sm:$0x1] %vm959_vm3, %v999_v58  ;;  %1158 = vmatpush.msrb.mxu2 %v1939_v19 }
 0x19f   : > { %1092 = vmatpush.msra.mxu3 %v1873_v48  ;;  %1587 = vxpose.xlu2.b32.cont [15/16] (narrow) %v1586_v34, 32 }
 0x1a0   : > { %1159 = vmatpush.msrb.mxu2 %v1923_v7 }
 0x1a1   : > { %1093 = vmatpush.msra.mxu3 %v1863_v43 }
 0x1a2   : > { %1160 = vmatpush.msrb.mxu2 %v1912_v3 }
 0x1a4   : > { %1161 = vmatpush.msrb.mxu2 %v1903_v63 }
 0x1a6   : > { %1162 = vmatpush.msrb.mxu2 %v1895_v59 }
 0x1a7   : > { %1589 = vxpose.xlu2.b32.end [16/16] (narrow) %v1588_v62, 32 }
 0x1a8   : > { %1163 = vmatpush.msrb.mxu2 %v1887_v55 }
 0x1aa   : > { %1164 = vmatpush.msrb.mxu2 %v1879_v51 }
 0x1ac   : > { %1165 = vmatpush.msrb.mxu2 %v1873_v48 }
 0x1ae   : > { %1166 = vmatpush.msrb.mxu2 %v1863_v43 }
 0x1c8   : > { %v1590_v7 = vpop.trf.xlu2 }
 0x1c9   : > { %v1591_v18 = vunpack.i.l.bf16 %v1590_v7  ;;  %v1594_v43 = vunpack.i.h.bf16 %v1590_v7 }
 0x1cb   : > { %1053 = vmatmul.f32.vlgmr.msra.gmra.mxu2 %v1591_v18  ;;  %1094 = vmatmul.f32.vlgmr.msra.gmra.mxu3 %v1591_v18 }
 0x1d0   : > { %v1595_v3 = vpop.trf.xlu2 }
 0x1d1   : > { %v1596_v63 = vunpack.i.l.bf16 %v1595_v3  ;;  %v1599_v48 = vunpack.i.h.bf16 %v1595_v3 }
 0x1d3   : > { %1056 = vmatmul.f32.gmra.mxu2 %v1596_v63  ;;  %1097 = vmatmul.f32.gmra.mxu3 %v1596_v63 }
 0x1d8   : > { %v1600_v2 = vpop.trf.xlu2 }
 0x1d9   : > { %v1601_v59 = vunpack.i.l.bf16 %v1600_v2  ;;  %v1604_v19 = vunpack.i.h.bf16 %v1600_v2 }
 0x1db   : > { %1059 = vmatmul.f32.gmra.mxu2 %v1601_v59  ;;  %1100 = vmatmul.f32.gmra.mxu3 %v1601_v59 }
 0x1e0   : > { %v1605_v55 = vpop.trf.xlu2 }
 0x1e1   : > { %v1606_v51 = vunpack.i.l.bf16 %v1605_v55  ;;  %v1609_v39 = vunpack.i.h.bf16 %v1605_v55 }
 0x1e3   : > { %1062 = vmatmul.f32.gmra.mxu2 %v1606_v51  ;;  %1103 = vmatmul.f32.gmra.mxu3 %v1606_v51 }
 0x1eb   : > { %1167 = vmatmul.f32.vlgmr.msrb.gmra.mxu2 %v1594_v43 }
 0x1f3   : > { %1170 = vmatmul.f32.gmra.mxu2 %v1599_v48 }
 0x1fb   : > { %1173 = vmatmul.f32.gmra.mxu2 %v1604_v19 }
 0x203   : > { %1176 = vmatmul.f32.gmra.mxu2 %v1609_v39 }
 0x24e   : > { %v1054_v12 = vpop.f32.mrf.mxu2  ;;  %v1095_v13 = vpop.f32.mrf.mxu3 }
 0x24f   : > { %v1066_v15 = vadd.f32 %v1054_v12, %v1001_v10  ;;  %v1107_v16 = vadd.f32 %v1095_v13, %v1074_v11 }
 0x251   : > { %1070 = vst.msk [vmem:[%s1764_s23] sm:$0xff] %vm609_vm2, %v1066_v15 }
 0x252   : > { %1111 = vst.msk [vmem:[%s1769_s28] sm:$0xff] %vm609_vm2, %v1107_v16 }
 0x256   : > { %v1057_v21 = vpop.f32.mrf.mxu2  ;;  %v1098_v22 = vpop.f32.mrf.mxu3 }
 0x257   : > { %v1067_v23 = vadd.f32 %v1057_v21, %v1002_v17  ;;  %v1108_v24 = vadd.f32 %v1098_v22, %v1075_v20 }
 0x259   : > { %1071 = vst.msk [vmem:[%s1764_s23 + $0x8] sm:$0xff] %vm609_vm2, %v1067_v23 }
 0x25a   : > { %1112 = vst.msk [vmem:[%s1769_s28 + $0x8] sm:$0xff] %vm609_vm2, %v1108_v24 }
 0x25e   : > { %v1060_v26 = vpop.f32.mrf.mxu2  ;;  %v1101_v28 = vpop.f32.mrf.mxu3 }
 0x25f   : > { %v1068_v27 = vadd.f32 %v1060_v26, %v1003_v25  ;;  %v1109_v29 = vadd.f32 %v1101_v28, %v1076_v14 }
 0x261   : > { %1072 = vst.msk [vmem:[%s1764_s23 + $0x10] sm:$0xff] %vm609_vm2, %v1068_v27 }
 0x262   : > { %1113 = vst.msk [vmem:[%s1769_s28 + $0x10] sm:$0xff] %vm609_vm2, %v1109_v29 }
 0x266   : > { %v1063_v31 = vpop.f32.mrf.mxu2  ;;  %v1104_v32 = vpop.f32.mrf.mxu3 }
 0x267   : > { %v1069_v33 = vadd.f32 %v1063_v31, %v1004_v30  ;;  %v1110_v35 = vadd.f32 %v1104_v32, %v1077_v5 }
 0x269   : > { %1073 = vst.msk [vmem:[%s1764_s23 + $0x18] sm:$0xff] %vm609_vm2, %v1069_v33 }
 0x26a   : > { %1114 = vst.msk [vmem:[%s1769_s28 + $0x18] sm:$0xff] %vm609_vm2, %v1110_v35 }
 0x26e   : > { %v1168_v36 = vpop.f32.mrf.mxu2 }
 0x26f   : > { %v1180_v61 = vadd.f32 %v1168_v36, %v1115_v1 }
 0x271   : > { %1184 = vst.msk [vmem:[%s1774_s14] sm:$0xff] %vm609_vm2, %v1180_v61 }
 0x276   : > { %v1171_v38 = vpop.f32.mrf.mxu2 }
 0x277   : > { %v1181_v57 = vadd.f32 %v1171_v38, %v1116_v37 }
 0x279   : > { %1185 = vst.msk [vmem:[%s1774_s14 + $0x8] sm:$0xff] %vm609_vm2, %v1181_v57 }
 0x27e   : > { %v1174_v41 = vpop.f32.mrf.mxu2 }
 0x27f   : > { %v1182_v53 = vadd.f32 %v1174_v41, %v1117_v40 }
 0x281   : > { %1186 = vst.msk [vmem:[%s1774_s14 + $0x10] sm:$0xff] %vm609_vm2, %v1182_v53 }
 0x286   : > { %v1177_v45 = vpop.f32.mrf.mxu2 }
 0x287   : > { %v1183_v49 = vadd.f32 %v1177_v45, %v1118_v42 }
 0x289   : > { %1187 = vst.msk [vmem:[%s1774_s14 + $0x18] sm:$0xff] %vm609_vm2, %v1183_v49 }
 0x28a PF: > { %s19_s9 = sadd.s32 1, %s1648_s9   ;;  %s2122_s2 = sld [smem:[#allocation2_spill]] }
 0x28b   : > { %p16_p8 = scmp.ge.s32.totalorder %s19_s9, 6   ;;  %s2123_s3 = sld [smem:[#allocation3_spill]] }
 0x28c   : > { %s2124_s27 = smov %s1640_s29  ;;  %s2125_s28 = smov %s1644_s30 }
 0x28d   :  { %18 = sbr.rel (!%p16_p8) target bundleno = 4 (0x4), region = 127 }
 0x290   : > { %s2126_s29 = smov %s2122_s2 }
 0x291   : > { %s2127_s30 = smov %s2123_s3 }

// kernel: spatial_channel_attention_forward.9
= control target key start
LH: loop header
LB: loop body
LE: loop exit
PB: predicated region body
PF: predicated region fallthrough
CT: control target
= control target key end

     0   :  { %10 = vsyncpa [#allocation3], 0  ;;  %s1566_s0 = inlined_call_operand.vmem [shape: f32[2,16,16,32], index: 0, kind: input, shape index: {}]   ;;  %s1567_s1 = inlined_call_operand.vmem [shape: f32[2,16,16,2], index: 1, kind: input, shape index: {}]   ;;  %s1568_s2 = inlined_call_operand.vmem [shape: f32[2,32,32], index: 2, kind: input, shape index: {}]   ;;  %s1569_s3 = inlined_call_operand.vmem [shape: f32[2,32,32], index: 3, kind: input, shape index: {}]   ;;  %s1570_s4 = inlined_call_operand.vmem [shape: f32[1,32], index: 4, kind: input, shape index: {}]   ;;  %s1571_s5 = inlined_call_operand.hbm [shape: f32[2,16,16,32], index: 5, kind: output, shape index: {}]  }
   0x1   :  { %12 = vsyncpa [#allocation3 + $0x1], 0  ;;  %s1275_s18 = smov 0   ;;  %s1277_s19 = smov 0  }
   0x2   :  { %s1279_s20 = smov 0   ;;  %s1281_s21 = smov 0  }
   0x3   :  { %s1283_s22 = smov 0   ;;  %s1285_s23 = smov 0  }
   0x4   :  { %s1287_s24 = smov 0   ;;  %s1289_s25 = smov 0  }
   0x5 LB: > { %s980_s26 = sadd.s32 4294967295, %s1239_s25   ;;  %s981_s27 = sadd.s32 4294967294, %s1239_s25   ;;  %s1239_s25 = sphi %s1289_s25, %s18_s25   ;;  %s1235_s24 = sphi %s1287_s24, %s1580_s24   ;;  %s1231_s23 = sphi %s1285_s23, %s1579_s23   ;;  %s1227_s22 = sphi %s1283_s22, %s1578_s22   ;;  %s1223_s21 = sphi %s1281_s21, %s1577_s21   ;;  %s1219_s20 = sphi %s1279_s20, %s1576_s20   ;;  %s1215_s19 = sphi %s1277_s19, %s1575_s19   ;;  %s1211_s18 = sphi %s1275_s18, %s1574_s18  }
   0x6   : > { %s27_s28 = sadd.s32 1, %s1231_s23  ;;  %s30_s29 = sadd.s32 1, %s1235_s24 }
   0x7   : > { %p28_p0 = scmp.ge.s32.totalorder %s27_s28, 2  ;;  %p178_p1 = scmp.ne.s32.totalorder %s1219_s20, %s1215_s19 }
   0x8   : > { %p179_p2 = scmp.eq.s32.totalorder %s980_s26, 3  ;;  %p184_p5 = scmp.ne.s32.totalorder %s1215_s19, %s1211_s18 }
   0x9   : > { %s1582_s28 = smov (%p28_p0, %s27_s28), 0  ;;  %s1584_s29 = smov (!%p28_p0, %s30_s29), %s1235_s24 }
   0xa   : > { %s164_s30 = ssub.s32 %s1231_s23, %s1582_s28  ;;  %p1326_p3 = por %p179_p2, %p178_p1 }
   0xb   : > { %p32_p4 = scmp.ge.s32.totalorder %s1584_s29, 2  ;;  %p185_p6 = scmp.eq.s32.totalorder %s981_s27, 3 }
   0xc   : > { %p984_p7 = scmp.ge.s32.totalorder %s1239_s25, 1  ;;  %p250_p9 = scmp.lt.s32.totalorder %s1239_s25, 5 }
   0xd   : > { %s1586_s29 = smov (%p32_p4, %s1584_s29), 0  ;;  %p1335_p8 = por %p185_p6, %p184_p5 }
   0xe   : > { %s163_s8 = ssub.s32 %s1235_s24, %s1586_s29  ;;  %s168_s9 = sadd.s32 1, %s1219_s20 }
   0xf   : > { %s165_s10 = sor.u32 %s164_s30, %s163_s8  ;;  %p251_p10 = pnand %p984_p7, %p250_p9 }
  0x10   : > { %p166_p11 = scmp.eq.s32.totalorder %s165_s10, 0  ;;  %s986_s12 = sshll.u32 (!%p251_p10), %s1223_s21, 3 }
  0x11   : > { %254 = sbr.rel (%p251_p10) target bundleno = 386 (0x182), region = 40  ;;  %p304_p12 = scmp.lt.s32.totalorder (!%p251_p10), %s1227_s22, 1 }
  0x12   : > { %s1344_s11 = scalar_select %p166_p11, %s1219_s20, %s168_s9  }
  0x13   : > { %p306_p13 = scmp.lt.s32.totalorder (!%p251_p10), %s986_s12, 15 }
  0x16   : > { %v1241_v0 = vmov 0   ;;  %s305_s13 = scalar_select %p304_p12, %s1227_s22, 1  ;;  %v1242_v4 = vmov 1   ;;  %vm552_vm0 = vcmask 261120  }
  0x17   : > { %1125 = vset.pattern.permute.xlu1 %v1241_v0  ;;  %1123 = vset.pattern.permute.xlu0 %v1241_v0  ;;  %s1588_s12 = smov (!%p306_p13, %s986_s12), 15 }
  0x18   : > { %1127 = vset.pattern.permute.xlu2 %v1241_v0  ;;  %s1352_s14 = sshll.u32 %s305_s13, 5  ;;  %s987_s15 = sshll.u32 %s1588_s12, 1 }
  0x19   : > { %s1355_s16 = sadd.s32 %s1352_s14, %s987_s15  ;;  %s329_s10 = scalar_lea.vmem %s1568_s2, %s1352_s14 }
  0x1a   : > { %s989_s17 = sshll.u32 %s1355_s16, 3  ;;  %v467_v15 = vld [vmem:[%s329_s10 + $0x18] sm:$0xff]  ;;  %v466_v16 = vld [vmem:[%s329_s10 + $0x10] sm:$0xff]  ;;  %v465_v17 = vld [vmem:[%s329_s10 + $0x8] sm:$0xff]  ;;  %s334_s15 = scalar_lea.vmem %s1569_s3, %s1352_s14 }
  0x1b   : > { %s1363_s30 = scalar_lea.vmem %s1567_s1, %s989_s17  ;;  %726 = vmatpush.msra.mxu1 %v467_v15  ;;  %1044 = vmatpush.msra.mxu3 %v467_v15  ;;  %v464_v20 = vld [vmem:[%s329_s10] sm:$0xff]  ;;  %v551_v21 = vld [vmem:[%s334_s15 + $0x18] sm:$0xff]  ;;  %v550_v22 = vld [vmem:[%s334_s15 + $0x10] sm:$0xff]  ;;  %s1412_s27 = scalar_lea.vmem %s1566_s0, %s989_s17 }
  0x1c   : > { %v360_v1 = vld [vmem:[%s1363_s30 + $0x40] sm:$0xff]  ;;  %v361_v3 = vld [vmem:[%s1363_s30 + $0x48] sm:$0xff]  ;;  %v363_v5 = vld [vmem:[%s1363_s30 + $0x58] sm:$0xff]  ;;  %613 = vmatpush.msra.mxu0 %v551_v21  ;;  %1040 = vmatpush.msra.mxu2 %v551_v21  ;;  %s300_s16 = sand.u32 1, %s1215_s19   ;;  %s1039_s10 = sshll.u32 %s1223_s21, 4 }
  0x1d   : > { %v352_v2 = vld [vmem:[%s1363_s30] sm:$0xff]  ;;  %410 = vperm.xlu0 %1123, %v360_v1   ;;  %415 = vperm.xlu2 %1127, %v361_v3   ;;  %v353_v6 = vld [vmem:[%s1363_s30 + $0x8] sm:$0xff]  ;;  %v362_v7 = vld [vmem:[%s1363_s30 + $0x50] sm:$0xff]  ;;  %s985_s8 = sshll.u32 %s300_s16, 7  ;;  %s1033_s12 = sshll.u32 %s1227_s22, 5 }
  0x1e   : > { %370 = vperm.xlu1 %1125, %v352_v2   ;;  %v354_v8 = vld [vmem:[%s1363_s30 + $0x10] sm:$0xff]  ;;  %v356_v9 = vld [vmem:[%s1363_s30 + $0x20] sm:$0xff]  ;;  %v357_v10 = vld [vmem:[%s1363_s30 + $0x28] sm:$0xff]  ;;  %727 = vmatpush.msra.mxu1 %v466_v16  ;;  %s1471_s9 = scalar_lea.vmem [#allocation2], %s985_s8  ;;  %s844_s13 = sadd.s32 %s1039_s10, %s1033_s12 }
  0x1f   : > { %v355_v11 = vld [vmem:[%s1363_s30 + $0x18] sm:$0xff]  ;;  %v364_v12 = vld [vmem:[%s1363_s30 + $0x60] sm:$0xff]  ;;  %v365_v13 = vld [vmem:[%s1363_s30 + $0x68] sm:$0xff]  ;;  %1045 = vmatpush.msra.mxu3 %v466_v16  ;;  %614 = vmatpush.msra.mxu0 %v550_v22  ;;  %s847_s21 = sshll.u32 %s1471_s9, 4  ;;  %s832_s17 = scalar_lea.sflag [#allocation3], %s300_s16  ;;  %s848_s21 = int_to_ptr.vmem [resolvable:$true] %s847_s21 }
  0x20   : > { %v367_v14 = vld [vmem:[%s1363_s30 + $0x78] sm:$0xff]  ;;  %v366_v18 = vld [vmem:[%s1363_s30 + $0x70] sm:$0xff]  ;;  %728 = vmatpush.msra.mxu1 %v465_v17  ;;  %v549_v23 = vld [vmem:[%s334_s15 + $0x8] sm:$0xff]  ;;  %1041 = vmatpush.msra.mxu2 %v550_v22 }
  0x21   : > { %1046 = vmatpush.msra.mxu3 %v465_v17  ;;  %v358_v19 = vld [vmem:[%s1363_s30 + $0x30] sm:$0xff]  ;;  %615 = vmatpush.msra.mxu0 %v549_v23  ;;  %v548_v25 = vld [vmem:[%s334_s15] sm:$0xff]  ;;  %v359_v26 = vld [vmem:[%s1363_s30 + $0x38] sm:$0xff]  ;;  %s1034_s15 = sshll.u32 %s844_s13, 3  ;;  %s1165_s13 = scalar_lea.hbm %s1571_s5, 512 }
  0x22   : > { %729 = vmatpush.msra.mxu1 %v464_v20  ;;  %1042 = vmatpush.msra.mxu2 %v549_v23  ;;  %v336_v29 = vld [vmem:[%s1412_s27] sm:$0xff]  ;;  %v345_v35 = vld [vmem:[%s1412_s27 + $0x48] sm:$0xff]  ;;  %v338_v49 = vld [vmem:[%s1412_s27 + $0x10] sm:$0xff] }
  0x23   : > { %1047 = vmatpush.msra.mxu3 %v464_v20  ;;  %616 = vmatpush.msra.mxu0 %v548_v25  ;;  %v344_v30 = vld [vmem:[%s1412_s27 + $0x40] sm:$0xff]  ;;  %v337_v42 = vld [vmem:[%s1412_s27 + $0x8] sm:$0xff]  ;;  %v346_v51 = vld [vmem:[%s1412_s27 + $0x50] sm:$0xff] }
  0x24   : > { %1043 = vmatpush.msra.mxu2 %v548_v25  ;;  %v347_v57 = vld [vmem:[%s1412_s27 + $0x58] sm:$0xff]  ;;  %v350_v23 = vld [vmem:[%s1412_s27 + $0x70] sm:$0xff] }
  0x25   : > { %1124 = vset.pattern.permute.xlu0 %v1242_v4  ;;  %1128 = vset.pattern.permute.xlu2 %v1242_v4  ;;  %v339_v63 = vld [vmem:[%s1412_s27 + $0x18] sm:$0xff]  ;;  %v342_v25 = vld [vmem:[%s1412_s27 + $0x30] sm:$0xff] }
  0x26   : > { %1126 = vset.pattern.permute.xlu1 %v1242_v4  ;;  %501 = vperm.xlu0 %1124, %v360_v1  }
  0x27   : > { %469 = vperm.xlu1 %1126, %v352_v2   ;;  %505 = vperm.xlu2 %1128, %v361_v3  }
  0x2e   : > { %513 = vperm.xlu0 %1124, %v363_v5  }
  0x2f   : > { %1129 = vset.pattern.permute.xlu1 %v1241_v0  ;;  %473 = vperm.xlu2 %1128, %v353_v6  }
  0x30   : > { %375 = vperm.xlu1 %1129, %v353_v6  }
  0x36   : > { %1132 = vset.pattern.permute.xlu0 %v1241_v0 }
  0x37   : > { %420 = vperm.xlu0 %1132, %v362_v7   ;;  %1131 = vset.pattern.permute.xlu2 %v1241_v0 }
  0x38   : > { %1130 = vset.pattern.permute.xlu1 %v1242_v4  ;;  %380 = vperm.xlu2 %1131, %v354_v8  }
  0x39   : > { %509 = vperm.xlu1 %1130, %v362_v7   ;;  %v340_v7 = vld [vmem:[%s1412_s27 + $0x20] sm:$0xff] }
  0x3f   : > { %390 = vperm.xlu0 %1132, %v356_v9  }
  0x40   : > { %425 = vperm.xlu2 %1131, %v363_v5  }
  0x41   : > { %477 = vperm.xlu1 %1130, %v354_v8  }
  0x47   : > { %1137 = vset.pattern.permute.xlu0 %v1242_v4 }
  0x48   : > { %489 = vperm.xlu0 %1137, %v357_v10   ;;  %1134 = vset.pattern.permute.xlu2 %v1242_v4 }
  0x49   : > { %1133 = vset.pattern.permute.xlu1 %v1241_v0  ;;  %481 = vperm.xlu2 %1134, %v355_v11  }
  0x4a   : > { %385 = vperm.xlu1 %1133, %v355_v11  }
  0x50   : > { %1140 = vset.pattern.permute.xlu0 %v1241_v0 }
  0x51   : > { %517 = vperm.xlu2 %1134, %v364_v12   ;;  %445 = vperm.xlu0 %1140, %v367_v14  }
  0x52   : > { %430 = vperm.xlu1 %1133, %v364_v12   ;;  %v349_v12 = vld [vmem:[%s1412_s27 + $0x68] sm:$0xff] }
  0x59   : > { %1136 = vset.pattern.permute.xlu2 %v1241_v0  ;;  %1143 = vset.pattern.permute.xlu0 %v1242_v4 }
  0x5a   : > { %1135 = vset.pattern.permute.xlu1 %v1242_v4  ;;  %435 = vperm.xlu2 %1136, %v365_v13  }
  0x5b   : > { %485 = vperm.xlu1 %1135, %v356_v9  }
  0x62   : > { %395 = vperm.xlu2 %1136, %v357_v10  }
  0x63   : > { %521 = vperm.xlu1 %1135, %v365_v13   ;;  %v341_v13 = vld [vmem:[%s1412_s27 + $0x28] sm:$0xff] }
  0x6a   : > { %1139 = vset.pattern.permute.xlu2 %v1242_v4 }
  0x6b   : > { %1138 = vset.pattern.permute.xlu1 %v1241_v0  ;;  %525 = vperm.xlu2 %1139, %v366_v18  }
  0x6c   : > { %440 = vperm.xlu1 %1138, %v366_v18  }
  0x73   : > { %493 = vperm.xlu2 %1139, %v358_v19  }
  0x74   : > { %400 = vperm.xlu1 %1138, %v358_v19  }
  0x77   : > { %v416_v24 = vpop.permute.xlu2 %415 }
  0x78   : > { %v457_v37 = vmul.f32 %v416_v24, %v345_v35 }
  0x7b   : > { %1142 = vset.pattern.permute.xlu2 %v1241_v0  ;;  %v348_v0 = vld [vmem:[%s1412_s27 + $0x60] sm:$0xff] }
  0x7c   : > { %1141 = vset.pattern.permute.xlu1 %v1242_v4  ;;  %405 = vperm.xlu2 %1142, %v359_v26  }
  0x7d   : > { %529 = vperm.xlu1 %1141, %v367_v14  }
  0x81   : > { %v506_v27 = vpop.permute.xlu2 %505 }
  0x82   : > { %v541_v44 = vmul.f32 %v506_v27, %v345_v35 }
  0x85   : > { %497 = vperm.xlu1 %1141, %v359_v26  }
  0x89   : > { %v474_v28 = vpop.permute.xlu2 %473 }
  0x8a   : > { %v533_v45 = vmul.f32 %v474_v28, %v337_v42 }
  0x8f   : > { %v411_v32 = vpop.permute.xlu0 %410 }
  0x90   : > { %v371_v31 = vpop.permute.xlu1 %370  ;;  %v456_v34 = vmul.f32 %v411_v32, %v344_v30 }
  0x91   : > { %v448_v33 = vmul.f32 %v371_v31, %v336_v29  ;;  %v351_v31 = vld [vmem:[%s1412_s27 + $0x78] sm:$0xff] }
  0x92   : > { %1022 = vmatmul.msk.f32.vlgmr.msra.gmra.mxu3 %vm552_vm0, %v456_v34  ;;  %v381_v36 = vpop.permute.xlu2 %380 }
  0x93   : > { %1014 = vmatmul.msk.f32.vlgmr.msra.gmra.mxu1 %vm552_vm0, %v448_v33  ;;  %v450_v52 = vmul.f32 %v381_v36, %v338_v49  ;;  %v343_v36 = vld [vmem:[%s1412_s27 + $0x38] sm:$0xff]  ;;  %s846_s27 = scalar_lea.hbm %s1571_s5, %s1034_s15 }
  0x94   : > { %s849_s22 = sshll.u32 %s846_s27, 4  ;;  %s850_s22 = int_to_ptr.hbm [resolvable:$true] %s849_s22 }
  0x95   : > { %s1159_s30 = sshra.s32 %s850_s22, 4  ;;  %s1160_s30 = int_to_ptr.hbm [resolvable:$true] %s1159_s30 }
  0x96   : > { %s1161_s8 = scalar_lea.hbm %s1160_s30, 128  ;;  %p1166_p4 = scmp.lt.s32.totalorder %s1160_s30, %s1571_s5 }
  0x97   : > { %p1162_p0 = scmp.ne.s32.totalorder %s1160_s30, %s1161_s8  ;;  %p1167_p5 = scmp.lt.s32.totalorder %s1165_s13, %s1161_s8 }
  0x98   : > { %v502_v38 = vpop.permute.xlu0 %501 }
  0x99   : > { %v470_v39 = vpop.permute.xlu1 %469  ;;  %v540_v40 = vmul.f32 %v502_v38, %v344_v30  ;;  %p1163_p1 = pnand %p1162_p0, %p1326_p3  ;;  %p1168_p6 = por %p1167_p5, %p1166_p4 }
  0x9a   : > { %v532_v41 = vmul.f32 %v470_v39, %v336_v29  ;;  %1023 = vmatmul.msk.f32.gmra.mxu3 %vm552_vm0, %v457_v37  ;;  %v426_v43 = vpop.permute.xlu2 %425 }
  0x9b   : > { %1006 = vmatmul.msk.f32.vlgmr.msra.gmra.mxu2 %vm552_vm0, %v540_v40  ;;  %v459_v58 = vmul.f32 %v426_v43, %v347_v57  ;;  %p1164_p2 = pneg %p1163_p1 }
  0x9c   : > { %998 = vmatmul.msk.f32.vlgmr.msra.gmra.mxu0 %vm552_vm0, %v532_v41 }
  0x9d   : > { %p1169_p7 = pnand %p1168_p6, %p1164_p2 }
  0xa0   : > { %v514_v46 = vpop.permute.xlu0 %513 }
  0xa1   : > { %v543_v60 = vmul.f32 %v514_v46, %v347_v57 }
  0xa2   : > { %v376_v47 = vpop.permute.xlu1 %375 }
  0xa3   : > { %v449_v48 = vmul.f32 %v376_v47, %v337_v42  ;;  %1007 = vmatmul.msk.f32.gmra.mxu2 %vm552_vm0, %v541_v44  ;;  %v482_v50 = vpop.permute.xlu2 %481  ;;  %v1466_v42 = vld [vmem:[%s1570_s4] ss:$0 sm:$0xff] }
  0xa4   : > { %999 = vmatmul.msk.f32.gmra.mxu0 %vm552_vm0, %v533_v45  ;;  %v535_v1 = vmul.f32 %v482_v50, %v339_v63 }
  0xa5   : > { %1015 = vmatmul.msk.f32.gmra.mxu1 %vm552_vm0, %v449_v48 }
  0xa9   : > { %v421_v53 = vpop.permute.xlu0 %420 }
  0xaa   : > { %v458_v54 = vmul.f32 %v421_v53, %v346_v51 }
  0xab   : > { %v510_v55 = vpop.permute.xlu1 %509  ;;  %v518_v59 = vpop.permute.xlu2 %517 }
  0xac   : > { %v542_v56 = vmul.f32 %v510_v55, %v346_v51  ;;  %1024 = vmatmul.msk.f32.gmra.mxu3 %vm552_vm0, %v458_v54  ;;  %v544_v2 = vmul.f32 %v518_v59, %v348_v0 }
  0xad   : > { %1016 = vmatmul.msk.f32.gmra.mxu1 %vm552_vm0, %v450_v52 }
  0xae   : > { %1008 = vmatmul.msk.f32.gmra.mxu2 %vm552_vm0, %v542_v56 }
  0xb1   : > { %v391_v6 = vpop.permute.xlu0 %390 }
  0xb2   : > { %v452_v8 = vmul.f32 %v391_v6, %v340_v7 }
  0xb3   : > { %v478_v61 = vpop.permute.xlu1 %477 }
  0xb4   : > { %v534_v62 = vmul.f32 %v478_v61, %v338_v49  ;;  %1025 = vmatmul.msk.f32.gmra.mxu3 %vm552_vm0, %v459_v58  ;;  %v436_v3 = vpop.permute.xlu2 %435 }
  0xb5   : > { %v461_v14 = vmul.f32 %v436_v3, %v349_v12 }
  0xb6   : > { %1000 = vmatmul.msk.f32.gmra.mxu0 %vm552_vm0, %v534_v62  ;;  %1009 = vmatmul.msk.f32.gmra.mxu2 %vm552_vm0, %v543_v60 }
  0xba   : > { %v490_v19 = vpop.permute.xlu0 %489 }
  0xbb   : > { %v537_v20 = vmul.f32 %v490_v19, %v341_v13 }
  0xbc   : > { %v386_v4 = vpop.permute.xlu1 %385  ;;  %v396_v11 = vpop.permute.xlu2 %395 }
  0xbd   : > { %v451_v5 = vmul.f32 %v386_v4, %v339_v63  ;;  %v453_v15 = vmul.f32 %v396_v11, %v341_v13 }
  0xbe   : > { %1001 = vmatmul.msk.f32.gmra.mxu0 %vm552_vm0, %v535_v1  ;;  %1010 = vmatmul.msk.f32.gmra.mxu2 %vm552_vm0, %v544_v2 }
  0xbf   : > { %1017 = vmatmul.msk.f32.gmra.mxu1 %vm552_vm0, %v451_v5 }
  0xc3   : > { %v446_v30 = vpop.permute.xlu0 %445 }
  0xc4   : > { %v431_v9 = vpop.permute.xlu1 %430  ;;  %v463_v32 = vmul.f32 %v446_v30, %v351_v31 }
  0xc5   : > { %v460_v10 = vmul.f32 %v431_v9, %v348_v0  ;;  %v526_v18 = vpop.permute.xlu2 %525 }
  0xc6   : > { %v546_v26 = vmul.f32 %v526_v18, %v350_v23 }
  0xc7   : > { %1026 = vmatmul.msk.f32.gmra.mxu3 %vm552_vm0, %v460_v10  ;;  %1018 = vmatmul.msk.f32.gmra.mxu1 %vm552_vm0, %v452_v8 }
  0xcd   : > { %v486_v16 = vpop.permute.xlu1 %485  ;;  %v494_v24 = vpop.permute.xlu2 %493 }
  0xce   : > { %v536_v17 = vmul.f32 %v486_v16, %v340_v7  ;;  %v538_v27 = vmul.f32 %v494_v24, %v342_v25 }
  0xcf   : > { %1019 = vmatmul.msk.f32.gmra.mxu1 %vm552_vm0, %v453_v15  ;;  %1027 = vmatmul.msk.f32.gmra.mxu3 %vm552_vm0, %v461_v14 }
  0xd0   : > { %1002 = vmatmul.msk.f32.gmra.mxu0 %vm552_vm0, %v536_v17 }
  0xd5   : > { %v522_v21 = vpop.permute.xlu1 %521 }
  0xd6   : > { %v545_v22 = vmul.f32 %v522_v21, %v349_v12  ;;  %v406_v35 = vpop.permute.xlu2 %405 }
  0xd7   : > { %v455_v37 = vmul.f32 %v406_v35, %v343_v36 }
  0xd8   : > { %1003 = vmatmul.msk.f32.gmra.mxu0 %vm552_vm0, %v537_v20  ;;  %1011 = vmatmul.msk.f32.gmra.mxu2 %vm552_vm0, %v545_v22 }
  0xde   : > { %v441_v28 = vpop.permute.xlu1 %440 }
  0xdf   : > { %v462_v29 = vmul.f32 %v441_v28, %v350_v23 }
  0xe0   : > { %1012 = vmatmul.msk.f32.gmra.mxu2 %vm552_vm0, %v546_v26  ;;  %1004 = vmatmul.msk.f32.gmra.mxu0 %vm552_vm0, %v538_v27 }
  0xe1   : > { %1028 = vmatmul.msk.f32.gmra.mxu3 %vm552_vm0, %v462_v29 }
  0xe6   : > { %v401_v33 = vpop.permute.xlu1 %400 }
  0xe7   : > { %v454_v34 = vmul.f32 %v401_v33, %v342_v25 }
  0xe9   : > { %1020 = vmatmul.msk.f32.gmra.mxu1 %vm552_vm0, %v454_v34  ;;  %1029 = vmatmul.msk.f32.gmra.mxu3 %vm552_vm0, %v463_v32 }
  0xef   : > { %v530_v38 = vpop.permute.xlu1 %529 }
  0xf0   : > { %v547_v39 = vmul.f32 %v530_v38, %v351_v31 }
  0xf1   : > { %1021 = vmatmul.msk.f32.gmra.mxu1 %vm552_vm0, %v455_v37 }
  0xf2   : > { %1013 = vmatmul.msk.f32.gmra.mxu2 %vm552_vm0, %v547_v39 }
  0xf7   : > { %v498_v40 = vpop.permute.xlu1 %497 }
  0xf8   : > { %v539_v41 = vmul.f32 %v498_v40, %v343_v36 }
  0xfa   : > { %1005 = vmatmul.msk.f32.gmra.mxu0 %vm552_vm0, %v539_v41 }
 0x110   : > { %v731_v43 = vpop.f32.mrf.mxu1 }
 0x115   : > { %v755_v47 = vpop.f32.mrf.mxu3 }
 0x119   : > { %v618_v44 = vpop.f32.mrf.mxu0 }
 0x11a   : > { %v732_v45 = vadd.f32 %v731_v43, %v618_v44 }
 0x11c   : > { %v783_v46 = vadd.f32 %v1466_v42, %v732_v45 }
 0x11d   : > { %v758_v57 = vpop.f32.mrf.mxu3 }
 0x11e   : > { %v799_v48 = vmax.f32 %v783_v46, 0.0  ;;  %v642_v49 = vpop.f32.mrf.mxu2 }
 0x11f   : > { %v756_v50 = vadd.f32 %v755_v47, %v642_v49 }
 0x120   : > { %815 = vst.msk [vmem:[%s1471_s9] sm:$0xff] %vm552_vm0, %v799_v48 }
 0x121   : > { %v621_v51 = vpop.f32.mrf.mxu0  ;;  %v791_v52 = vadd.f32 %v1466_v42, %v756_v50 }
 0x122   : > { %v734_v53 = vpop.f32.mrf.mxu1 }
 0x123   : > { %v735_v54 = vadd.f32 %v734_v53, %v621_v51  ;;  %v807_v55 = vmax.f32 %v791_v52, 0.0 }
 0x125   : > { %v784_v56 = vadd.f32 %v1466_v42, %v735_v54  ;;  %823 = vst.msk [vmem:[%s1471_s9 + $0x40] sm:$0xff] %vm552_vm0, %v807_v55 }
 0x126   : > { %v645_v59 = vpop.f32.mrf.mxu2 }
 0x127   : > { %v800_v58 = vmax.f32 %v784_v56, 0.0  ;;  %v759_v60 = vadd.f32 %v758_v57, %v645_v59 }
 0x129   : > { %816 = vst.msk [vmem:[%s1471_s9 + $0x8] sm:$0xff] %vm552_vm0, %v800_v58  ;;  %v792_v61 = vadd.f32 %v1466_v42, %v759_v60 }
 0x12a   : > { %v737_v1 = vpop.f32.mrf.mxu1 }
 0x12b   : > { %v808_v62 = vmax.f32 %v792_v61, 0.0 }
 0x12d   : > { %824 = vst.msk [vmem:[%s1471_s9 + $0x48] sm:$0xff] %vm552_vm0, %v808_v62 }
 0x12f   : > { %v761_v63 = vpop.f32.mrf.mxu3 }
 0x131   : > { %v648_v0 = vpop.f32.mrf.mxu2 }
 0x132   : > { %v762_v2 = vadd.f32 %v761_v63, %v648_v0 }
 0x133   : > { %v624_v3 = vpop.f32.mrf.mxu0 }
 0x134   : > { %v793_v4 = vadd.f32 %v1466_v42, %v762_v2  ;;  %v738_v5 = vadd.f32 %v737_v1, %v624_v3 }
 0x136   : > { %v809_v6 = vmax.f32 %v793_v4, 0.0  ;;  %v785_v7 = vadd.f32 %v1466_v42, %v738_v5 }
 0x137   : > { %v764_v9 = vpop.f32.mrf.mxu3 }
 0x138   : > { %825 = vst.msk [vmem:[%s1471_s9 + $0x50] sm:$0xff] %vm552_vm0, %v809_v6  ;;  %v801_v8 = vmax.f32 %v785_v7, 0.0 }
 0x139   : > { %v651_v10 = vpop.f32.mrf.mxu2 }
 0x13a   : > { %817 = vst.msk [vmem:[%s1471_s9 + $0x10] sm:$0xff] %vm552_vm0, %v801_v8  ;;  %v765_v11 = vadd.f32 %v764_v9, %v651_v10 }
 0x13b   : > { %v627_v12 = vpop.f32.mrf.mxu0 }
 0x13c   : > { %v794_v13 = vadd.f32 %v1466_v42, %v765_v11  ;;  %v740_v14 = vpop.f32.mrf.mxu1 }
 0x13d   : > { %v741_v15 = vadd.f32 %v740_v14, %v627_v12 }
 0x13e   : > { %v810_v16 = vmax.f32 %v794_v13, 0.0 }
 0x13f   : > { %v786_v17 = vadd.f32 %v1466_v42, %v741_v15 }
 0x140   : > { %826 = vst.msk [vmem:[%s1471_s9 + $0x58] sm:$0xff] %vm552_vm0, %v810_v16 }
 0x141   : > { %v802_v18 = vmax.f32 %v786_v17, 0.0  ;;  %v654_v19 = vpop.f32.mrf.mxu2 }
 0x143   : > { %818 = vst.msk [vmem:[%s1471_s9 + $0x18] sm:$0xff] %vm552_vm0, %v802_v18 }
 0x144   : > { %v743_v21 = vpop.f32.mrf.mxu1 }
 0x14a   : > { %v767_v20 = vpop.f32.mrf.mxu3 }
 0x14b   : > { %v768_v22 = vadd.f32 %v767_v20, %v654_v19 }
 0x14c   : > { %v746_v29 = vpop.f32.mrf.mxu1 }
 0x14d   : > { %v795_v23 = vadd.f32 %v1466_v42, %v768_v22  ;;  %v630_v24 = vpop.f32.mrf.mxu0 }
 0x14e   : > { %v744_v25 = vadd.f32 %v743_v21, %v630_v24 }
 0x14f   : > { %v811_v26 = vmax.f32 %v795_v23, 0.0 }
 0x150   : > { %v787_v27 = vadd.f32 %v1466_v42, %v744_v25 }
 0x151   : > { %827 = vst.msk [vmem:[%s1471_s9 + $0x60] sm:$0xff] %vm552_vm0, %v811_v26 }
 0x152   : > { %v803_v28 = vmax.f32 %v787_v27, 0.0  ;;  %v770_v33 = vpop.f32.mrf.mxu3 }
 0x154   : > { %819 = vst.msk [vmem:[%s1471_s9 + $0x20] sm:$0xff] %vm552_vm0, %v803_v28 }
 0x155   : > { %v633_v30 = vpop.f32.mrf.mxu0 }
 0x156   : > { %v747_v31 = vadd.f32 %v746_v29, %v633_v30 }
 0x158   : > { %v788_v32 = vadd.f32 %v1466_v42, %v747_v31 }
 0x15a   : > { %v804_v34 = vmax.f32 %v788_v32, 0.0 }
 0x15b   : > { %v657_v35 = vpop.f32.mrf.mxu2 }
 0x15c   : > { %820 = vst.msk [vmem:[%s1471_s9 + $0x28] sm:$0xff] %vm552_vm0, %v804_v34  ;;  %v771_v36 = vadd.f32 %v770_v33, %v657_v35 }
 0x15d   : > { %v636_v41 = vpop.f32.mrf.mxu0 }
 0x15e   : > { %v796_v37 = vadd.f32 %v1466_v42, %v771_v36 }
 0x160   : > { %v812_v38 = vmax.f32 %v796_v37, 0.0 }
 0x162   : > { %828 = vst.msk [vmem:[%s1471_s9 + $0x68] sm:$0xff] %vm552_vm0, %v812_v38 }
 0x163   : > { %v660_v39 = vpop.f32.mrf.mxu2 }
 0x164   : > { %v773_v40 = vpop.f32.mrf.mxu3 }
 0x165   : > { %v774_v43 = vadd.f32 %v773_v40, %v660_v39 }
 0x166   : > { %v749_v44 = vpop.f32.mrf.mxu1 }
 0x167   : > { %v797_v45 = vadd.f32 %v1466_v42, %v774_v43  ;;  %v750_v46 = vadd.f32 %v749_v44, %v636_v41 }
 0x169   : > { %v813_v47 = vmax.f32 %v797_v45, 0.0  ;;  %v789_v48 = vadd.f32 %v1466_v42, %v750_v46 }
 0x16b   : > { %829 = vst.msk [vmem:[%s1471_s9 + $0x70] sm:$0xff] %vm552_vm0, %v813_v47  ;;  %v805_v49 = vmax.f32 %v789_v48, 0.0 }
 0x16c   : > { %v776_v50 = vpop.f32.mrf.mxu3 }
 0x16d   : > { %821 = vst.msk [vmem:[%s1471_s9 + $0x30] sm:$0xff] %vm552_vm0, %v805_v49 }
 0x16e   : > { %v752_v52 = vpop.f32.mrf.mxu1 }
 0x175   : > { %v663_v51 = vpop.f32.mrf.mxu2 }
 0x176   : > { %v777_v53 = vadd.f32 %v776_v50, %v663_v51 }
 0x177   : > { %v639_v54 = vpop.f32.mrf.mxu0 }
 0x178   : > { %v798_v55 = vadd.f32 %v1466_v42, %v777_v53  ;;  %v753_v56 = vadd.f32 %v752_v52, %v639_v54 }
 0x17a   : > { %v814_v57 = vmax.f32 %v798_v55, 0.0  ;;  %v790_v58 = vadd.f32 %v1466_v42, %v753_v56 }
 0x17c   : > { %830 = vst.msk [vmem:[%s1471_s9 + $0x78] sm:$0xff] %vm552_vm0, %v814_v57  ;;  %v806_v59 = vmax.f32 %v790_v58, 0.0 }
 0x17e   : > { %822 = vst.msk [vmem:[%s1471_s9 + $0x38] sm:$0xff] %vm552_vm0, %v806_v59 }
 0x17f   : > { %1172 = shalt.err (!%p1169_p7)
}
 0x180   : > { %s1243_s16 = smov 128   ;;  %s1244_s9 = smov 8  }
 0x181   : > { %1048 = dma.vmem_to_hbm [thread:$0]  (%p1326_p3), %s848_s21, 2048, %s850_s22, %s832_s17, %s1243_s16, %s1243_s16, %s1244_s9  }
 0x182 PF: > { %p1054_p9 = scmp.ge.s32.totalorder %s1239_s25, 2  ;;  %s864_s26 = sand.u32 1, %s1211_s18  }
 0x183   : > { %s865_s27 = scalar_lea.sflag [#allocation3], %s864_s26 }
 0x184   : > { %p1051_p10 = pnand %p1054_p9, %p1335_p8 }
 0x186   : > { %p1052_p11 = pneg %p1051_p10 }
 0x188   : > { %1206 = dma.done.wait (%p1052_p11), %s865_s27, 2048  }
 0x189   : > { %1208 = vsyncadd (%p1052_p11), %s865_s27, 4294965248  ;;  %s18_s25 = sadd.s32 1, %s1239_s25   ;;  %s1574_s18 = smov %s1215_s19 }
 0x18a   : > { %p15_p12 = scmp.ge.s32.totalorder %s18_s25, 6   ;;  %s1575_s19 = smov %s1219_s20 }
 0x18b   : > { %s1576_s20 = smov %s1344_s11  ;;  %s1577_s21 = smov %s1231_s23 }
 0x18c   : > { %s1578_s22 = smov %s1235_s24  ;;  %s1579_s23 = smov %s1582_s28 }
 0x18d   : > { %s1580_s24 = smov %s1586_s29  ;;  %17 = sbr.rel (!%p15_p12) target bundleno = 5 (0x5), region = 84 }
 0x192   :  { %871 = vsyncpa [#allocation3], 1 }
 0x193   :  { %873 = vsyncpa [#allocation3 + $0x1], 1 }

</bundles_post_ra>
